<compile_context>
chip_gen: v5e
topology: v5e:2x2
jax: 0.10.0
libtpu: 0.0.40
codegen_flags: <defaults>
</compile_context>

<pallas_src>
import jax
import jax.numpy as jnp
from jax.experimental import pallas as pl
from jax.experimental.pallas import tpu as pltpu

LANE = 128
SUBLANE = 8


def _round_up(n, m):
    return ((n + m - 1) // m) * m


def mlp_kernel(x_ref, w1_ref, b1_ref, w2_ref, b2_ref, w3_ref, b3_ref, o_ref):
    # Layer 1: Linear(input_size, 512) + ReLU  (bf16 MXU inputs, f32 accumulate)
    x = x_ref[...]
    h1 = jnp.dot(x, w1_ref[...], preferred_element_type=jnp.float32) + b1_ref[...]
    h1 = jnp.maximum(h1, 0.0)
    # Layer 2: Linear(512, 512) + ReLU
    h2 = jnp.dot(h1.astype(jnp.bfloat16), w2_ref[...],
                 preferred_element_type=jnp.float32) + b2_ref[...]
    h2 = jnp.maximum(h2, 0.0)
    # Layer 3: Linear(512, num_pad)  (classes padded to 128; padded cols bias = -1e30)
    logits = jnp.dot(h2.astype(jnp.bfloat16), w3_ref[...],
                     preferred_element_type=jnp.float32) + b3_ref[...]
    # Numerically-stable softmax over the class dim (same as nn.Softmax on 2-D input).
    m = jnp.max(logits, axis=-1, keepdims=True)
    e = jnp.exp(logits - m)
    denom = jnp.sum(e, axis=-1, keepdims=True)
    o_ref[...] = e * pl.reciprocal(denom, approx=True)


def mlp_forward(x_nchw, params, *, block_b=512):
    w1, b1, w2, b2, w3, b3 = params
    B = x_nchw.shape[0]
    x = x_nchw.reshape(B, -1).astype(jnp.float32)   # torch.nn.Flatten()
    input_size = x.shape[1]
    hidden = w1.shape[1]
    num_size = w3.shape[1]
    num_pad = _round_up(num_size, LANE)

    # Batch tile: multiple of 8 sublanes, capped at block_b; pad batch to fill tiles.
    tb = min(block_b, _round_up(B, SUBLANE))
    b_pad = _round_up(B, tb)
    if b_pad != B:
        x = jnp.pad(x, ((0, b_pad - B), (0, 0)))

    # bf16 operands for the MXU (accumulation stays f32 inside the kernel).
    x_bf = x.astype(jnp.bfloat16)
    w1_bf = w1.astype(jnp.bfloat16)
    w2_bf = w2.astype(jnp.bfloat16)
    # Pad layer-3 weights/bias to lane-dense 128 classes; padded columns get a huge
    # negative bias so exp(.) underflows to 0 and they never affect the softmax.
    w3_bf = jnp.pad(w3, ((0, 0), (0, num_pad - num_size))).astype(jnp.bfloat16)
    b3_f = jnp.pad(b3.astype(jnp.float32), ((0, 0), (0, num_pad - num_size)),
                   constant_values=-1e30)
    b1_f = b1.astype(jnp.float32)
    b2_f = b2.astype(jnp.float32)

    # Weights/biases: constant index_map -> stay resident across batch-grid steps.
    resident = lambda shape: pl.BlockSpec(shape, lambda i: (0, 0))

    # NOTE: for very large input_size on v7x (64 MiB VMEM), layer 1 should also be
    # K-tiled with an f32 accumulator; not needed at these sizes.
    out = pl.pallas_call(
        mlp_kernel,
        out_shape=jax.ShapeDtypeStruct((b_pad, num_pad), jnp.float32),
        grid=(b_pad // tb,),
        in_specs=[
            pl.BlockSpec((tb, input_size), lambda i: (i, 0)),
            resident((input_size, hidden)),
            resident((1, hidden)),
            resident((hidden, hidden)),
            resident((1, hidden)),
            resident((hidden, num_pad)),
            resident((1, num_pad)),
        ],
        out_specs=pl.BlockSpec((tb, num_pad), lambda i: (i, 0)),
        compiler_params=pltpu.CompilerParams(
            dimension_semantics=("parallel",),
            vmem_limit_bytes=48 << 20,
        ),
    )(x_bf, w1_bf, b1_f, w2_bf, b2_f, w3_bf, b3_f)

    return out[:B, :num_size]


def mlp_reference(x_nchw, params):
    w1, b1, w2, b2, w3, b3 = params
    x = x_nchw.reshape(x_nchw.shape[0], -1)
    h1 = jnp.maximum(x @ w1 + b1, 0.0)
    h2 = jnp.maximum(h1 @ w2 + b2, 0.0)
    logits = h2 @ w3 + b3
    return jax.nn.softmax(logits, axis=-1)


def init_params(key, input_size, num_size, hidden=512):
    k1, k2, k3, k4, k5, k6 = jax.random.split(key, 6)
    scale1 = 1.0 / jnp.sqrt(input_size)
    scale2 = 1.0 / jnp.sqrt(hidden)
    w1 = jax.random.uniform(k1, (input_size, hidden), jnp.float32, -scale1, scale1)
    b1 = jax.random.uniform(k2, (1, hidden), jnp.float32, -scale1, scale1)
    w2 = jax.random.uniform(k3, (hidden, hidden), jnp.float32, -scale2, scale2)
    b2 = jax.random.uniform(k4, (1, hidden), jnp.float32, -scale2, scale2)
    w3 = jax.random.uniform(k5, (hidden, num_size), jnp.float32, -scale2, scale2)
    b3 = jax.random.uniform(k6, (1, num_size), jnp.float32, -scale2, scale2)
    return (w1, b1, w2, b2, w3, b3)


if __name__ == "__main__":
    key = jax.random.PRNGKey(0)
    kx, kp = jax.random.split(key)

    # Small example: x of shape [2, 4, 16, 16] -> input_size = 4*16*16 = 1024
    B, C, H, W = 2, 4, 16, 16
    input_size = C * H * W
    num_size = 10

    x = jax.random.normal(kx, (B, C, H, W), jnp.float32)
    params = init_params(kp, input_size, num_size)

    out = mlp_forward(x, params)
    out = jax.block_until_ready(out)

    # sanity: shape, softmax rows ~sum to 1, matches f32 reference within bf16 tolerance
    assert out.shape == (B, num_size)
    assert jnp.allclose(jnp.sum(out, axis=-1), 1.0, atol=1e-2)
    ref = mlp_reference(x, params)
    assert jnp.allclose(out, ref, atol=2e-2, rtol=2e-2)
    print("KERNEL_OK")
</pallas_src>

<mosaic_0001>
module attributes {stable_mosaic.version = 11 : i64} {
  func.func @mlp_kernel(%arg0: i32, %arg1: memref<8x1024xbf16, #tpu.memory_space<vmem>>, %arg2: memref<1024x512xbf16, #tpu.memory_space<vmem>>, %arg3: memref<1x512xf32, #tpu.memory_space<vmem>>, %arg4: memref<512x512xbf16, #tpu.memory_space<vmem>>, %arg5: memref<1x512xf32, #tpu.memory_space<vmem>>, %arg6: memref<512x128xbf16, #tpu.memory_space<vmem>>, %arg7: memref<1x128xf32, #tpu.memory_space<vmem>>, %arg8: memref<8x128xf32, #tpu.memory_space<vmem>>) attributes {dimension_semantics = [#tpu.dimension_semantics<parallel>], iteration_bounds = array<i64: 1>, scalar_prefetch = 0 : i64, scratch_operands = 0 : i64, tpu.core_type = #tpu.core_type<tc>, window_params = [{transform_indices = @transform_0, window_bounds = array<i64: 8, 1024>}, {pipeline_mode = #tpu.pipeline_mode<synchronous>, transform_indices = @transform_1, window_bounds = array<i64: 1024, 512>}, {pipeline_mode = #tpu.pipeline_mode<synchronous>, transform_indices = @transform_2, window_bounds = array<i64: 1, 512>}, {pipeline_mode = #tpu.pipeline_mode<synchronous>, transform_indices = @transform_3, window_bounds = array<i64: 512, 512>}, {pipeline_mode = #tpu.pipeline_mode<synchronous>, transform_indices = @transform_4, window_bounds = array<i64: 1, 512>}, {pipeline_mode = #tpu.pipeline_mode<synchronous>, transform_indices = @transform_5, window_bounds = array<i64: 512, 128>}, {pipeline_mode = #tpu.pipeline_mode<synchronous>, transform_indices = @transform_6, window_bounds = array<i64: 1, 128>}, {transform_indices = @transform_7, window_bounds = array<i64: 8, 128>}]} {
    %c0 = arith.constant 0 : index
    %c0_0 = arith.constant 0 : index
    %0 = vector.load %arg1[%c0, %c0_0] : memref<8x1024xbf16, #tpu.memory_space<vmem>>, vector<8x1024xbf16>
    %c0_1 = arith.constant 0 : index
    %c0_2 = arith.constant 0 : index
    %1 = vector.load %arg2[%c0_1, %c0_2] : memref<1024x512xbf16, #tpu.memory_space<vmem>>, vector<1024x512xbf16>
    %cst = arith.constant dense<0.000000e+00> : vector<8x512xf32>
    %2 = tpu.matmul %0, %1, %cst {dimension_numbers = #tpu.dot_dimension_numbers<[1], [0], [0], [1], [0, 0, 1, 1], [], []>} : vector<8x1024xbf16>, vector<1024x512xbf16>, vector<8x512xf32> -> vector<8x512xf32>
    %c0_3 = arith.constant 0 : index
    %c0_4 = arith.constant 0 : index
    %3 = vector.load %arg3[%c0_3, %c0_4] : memref<1x512xf32, #tpu.memory_space<vmem>>, vector<1x512xf32>
    %4 = vector.broadcast %3 : vector<1x512xf32> to vector<8x512xf32>
    %5 = arith.addf %2, %4 : vector<8x512xf32>
    %cst_5 = arith.constant 0.000000e+00 : f32
    %6 = vector.broadcast %cst_5 : f32 to vector<8x512xf32>
    %7 = arith.maximumf %5, %6 : vector<8x512xf32>
    %8 = arith.truncf %7 : vector<8x512xf32> to vector<8x512xbf16>
    %c0_6 = arith.constant 0 : index
    %c0_7 = arith.constant 0 : index
    %9 = vector.load %arg4[%c0_6, %c0_7] : memref<512x512xbf16, #tpu.memory_space<vmem>>, vector<512x512xbf16>
    %cst_8 = arith.constant dense<0.000000e+00> : vector<8x512xf32>
    %10 = tpu.matmul %8, %9, %cst_8 {dimension_numbers = #tpu.dot_dimension_numbers<[1], [0], [0], [1], [0, 0, 1, 1], [], []>} : vector<8x512xbf16>, vector<512x512xbf16>, vector<8x512xf32> -> vector<8x512xf32>
    %c0_9 = arith.constant 0 : index
    %c0_10 = arith.constant 0 : index
    %11 = vector.load %arg5[%c0_9, %c0_10] : memref<1x512xf32, #tpu.memory_space<vmem>>, vector<1x512xf32>
    %12 = vector.broadcast %11 : vector<1x512xf32> to vector<8x512xf32>
    %13 = arith.addf %10, %12 : vector<8x512xf32>
    %cst_11 = arith.constant 0.000000e+00 : f32
    %14 = vector.broadcast %cst_11 : f32 to vector<8x512xf32>
    %15 = arith.maximumf %13, %14 : vector<8x512xf32>
    %16 = arith.truncf %15 : vector<8x512xf32> to vector<8x512xbf16>
    %c0_12 = arith.constant 0 : index
    %c0_13 = arith.constant 0 : index
    %17 = vector.load %arg6[%c0_12, %c0_13] : memref<512x128xbf16, #tpu.memory_space<vmem>>, vector<512x128xbf16>
    %cst_14 = arith.constant dense<0.000000e+00> : vector<8x128xf32>
    %18 = tpu.matmul %16, %17, %cst_14 {dimension_numbers = #tpu.dot_dimension_numbers<[1], [0], [0], [1], [0, 0, 1, 1], [], []>} : vector<8x512xbf16>, vector<512x128xbf16>, vector<8x128xf32> -> vector<8x128xf32>
    %c0_15 = arith.constant 0 : index
    %c0_16 = arith.constant 0 : index
    %19 = vector.load %arg7[%c0_15, %c0_16] : memref<1x128xf32, #tpu.memory_space<vmem>>, vector<1x128xf32>
    %20 = vector.broadcast %19 : vector<1x128xf32> to vector<8x128xf32>
    %21 = arith.addf %18, %20 : vector<8x128xf32>
    %cst_17 = arith.constant dense<0xFF800000> : vector<8xf32>
    %22 = vector.multi_reduction <maximumf>, %21, %cst_17 [1] : vector<8x128xf32> to vector<8xf32>
    %23 = vector.shape_cast %22 : vector<8xf32> to vector<8x1xf32>
    %24 = vector.broadcast %23 : vector<8x1xf32> to vector<8x128xf32>
    %25 = arith.subf %21, %24 : vector<8x128xf32>
    %26 = math.exp %25 : vector<8x128xf32>
    %cst_18 = arith.constant dense<0.000000e+00> : vector<8xf32>
    %27 = vector.multi_reduction <add>, %26, %cst_18 [1] : vector<8x128xf32> to vector<8xf32>
    %28 = vector.shape_cast %27 : vector<8xf32> to vector<8x1xf32>
    %29 = tpu.reciprocal %28 {approx = true} : vector<8x1xf32> -> vector<8x1xf32>
    %30 = vector.broadcast %29 : vector<8x1xf32> to vector<8x128xf32>
    %31 = arith.mulf %26, %30 : vector<8x128xf32>
    %c0_19 = arith.constant 0 : index
    %c0_20 = arith.constant 0 : index
    %32 = vector.load %arg8[%c0_19, %c0_20] : memref<8x128xf32, #tpu.memory_space<vmem>>, vector<8x128xf32>
    tpu.vector_store %arg8[%c0_19, %c0_20], %31 {strides = array<i32>} : memref<8x128xf32, #tpu.memory_space<vmem>>, vector<8x128xf32>,
    return
  }
  func.func @transform_0(%arg0: i32) -> (i32, i32) {
    %c0_i32 = arith.constant 0 : i32
    %c0_i32_0 = arith.constant 0 : i32
    return %arg0, %c0_i32 : i32, i32
  }
  func.func @transform_1(%arg0: i32) -> (i32, i32) {
    %c0_i32 = arith.constant 0 : i32
    %c0_i32_0 = arith.constant 0 : i32
    %c0_i32_1 = arith.constant 0 : i32
    return %c0_i32, %c0_i32_0 : i32, i32
  }
  func.func @transform_2(%arg0: i32) -> (i32, i32) {
    %c0_i32 = arith.constant 0 : i32
    %c0_i32_0 = arith.constant 0 : i32
    %c0_i32_1 = arith.constant 0 : i32
    return %c0_i32, %c0_i32_0 : i32, i32
  }
  func.func @transform_3(%arg0: i32) -> (i32, i32) {
    %c0_i32 = arith.constant 0 : i32
    %c0_i32_0 = arith.constant 0 : i32
    %c0_i32_1 = arith.constant 0 : i32
    return %c0_i32, %c0_i32_0 : i32, i32
  }
  func.func @transform_4(%arg0: i32) -> (i32, i32) {
    %c0_i32 = arith.constant 0 : i32
    %c0_i32_0 = arith.constant 0 : i32
    %c0_i32_1 = arith.constant 0 : i32
    return %c0_i32, %c0_i32_0 : i32, i32
  }
  func.func @transform_5(%arg0: i32) -> (i32, i32) {
    %c0_i32 = arith.constant 0 : i32
    %c0_i32_0 = arith.constant 0 : i32
    %c0_i32_1 = arith.constant 0 : i32
    return %c0_i32, %c0_i32_0 : i32, i32
  }
  func.func @transform_6(%arg0: i32) -> (i32, i32) {
    %c0_i32 = arith.constant 0 : i32
    %c0_i32_0 = arith.constant 0 : i32
    %c0_i32_1 = arith.constant 0 : i32
    return %c0_i32, %c0_i32_0 : i32, i32
  }
  func.func @transform_7(%arg0: i32) -> (i32, i32) {
    %c0_i32 = arith.constant 0 : i32
    %c0_i32_0 = arith.constant 0 : i32
    return %arg0, %c0_i32 : i32, i32
  }
}

</mosaic_0001>

<bundles_post_ra>
// kernel: tpu_custom_call.1
= control target key start
LH: loop header
LB: loop body
LE: loop exit
PB: predicated region body
PF: predicated region fallthrough
CT: control target
= control target key end

     0   :  { %12 = vsyncpa [#allocation3], 0  ;;  %s5943_s0 = inlined_call_operand.hbm [shape: bf16[8,1024], index: 0, kind: input, shape index: {}]   ;;  %s5944_s1 = inlined_call_operand.hbm [shape: bf16[1024,512], index: 1, kind: input, shape index: {}]   ;;  %s5945_s2 = inlined_call_operand.hbm [shape: f32[1,512], index: 2, kind: input, shape index: {}]   ;;  %s5946_s3 = inlined_call_operand.hbm [shape: bf16[512,512], index: 3, kind: input, shape index: {}]   ;;  %s5947_s4 = inlined_call_operand.hbm [shape: f32[1,512], index: 4, kind: input, shape index: {}]   ;;  %s5948_s5 = inlined_call_operand.hbm [shape: bf16[512,128], index: 5, kind: input, shape index: {}]   ;;  %s5949_s6 = inlined_call_operand.vmem [shape: f32[1,128], index: 6, kind: input, shape index: {}]   ;;  %s5950_s7 = inlined_call_operand.hbm [shape: f32[8,128], index: 7, kind: output, shape index: {}]  }
   0x1   :  { %13 = vsyncpa [#allocation6], 0 }
   0x2   :  { %14 = vsyncpa [#allocation9], 0 }
   0x3   :  { %15 = vsyncpa [#allocation12], 0  ;;  %s32_s26 = sshll.u32 %s5944_s1, 4  ;;  %s33_s26 = int_to_ptr.hbm [resolvable:$true] %s32_s26 }
   0x4   :  { %16 = vsyncpa [#allocation4], 0  ;;  %s5728_s27 = smov [#allocation5]   ;;  %s56_s8 = sshll.u32 %s5946_s3, 4  ;;  %s57_s8 = int_to_ptr.hbm [resolvable:$true] %s56_s8 }
   0x5   :  { %s34_s28 = sshll.u32 %s5728_s27, 4  ;;  %s5729_s9 = smov 256   ;;  %s35_s28 = int_to_ptr.vmem [resolvable:$true] %s34_s28 }
   0x6   :  { %s5730_s10 = smov 16   ;;  %s5731_s11 = smov [#allocation8]  }
   0x7   :  { %40 = dma.hbm_to_vmem [thread:$0]  %s33_s26, 32768, %s35_s28, [#allocation6], %s5729_s9, %s5729_s9, %s5730_s10  }
   0x8   :  { %s58_s12 = sshll.u32 %s5731_s11, 4  ;;  %s22_s15 = sshll.u32 %s5943_s0, 4  ;;  %s59_s12 = int_to_ptr.vmem [resolvable:$true] %s58_s12  ;;  %s23_s15 = int_to_ptr.hbm [resolvable:$true] %s22_s15 }
   0x9   :  { %64 = dma.hbm_to_vmem [thread:$0]  %s57_s8, 16384, %s59_s12, [#allocation9], %s5729_s9, %s5729_s9, %s5730_s10  }
   0xa   :  { %s46_s17 = sshll.u32 %s5945_s2, 4  ;;  %s5732_s18 = smov [#allocation2]   ;;  %s47_s17 = int_to_ptr.hbm [resolvable:$true] %s46_s17 }
   0xb   :  { %s24_s19 = sshll.u32 %s5732_s18, 4  ;;  %s5733_s3 = smov [#allocation7]   ;;  %s25_s19 = int_to_ptr.vmem [resolvable:$true] %s24_s19 }
   0xc   :  { %27 = dma.hbm_to_vmem [thread:$0]  %s23_s15, 512, %s25_s19, [#allocation3]  }
   0xd   :  { %s48_s20 = sshll.u32 %s5733_s3, 4  ;;  %s70_s23 = sshll.u32 %s5947_s4, 4  ;;  %s49_s20 = int_to_ptr.vmem [resolvable:$true] %s48_s20  ;;  %s71_s23 = int_to_ptr.hbm [resolvable:$true] %s70_s23 }
   0xe   :  { %51 = dma.hbm_to_vmem [thread:$0]  %s47_s17, 64, %s49_s20, [#allocation6]  }
   0xf   :  { %s80_s25 = sshll.u32 %s5948_s5, 4  ;;  %s5734_s26 = smov [#allocation10]   ;;  %s81_s25 = int_to_ptr.hbm [resolvable:$true] %s80_s25 }
  0x10   :  { %s72_s2 = sshll.u32 %s5734_s26, 4  ;;  %s5735_s27 = smov [#allocation11]   ;;  %s73_s2 = int_to_ptr.vmem [resolvable:$true] %s72_s2 }
  0x11   :  { %75 = dma.hbm_to_vmem [thread:$0]  %s71_s23, 64, %s73_s2, [#allocation9]  }
  0x12   :  { %s82_s28 = sshll.u32 %s5735_s27, 4  ;;  %s5736_s29 = smov 64   ;;  %s83_s28 = int_to_ptr.vmem [resolvable:$true] %s82_s28 }
  0x13   :  { %s5737_s30 = smov 4  }
  0x14   :  { %88 = dma.hbm_to_vmem [thread:$0]  %s81_s25, 4096, %s83_s28, [#allocation12], %s5736_s29, %s5736_s29, %s5737_s30  }
  0x15   :  { %5718 = dma.done.wait [#allocation3], 512  }
  0x16   :  { %5719 = vsyncadd [#allocation3], 4294966784 }
  0x17   :  { %5720 = dma.done.wait [#allocation6], 32832  }
  0x18   :  { %5721 = vsyncadd [#allocation6], 4294934464 }
  0x19   :  { %5722 = dma.done.wait [#allocation9], 16448  }
  0x1a   :  { %5723 = vsyncadd [#allocation9], 4294950848 }
  0x1b   :  { %5724 = dma.done.wait [#allocation12], 4096  }
  0x1c   :  { %5725 = vsyncadd [#allocation12], 4294963200  ;;  %v3567_v0 = vld [vmem:[#allocation5 + $0xe0] sm:$0xf]  ;;  %v5147_v1 = vld [vmem:[#allocation5 + $0xec] sm:$0xf0] }
  0x1d   :  { %v3695_v2 = vld [vmem:[#allocation5 + $0x1e0] sm:$0xf]  ;;  %v3568_v3 = vor.u32 %v5147_v1, %v3567_v0  ;;  %v5179_v4 = vld [vmem:[#allocation5 + $0x1ec] sm:$0xf0]  ;;  %s5738_s8 = smov [#allocation13]  }
  0x1e   :  { %v3823_v5 = vld [vmem:[#allocation5 + $0x2e0] sm:$0xf]  ;;  %v5211_v6 = vld [vmem:[#allocation5 + $0x2ec] sm:$0xf0]  ;;  %v3696_v7 = vor.u32 %v5179_v4, %v3695_v2  ;;  %s3438_s9 = sshll.u32 %s5738_s8, 4  ;;  %s3439_s9 = int_to_ptr.vmem [resolvable:$true] %s3438_s9 }
  0x1f   :  { %v3824_v8 = vor.u32 %v5211_v6, %v3823_v5  ;;  %v3951_v9 = vld [vmem:[#allocation5 + $0x3e0] sm:$0xf]  ;;  %v5243_v10 = vld [vmem:[#allocation5 + $0x3ec] sm:$0xf0]  ;;  %1693 = vmatpush.bf16.msra.mxu0 %v3568_v3 }
  0x20   :  { %v3551_v11 = vld [vmem:[#allocation5 + $0xc0] sm:$0xf]  ;;  %v3952_v12 = vor.u32 %v5243_v10, %v3951_v9  ;;  %v5143_v13 = vld [vmem:[#allocation5 + $0xcc] sm:$0xf0]  ;;  %1706 = vmatpush.bf16.msra.mxu1 %v3696_v7 }
  0x21   :  { %v3679_v14 = vld [vmem:[#allocation5 + $0x1c0] sm:$0xf]  ;;  %v5175_v15 = vld [vmem:[#allocation5 + $0x1cc] sm:$0xf0]  ;;  %1719 = vmatpush.bf16.msra.mxu2 %v3824_v8  ;;  %v3552_v16 = vor.u32 %v5143_v13, %v3551_v11 }
  0x22   :  { %v3680_v17 = vor.u32 %v5175_v15, %v3679_v14  ;;  %v3807_v18 = vld [vmem:[#allocation5 + $0x2c0] sm:$0xf]  ;;  %v5207_v19 = vld [vmem:[#allocation5 + $0x2cc] sm:$0xf0]  ;;  %1732 = vmatpush.bf16.msra.mxu3 %v3952_v12 }
  0x23   :  { %v3935_v20 = vld [vmem:[#allocation5 + $0x3c0] sm:$0xf]  ;;  %v3808_v21 = vor.u32 %v5207_v19, %v3807_v18  ;;  %v5239_v22 = vld [vmem:[#allocation5 + $0x3cc] sm:$0xf0]  ;;  %1694 = vmatpush.bf16.msra.mxu0 %v3552_v16 }
  0x24   :  { %v3535_v23 = vld [vmem:[#allocation5 + $0xa0] sm:$0xf]  ;;  %v5139_v24 = vld [vmem:[#allocation5 + $0xac] sm:$0xf0]  ;;  %v3936_v25 = vor.u32 %v5239_v22, %v3935_v20  ;;  %1707 = vmatpush.bf16.msra.mxu1 %v3680_v17 }
  0x25   :  { %v3663_v26 = vld [vmem:[#allocation5 + $0x1a0] sm:$0xf]  ;;  %v5171_v27 = vld [vmem:[#allocation5 + $0x1ac] sm:$0xf0]  ;;  %v3536_v29 = vor.u32 %v5139_v24, %v3535_v23  ;;  %1720 = vmatpush.bf16.msra.mxu2 %v3808_v21 }
  0x26   :  { %v3791_v28 = vld [vmem:[#allocation5 + $0x2a0] sm:$0xf]  ;;  %v5203_v30 = vld [vmem:[#allocation5 + $0x2ac] sm:$0xf0]  ;;  %v3664_v33 = vor.u32 %v5171_v27, %v3663_v26  ;;  %1733 = vmatpush.bf16.msra.mxu3 %v3936_v25 }
  0x27   :  { %v3919_v31 = vld [vmem:[#allocation5 + $0x3a0] sm:$0xf]  ;;  %v5235_v32 = vld [vmem:[#allocation5 + $0x3ac] sm:$0xf0]  ;;  %v3792_v34 = vor.u32 %v5203_v30, %v3791_v28  ;;  %1695 = vmatpush.bf16.msra.mxu0 %v3536_v29 }
  0x28   :  { %v3519_v35 = vld [vmem:[#allocation5 + $0x80] sm:$0xf]  ;;  %v5135_v36 = vld [vmem:[#allocation5 + $0x8c] sm:$0xf0]  ;;  %v3920_v38 = vor.u32 %v5235_v32, %v3919_v31  ;;  %1708 = vmatpush.bf16.msra.mxu1 %v3664_v33 }
  0x29   :  { %v3647_v37 = vld [vmem:[#allocation5 + $0x180] sm:$0xf]  ;;  %v5167_v39 = vld [vmem:[#allocation5 + $0x18c] sm:$0xf0]  ;;  %v3520_v44 = vor.u32 %v5135_v36, %v3519_v35  ;;  %1721 = vmatpush.bf16.msra.mxu2 %v3792_v34 }
  0x2a   :  { %v3775_v40 = vld [vmem:[#allocation5 + $0x280] sm:$0xf]  ;;  %v5199_v41 = vld [vmem:[#allocation5 + $0x28c] sm:$0xf0]  ;;  %v3648_v45 = vor.u32 %v5167_v39, %v3647_v37  ;;  %1734 = vmatpush.bf16.msra.mxu3 %v3920_v38 }
  0x2b   :  { %v3903_v42 = vld [vmem:[#allocation5 + $0x380] sm:$0xf]  ;;  %v5231_v43 = vld [vmem:[#allocation5 + $0x38c] sm:$0xf0]  ;;  %v3776_v46 = vor.u32 %v5199_v41, %v3775_v40  ;;  %1696 = vmatpush.bf16.msra.mxu0 %v3520_v44 }
  0x2c   :  { %v3503_v47 = vld [vmem:[#allocation5 + $0x60] sm:$0xf]  ;;  %v5131_v48 = vld [vmem:[#allocation5 + $0x6c] sm:$0xf0]  ;;  %v3904_v50 = vor.u32 %v5231_v43, %v3903_v42  ;;  %1709 = vmatpush.bf16.msra.mxu1 %v3648_v45 }
  0x2d   :  { %v3631_v49 = vld [vmem:[#allocation5 + $0x160] sm:$0xf]  ;;  %v5163_v51 = vld [vmem:[#allocation5 + $0x16c] sm:$0xf0]  ;;  %v3504_v56 = vor.u32 %v5131_v48, %v3503_v47  ;;  %1722 = vmatpush.bf16.msra.mxu2 %v3776_v46 }
  0x2e   :  { %v3759_v52 = vld [vmem:[#allocation5 + $0x260] sm:$0xf]  ;;  %v5195_v53 = vld [vmem:[#allocation5 + $0x26c] sm:$0xf0]  ;;  %v3632_v57 = vor.u32 %v5163_v51, %v3631_v49  ;;  %1735 = vmatpush.bf16.msra.mxu3 %v3904_v50 }
  0x2f   :  { %v3887_v54 = vld [vmem:[#allocation5 + $0x360] sm:$0xf]  ;;  %v5227_v55 = vld [vmem:[#allocation5 + $0x36c] sm:$0xf0]  ;;  %v3760_v58 = vor.u32 %v5195_v53, %v3759_v52  ;;  %1697 = vmatpush.bf16.msra.mxu0 %v3504_v56 }
  0x30   :  { %v3487_v59 = vld [vmem:[#allocation5 + $0x40] sm:$0xf]  ;;  %v5127_v60 = vld [vmem:[#allocation5 + $0x4c] sm:$0xf0]  ;;  %v3888_v62 = vor.u32 %v5227_v55, %v3887_v54  ;;  %1710 = vmatpush.bf16.msra.mxu1 %v3632_v57 }
  0x31   :  { %v3615_v61 = vld [vmem:[#allocation5 + $0x140] sm:$0xf]  ;;  %v5159_v63 = vld [vmem:[#allocation5 + $0x14c] sm:$0xf0]  ;;  %v3488_v4 = vor.u32 %v5127_v60, %v3487_v59  ;;  %1723 = vmatpush.bf16.msra.mxu2 %v3760_v58 }
  0x32   :  { %v3743_v0 = vld [vmem:[#allocation5 + $0x240] sm:$0xf]  ;;  %v5191_v1 = vld [vmem:[#allocation5 + $0x24c] sm:$0xf0]  ;;  %v3616_v5 = vor.u32 %v5159_v63, %v3615_v61  ;;  %1736 = vmatpush.bf16.msra.mxu3 %v3888_v62 }
  0x33   :  { %v3871_v2 = vld [vmem:[#allocation5 + $0x340] sm:$0xf]  ;;  %v5223_v3 = vld [vmem:[#allocation5 + $0x34c] sm:$0xf0]  ;;  %v3744_v6 = vor.u32 %v5191_v1, %v3743_v0  ;;  %1698 = vmatpush.bf16.msra.mxu0 %v3488_v4 }
  0x34   :  { %v3471_v7 = vld [vmem:[#allocation5 + $0x20] sm:$0xf]  ;;  %v5123_v8 = vld [vmem:[#allocation5 + $0x2c] sm:$0xf0]  ;;  %v3872_v10 = vor.u32 %v5223_v3, %v3871_v2  ;;  %1711 = vmatpush.bf16.msra.mxu1 %v3616_v5  ;;  %v116_v2 = vld [vmem:[#allocation2 + $0x8] sm:$0xff] }
  0x35   :  { %v3599_v9 = vld [vmem:[#allocation5 + $0x120] sm:$0xf]  ;;  %v5155_v11 = vld [vmem:[#allocation5 + $0x12c] sm:$0xf0]  ;;  %v3472_v16 = vor.u32 %v5123_v8, %v3471_v7  ;;  %1724 = vmatpush.bf16.msra.mxu2 %v3744_v6  ;;  %v391_v8 = vunpack.c.l.b16 %v116_v2 }
  0x36   :  { %v3727_v12 = vld [vmem:[#allocation5 + $0x220] sm:$0xf]  ;;  %v5187_v13 = vld [vmem:[#allocation5 + $0x22c] sm:$0xf0]  ;;  %v3600_v19 = vor.u32 %v5155_v11, %v3599_v9  ;;  %1737 = vmatpush.bf16.msra.mxu3 %v3872_v10  ;;  %v392_v10 = vunpack.c.h.b16 %v116_v2 }
  0x37   :  { %v3855_v14 = vld [vmem:[#allocation5 + $0x320] sm:$0xf]  ;;  %v5219_v15 = vld [vmem:[#allocation5 + $0x32c] sm:$0xf0]  ;;  %v3728_v20 = vor.u32 %v5187_v13, %v3727_v12  ;;  %1699 = vmatpush.bf16.msra.mxu0 %v3472_v16 }
  0x38   :  { %v3455_v17 = vld [vmem:[#allocation5] sm:$0xf]  ;;  %v5119_v18 = vld [vmem:[#allocation5 + $0xc] sm:$0xf0]  ;;  %v3856_v24 = vor.u32 %v5219_v15, %v3855_v14  ;;  %1712 = vmatpush.bf16.msra.mxu1 %v3600_v19 }
  0x39   :  { %v3583_v21 = vld [vmem:[#allocation5 + $0x100] sm:$0xf]  ;;  %v5151_v22 = vld [vmem:[#allocation5 + $0x10c] sm:$0xf0]  ;;  %v3456_v31 = vor.u32 %v5119_v18, %v3455_v17  ;;  %1725 = vmatpush.bf16.msra.mxu2 %v3728_v20  ;;  %v5797_v18 = vpack.c.b16 %v391_v8, %v391_v8  ;;  %v5801_v20 = vpack.c.b16 %v392_v10, %v392_v10  ;;  %v5145_v8 = vld [vmem:[#allocation5 + $0xe4] sm:$0xf] }
  0x3a   :  { %v3711_v23 = vld [vmem:[#allocation5 + $0x200] sm:$0xf]  ;;  %v5183_v25 = vld [vmem:[#allocation5 + $0x20c] sm:$0xf0]  ;;  %v3584_v35 = vor.u32 %v5151_v22, %v3583_v21  ;;  %1738 = vmatpush.bf16.msra.mxu3 %v3856_v24  ;;  %v5177_v10 = vld [vmem:[#allocation5 + $0x1e4] sm:$0xf] }
  0x3b   :  { %v3839_v26 = vld [vmem:[#allocation5 + $0x300] sm:$0xf]  ;;  %v5215_v27 = vld [vmem:[#allocation5 + $0x30c] sm:$0xf0]  ;;  %v3712_v36 = vor.u32 %v5183_v25, %v3711_v23  ;;  %1700 = vmatpush.bf16.msra.mxu0 %v3456_v31 }
  0x3c   :  { %v4079_v28 = vld [vmem:[#allocation5 + $0x4e0] sm:$0xf]  ;;  %v5275_v29 = vld [vmem:[#allocation5 + $0x4ec] sm:$0xf0]  ;;  %v3840_v39 = vor.u32 %v5215_v27, %v3839_v26  ;;  %1713 = vmatpush.bf16.msra.mxu1 %v3584_v35 }
  0x3d   :  { %v4207_v30 = vld [vmem:[#allocation5 + $0x5e0] sm:$0xf]  ;;  %v5307_v32 = vld [vmem:[#allocation5 + $0x5ec] sm:$0xf0]  ;;  %v4080_v40 = vor.u32 %v5275_v29, %v4079_v28  ;;  %1726 = vmatpush.bf16.msra.mxu2 %v3712_v36 }
  0x3e   :  { %v4335_v33 = vld [vmem:[#allocation5 + $0x6e0] sm:$0xf]  ;;  %v5339_v34 = vld [vmem:[#allocation5 + $0x6ec] sm:$0xf0]  ;;  %v4208_v41 = vor.u32 %v5307_v32, %v4207_v30  ;;  %1739 = vmatpush.bf16.msra.mxu3 %v3840_v39 }
  0x3f   :  { %v4463_v37 = vld [vmem:[#allocation5 + $0x7e0] sm:$0xf]  ;;  %v5371_v38 = vld [vmem:[#allocation5 + $0x7ec] sm:$0xf0]  ;;  %v4336_v42 = vor.u32 %v5339_v34, %v4335_v33  ;;  %1745 = vmatpush.bf16.msrb.mxu0 %v4080_v40 }
  0x40   :  { %v4063_v43 = vld [vmem:[#allocation5 + $0x4c0] sm:$0xf]  ;;  %v5271_v44 = vld [vmem:[#allocation5 + $0x4cc] sm:$0xf0]  ;;  %v4464_v46 = vor.u32 %v5371_v38, %v4463_v37  ;;  %1758 = vmatpush.bf16.msrb.mxu1 %v4208_v41  ;;  %1727 = vmatmul.bf16.vlgmr.msra.gmra.mxu2 %v5797_v18 }
  0x41   :  { %v4191_v45 = vld [vmem:[#allocation5 + $0x5c0] sm:$0xf]  ;;  %v5303_v47 = vld [vmem:[#allocation5 + $0x5cc] sm:$0xf0]  ;;  %v4064_v52 = vor.u32 %v5271_v44, %v4063_v43  ;;  %1771 = vmatpush.bf16.msrb.mxu2 %v4336_v42  ;;  %1740 = vmatmul.bf16.vlgmr.msra.gmra.mxu3 %v5801_v20 }
  0x42   :  { %v4319_v48 = vld [vmem:[#allocation5 + $0x6c0] sm:$0xf]  ;;  %v5335_v49 = vld [vmem:[#allocation5 + $0x6cc] sm:$0xf0]  ;;  %v4192_v54 = vor.u32 %v5303_v47, %v4191_v45  ;;  %1784 = vmatpush.bf16.msrb.mxu3 %v4464_v46 }
  0x43   :  { %v4447_v50 = vld [vmem:[#allocation5 + $0x7c0] sm:$0xf]  ;;  %v5367_v51 = vld [vmem:[#allocation5 + $0x7cc] sm:$0xf0]  ;;  %v4320_v55 = vor.u32 %v5335_v49, %v4319_v48  ;;  %1746 = vmatpush.bf16.msrb.mxu0 %v4064_v52 }
  0x44   :  { %v4047_v53 = vld [vmem:[#allocation5 + $0x4a0] sm:$0xf]  ;;  %v5267_v56 = vld [vmem:[#allocation5 + $0x4ac] sm:$0xf0]  ;;  %v4448_v59 = vor.u32 %v5367_v51, %v4447_v50  ;;  %1759 = vmatpush.bf16.msrb.mxu1 %v4192_v54 }
  0x45   :  { %v4175_v57 = vld [vmem:[#allocation5 + $0x5a0] sm:$0xf]  ;;  %v5299_v58 = vld [vmem:[#allocation5 + $0x5ac] sm:$0xf0]  ;;  %v4048_v0 = vor.u32 %v5267_v56, %v4047_v53  ;;  %1772 = vmatpush.bf16.msrb.mxu2 %v4320_v55 }
  0x46   :  { %v4303_v60 = vld [vmem:[#allocation5 + $0x6a0] sm:$0xf]  ;;  %v5331_v61 = vld [vmem:[#allocation5 + $0x6ac] sm:$0xf0]  ;;  %v4176_v1 = vor.u32 %v5299_v58, %v4175_v57  ;;  %1785 = vmatpush.bf16.msrb.mxu3 %v4448_v59 }
  0x47   :  { %v4431_v62 = vld [vmem:[#allocation5 + $0x7a0] sm:$0xf]  ;;  %v5363_v63 = vld [vmem:[#allocation5 + $0x7ac] sm:$0xf0]  ;;  %v4304_v4 = vor.u32 %v5331_v61, %v4303_v60  ;;  %1747 = vmatpush.bf16.msrb.mxu0 %v4048_v0 }
  0x48   :  { %v115_v3 = vld [vmem:[#allocation2] sm:$0xff]  ;;  %v5263_v6 = vld [vmem:[#allocation5 + $0x48c] sm:$0xf0]  ;;  %v4432_v11 = vor.u32 %v5363_v63, %v4431_v62  ;;  %1760 = vmatpush.bf16.msrb.mxu1 %v4176_v1 }
  0x49   :  { %v4031_v5 = vld [vmem:[#allocation5 + $0x480] sm:$0xf]  ;;  %v389_v9 = vunpack.c.l.b16 %v115_v3  ;;  %v5295_v12 = vld [vmem:[#allocation5 + $0x58c] sm:$0xf0]  ;;  %v390_v15 = vunpack.c.h.b16 %v115_v3  ;;  %1773 = vmatpush.bf16.msrb.mxu2 %v4304_v4  ;;  %v118_v3 = vld [vmem:[#allocation2 + $0x18] sm:$0xff] }
  0x4a   :  { %v4159_v7 = vld [vmem:[#allocation5 + $0x580] sm:$0xf]  ;;  %v5327_v14 = vld [vmem:[#allocation5 + $0x68c] sm:$0xf0]  ;;  %v4032_v21 = vor.u32 %v5263_v6, %v4031_v5  ;;  %1786 = vmatpush.bf16.msrb.mxu3 %v4432_v11 }
  0x4b   :  { %v4287_v13 = vld [vmem:[#allocation5 + $0x680] sm:$0xf]  ;;  %v5359_v17 = vld [vmem:[#allocation5 + $0x78c] sm:$0xf0]  ;;  %v5799_v19 = vpack.c.b16 %v389_v9, %v389_v9  ;;  %v5803_v22 = vpack.c.b16 %v390_v15, %v390_v15  ;;  %v4160_v23 = vor.u32 %v5295_v12, %v4159_v7  ;;  %v3569_v9 = vld [vmem:[#allocation5 + $0xf0] sm:$0xf0]  ;;  %v395_v15 = vunpack.c.l.b16 %v118_v3 }
  0x4c   :  { %v4415_v16 = vld [vmem:[#allocation5 + $0x780] sm:$0xf]  ;;  %v4288_v24 = vor.u32 %v5327_v14, %v4287_v13  ;;  %v5259_v26 = vld [vmem:[#allocation5 + $0x46c] sm:$0xf0]  ;;  %1748 = vmatpush.bf16.msrb.mxu0 %v4032_v21  ;;  %v3697_v12 = vld [vmem:[#allocation5 + $0x1f0] sm:$0xf0] }
  0x4d   :  { %v4015_v25 = vld [vmem:[#allocation5 + $0x460] sm:$0xf]  ;;  %v4416_v28 = vor.u32 %v5359_v17, %v4415_v16  ;;  %v5291_v29 = vld [vmem:[#allocation5 + $0x56c] sm:$0xf0]  ;;  %1701 = vmatmul.bf16.vlgmr.msra.gmra.mxu0 %v5799_v19  ;;  %1714 = vmatmul.bf16.vlgmr.msra.gmra.mxu1 %v5803_v22  ;;  %v5209_v13 = vld [vmem:[#allocation5 + $0x2e4] sm:$0xf] }
  0x4e   :  { %v4143_v27 = vld [vmem:[#allocation5 + $0x560] sm:$0xf]  ;;  %v5323_v31 = vld [vmem:[#allocation5 + $0x66c] sm:$0xf0]  ;;  %v4016_v34 = vor.u32 %v5259_v26, %v4015_v25  ;;  %1761 = vmatpush.bf16.msrb.mxu1 %v4160_v23  ;;  %1774 = vmatpush.bf16.msrb.mxu2 %v4288_v24  ;;  %v3825_v14 = vld [vmem:[#allocation5 + $0x2f0] sm:$0xf0]  ;;  %v396_v25 = vunpack.c.h.b16 %v118_v3 }
  0x4f   :  { %v4271_v30 = vld [vmem:[#allocation5 + $0x660] sm:$0xf]  ;;  %v5355_v33 = vld [vmem:[#allocation5 + $0x76c] sm:$0xf0]  ;;  %v4144_v35 = vor.u32 %v5291_v29, %v4143_v27  ;;  %1787 = vmatpush.bf16.msrb.mxu3 %v4416_v28  ;;  %v5241_v21 = vld [vmem:[#allocation5 + $0x3e4] sm:$0xf]  ;;  %v3572_v27 = vor.u32 %v5145_v8, %v3569_v9  ;;  %v3700_v29 = vor.u32 %v5177_v10, %v3697_v12 }
  0x50   :  { %v4399_v32 = vld [vmem:[#allocation5 + $0x760] sm:$0xf]  ;;  %v4272_v36 = vor.u32 %v5323_v31, %v4271_v30  ;;  %v5255_v38 = vld [vmem:[#allocation5 + $0x44c] sm:$0xf0]  ;;  %1749 = vmatpush.bf16.msrb.mxu0 %v4016_v34  ;;  %v3953_v23 = vld [vmem:[#allocation5 + $0x3f0] sm:$0xf0]  ;;  %v3828_v30 = vor.u32 %v5209_v13, %v3825_v14 }
  0x51   :  { %v3999_v37 = vld [vmem:[#allocation5 + $0x440] sm:$0xf]  ;;  %v4400_v40 = vor.u32 %v5355_v33, %v4399_v32  ;;  %v5287_v41 = vld [vmem:[#allocation5 + $0x54c] sm:$0xf0]  ;;  %v5141_v31 = vld [vmem:[#allocation5 + $0xc4] sm:$0xf]  ;;  %v3956_v34 = vor.u32 %v5241_v21, %v3953_v23 }
  0x52   :  { %v4127_v39 = vld [vmem:[#allocation5 + $0x540] sm:$0xf]  ;;  %v5319_v43 = vld [vmem:[#allocation5 + $0x64c] sm:$0xf0]  ;;  %v4000_v46 = vor.u32 %v5255_v38, %v3999_v37  ;;  %1762 = vmatpush.bf16.msrb.mxu1 %v4144_v35  ;;  %1775 = vmatpush.bf16.msrb.mxu2 %v4272_v36  ;;  %v3553_v32 = vld [vmem:[#allocation5 + $0xd0] sm:$0xf0]  ;;  %v5809_v38 = vpack.c.b16 %v395_v15, %v395_v15 }
  0x53   :  { %v4255_v42 = vld [vmem:[#allocation5 + $0x640] sm:$0xf]  ;;  %v5351_v45 = vld [vmem:[#allocation5 + $0x74c] sm:$0xf0]  ;;  %v4128_v47 = vor.u32 %v5287_v41, %v4127_v39  ;;  %1788 = vmatpush.bf16.msrb.mxu3 %v4400_v40  ;;  %v5173_v33 = vld [vmem:[#allocation5 + $0x1c4] sm:$0xf] }
  0x54   :  { %v4383_v44 = vld [vmem:[#allocation5 + $0x740] sm:$0xf]  ;;  %v4256_v48 = vor.u32 %v5319_v43, %v4255_v42  ;;  %v5251_v50 = vld [vmem:[#allocation5 + $0x42c] sm:$0xf0]  ;;  %1750 = vmatpush.bf16.msrb.mxu0 %v4000_v46  ;;  %v3681_v35 = vld [vmem:[#allocation5 + $0x1d0] sm:$0xf0]  ;;  %v5813_v42 = vpack.c.b16 %v396_v25, %v396_v25  ;;  %v3556_v43 = vor.u32 %v5141_v31, %v3553_v32 }
  0x55   :  { %v3983_v49 = vld [vmem:[#allocation5 + $0x420] sm:$0xf]  ;;  %v4384_v52 = vor.u32 %v5351_v45, %v4383_v44  ;;  %v5283_v53 = vld [vmem:[#allocation5 + $0x52c] sm:$0xf0]  ;;  %v5205_v36 = vld [vmem:[#allocation5 + $0x2c4] sm:$0xf]  ;;  %v3684_v45 = vor.u32 %v5173_v33, %v3681_v35 }
  0x56   :  { %v4111_v51 = vld [vmem:[#allocation5 + $0x520] sm:$0xf]  ;;  %v5315_v55 = vld [vmem:[#allocation5 + $0x62c] sm:$0xf0]  ;;  %v3984_v59 = vor.u32 %v5251_v50, %v3983_v49  ;;  %1763 = vmatpush.bf16.msrb.mxu1 %v4128_v47  ;;  %1776 = vmatpush.bf16.msrb.mxu2 %v4256_v48  ;;  %v3809_v37 = vld [vmem:[#allocation5 + $0x2d0] sm:$0xf0] }
  0x57   :  { %v4239_v54 = vld [vmem:[#allocation5 + $0x620] sm:$0xf]  ;;  %v5347_v57 = vld [vmem:[#allocation5 + $0x72c] sm:$0xf0]  ;;  %v4112_v63 = vor.u32 %v5283_v53, %v4111_v51  ;;  %1789 = vmatpush.bf16.msrb.mxu3 %v4384_v52  ;;  %v5237_v39 = vld [vmem:[#allocation5 + $0x3c4] sm:$0xf]  ;;  %v3812_v46 = vor.u32 %v5205_v36, %v3809_v37 }
  0x58   :  { %v4367_v56 = vld [vmem:[#allocation5 + $0x720] sm:$0xf]  ;;  %v5247_v60 = vld [vmem:[#allocation5 + $0x40c] sm:$0xf0]  ;;  %v4240_v0 = vor.u32 %v5315_v55, %v4239_v54  ;;  %1751 = vmatpush.bf16.msrb.mxu0 %v3984_v59  ;;  %v3937_v40 = vld [vmem:[#allocation5 + $0x3d0] sm:$0xf0] }
  0x59   :  { %v3967_v58 = vld [vmem:[#allocation5 + $0x400] sm:$0xf]  ;;  %v5279_v62 = vld [vmem:[#allocation5 + $0x50c] sm:$0xf0]  ;;  %v4368_v4 = vor.u32 %v5347_v57, %v4367_v56  ;;  %v5137_v47 = vld [vmem:[#allocation5 + $0xa4] sm:$0xf]  ;;  %v3940_v50 = vor.u32 %v5237_v39, %v3937_v40 }
  0x5a   :  { %v4095_v61 = vld [vmem:[#allocation5 + $0x500] sm:$0xf]  ;;  %v5311_v2 = vld [vmem:[#allocation5 + $0x60c] sm:$0xf0]  ;;  %v3968_v11 = vor.u32 %v5247_v60, %v3967_v58  ;;  %1764 = vmatpush.bf16.msrb.mxu1 %v4112_v63  ;;  %1777 = vmatpush.bf16.msrb.mxu2 %v4240_v0  ;;  %v3537_v48 = vld [vmem:[#allocation5 + $0xb0] sm:$0xf0] }
  0x5b   :  { %v4223_v1 = vld [vmem:[#allocation5 + $0x600] sm:$0xf]  ;;  %v5343_v6 = vld [vmem:[#allocation5 + $0x70c] sm:$0xf0]  ;;  %v4096_v16 = vor.u32 %v5279_v62, %v4095_v61  ;;  %1790 = vmatpush.bf16.msrb.mxu3 %v4368_v4  ;;  %v5169_v49 = vld [vmem:[#allocation5 + $0x1a4] sm:$0xf]  ;;  %v3540_v56 = vor.u32 %v5137_v47, %v3537_v48 }
  0x5c   :  { %v4351_v5 = vld [vmem:[#allocation5 + $0x700] sm:$0xf]  ;;  %v117_v7 = vld [vmem:[#allocation2 + $0x10] sm:$0xff]  ;;  %v4224_v17 = vor.u32 %v5311_v2, %v4223_v1  ;;  %1752 = vmatpush.bf16.msrb.mxu0 %v3968_v11  ;;  %v5201_v52 = vld [vmem:[#allocation5 + $0x2a4] sm:$0xf] }
  0x5d   :  { %v393_v24 = vunpack.c.l.b16 %v117_v7  ;;  %v4352_v26 = vor.u32 %v5343_v6, %v4351_v5  ;;  %v394_v28 = vunpack.c.h.b16 %v117_v7  ;;  %v3665_v51 = vld [vmem:[#allocation5 + $0x1b0] sm:$0xf0]  ;;  %v5233_v54 = vld [vmem:[#allocation5 + $0x3a4] sm:$0xf] }
  0x5e   :  { %1765 = vmatpush.bf16.msrb.mxu1 %v4096_v16  ;;  %1778 = vmatpush.bf16.msrb.mxu2 %v4224_v17  ;;  %v3793_v53 = vld [vmem:[#allocation5 + $0x2b0] sm:$0xf0]  ;;  %v3668_v57 = vor.u32 %v5169_v49, %v3665_v51  ;;  %v5133_v59 = vld [vmem:[#allocation5 + $0x84] sm:$0xf] }
  0x5f   :  { %v5811_v41 = vpack.c.b16 %v393_v24, %v393_v24  ;;  %1791 = vmatpush.bf16.msrb.mxu3 %v4352_v26  ;;  %v5815_v44 = vpack.c.b16 %v394_v28, %v394_v28  ;;  %v3921_v55 = vld [vmem:[#allocation5 + $0x3b0] sm:$0xf0]  ;;  %v3796_v58 = vor.u32 %v5201_v52, %v3793_v53  ;;  %v5165_v61 = vld [vmem:[#allocation5 + $0x184] sm:$0xf] }
  0x60   :  { %1797 = vmatpush.bf16.msra.mxu0 %v3572_v27  ;;  %v3521_v60 = vld [vmem:[#allocation5 + $0x90] sm:$0xf0]  ;;  %v3924_v62 = vor.u32 %v5233_v54, %v3921_v55  ;;  %v5197_v0 = vld [vmem:[#allocation5 + $0x284] sm:$0xf] }
  0x61   :  { %1779 = vmatmul.bf16.vlgmr.msrb.gmra.mxu2 %v5809_v38  ;;  %1753 = vmatmul.bf16.vlgmr.msrb.gmra.mxu0 %v5811_v41  ;;  %v3649_v63 = vld [vmem:[#allocation5 + $0x190] sm:$0xf0]  ;;  %v5229_v2 = vld [vmem:[#allocation5 + $0x384] sm:$0xf]  ;;  %v3524_v4 = vor.u32 %v5133_v59, %v3521_v60 }
  0x62   :  { %1810 = vmatpush.bf16.msra.mxu1 %v3700_v29  ;;  %1823 = vmatpush.bf16.msra.mxu2 %v3828_v30  ;;  %v3777_v1 = vld [vmem:[#allocation5 + $0x290] sm:$0xf0]  ;;  %v3652_v5 = vor.u32 %v5165_v61, %v3649_v63  ;;  %v5129_v7 = vld [vmem:[#allocation5 + $0x64] sm:$0xf] }
  0x63   :  { %1836 = vmatpush.bf16.msra.mxu3 %v3956_v34  ;;  %1766 = vmatmul.bf16.vlgmr.msrb.gmra.mxu1 %v5815_v44  ;;  %v3905_v3 = vld [vmem:[#allocation5 + $0x390] sm:$0xf0]  ;;  %v3780_v6 = vor.u32 %v5197_v0, %v3777_v1  ;;  %v5161_v9 = vld [vmem:[#allocation5 + $0x164] sm:$0xf] }
  0x64   :  { %1792 = vmatmul.bf16.vlgmr.msrb.gmra.mxu3 %v5813_v42  ;;  %1798 = vmatpush.bf16.msra.mxu0 %v3556_v43  ;;  %v3505_v8 = vld [vmem:[#allocation5 + $0x70] sm:$0xf0]  ;;  %v3908_v10 = vor.u32 %v5229_v2, %v3905_v3  ;;  %v5193_v12 = vld [vmem:[#allocation5 + $0x264] sm:$0xf] }
  0x65   :  { %v3633_v11 = vld [vmem:[#allocation5 + $0x170] sm:$0xf0]  ;;  %v5225_v14 = vld [vmem:[#allocation5 + $0x364] sm:$0xf]  ;;  %v3508_v16 = vor.u32 %v5129_v7, %v3505_v8 }
  0x66   :  { %1811 = vmatpush.bf16.msra.mxu1 %v3684_v45  ;;  %1824 = vmatpush.bf16.msra.mxu2 %v3812_v46  ;;  %v3761_v13 = vld [vmem:[#allocation5 + $0x270] sm:$0xf0]  ;;  %v3636_v17 = vor.u32 %v5161_v9, %v3633_v11  ;;  %v5125_v23 = vld [vmem:[#allocation5 + $0x44] sm:$0xf] }
  0x67   :  { %1837 = vmatpush.bf16.msra.mxu3 %v3940_v50  ;;  %v3889_v15 = vld [vmem:[#allocation5 + $0x370] sm:$0xf0]  ;;  %v3764_v21 = vor.u32 %v5193_v12, %v3761_v13  ;;  %v5157_v25 = vld [vmem:[#allocation5 + $0x144] sm:$0xf] }
  0x68   :  { %1799 = vmatpush.bf16.msra.mxu0 %v3540_v56  ;;  %v3489_v24 = vld [vmem:[#allocation5 + $0x50] sm:$0xf0]  ;;  %v3892_v26 = vor.u32 %v5225_v14, %v3889_v15  ;;  %v5189_v28 = vld [vmem:[#allocation5 + $0x244] sm:$0xf] }
  0x69   :  { %v3617_v27 = vld [vmem:[#allocation5 + $0x150] sm:$0xf0]  ;;  %v5221_v30 = vld [vmem:[#allocation5 + $0x344] sm:$0xf]  ;;  %v3492_v32 = vor.u32 %v5125_v23, %v3489_v24 }
  0x6a   :  { %1812 = vmatpush.bf16.msra.mxu1 %v3668_v57  ;;  %1825 = vmatpush.bf16.msra.mxu2 %v3796_v58  ;;  %v3745_v29 = vld [vmem:[#allocation5 + $0x250] sm:$0xf0]  ;;  %v3620_v33 = vor.u32 %v5157_v25, %v3617_v27  ;;  %v5121_v35 = vld [vmem:[#allocation5 + $0x24] sm:$0xf] }
  0x6b   :  { %1838 = vmatpush.bf16.msra.mxu3 %v3924_v62  ;;  %v3873_v31 = vld [vmem:[#allocation5 + $0x350] sm:$0xf0]  ;;  %v3748_v34 = vor.u32 %v5189_v28, %v3745_v29  ;;  %v5153_v37 = vld [vmem:[#allocation5 + $0x124] sm:$0xf] }
  0x6c   :  { %1800 = vmatpush.bf16.msra.mxu0 %v3524_v4  ;;  %v3473_v36 = vld [vmem:[#allocation5 + $0x30] sm:$0xf0]  ;;  %v3876_v39 = vor.u32 %v5221_v30, %v3873_v31  ;;  %v5185_v43 = vld [vmem:[#allocation5 + $0x224] sm:$0xf] }
  0x6d   :  { %v3601_v40 = vld [vmem:[#allocation5 + $0x130] sm:$0xf0]  ;;  %v5217_v46 = vld [vmem:[#allocation5 + $0x324] sm:$0xf]  ;;  %v3476_v48 = vor.u32 %v5121_v35, %v3473_v36 }
  0x6e   :  { %1813 = vmatpush.bf16.msra.mxu1 %v3652_v5  ;;  %1826 = vmatpush.bf16.msra.mxu2 %v3780_v6  ;;  %v3729_v45 = vld [vmem:[#allocation5 + $0x230] sm:$0xf0]  ;;  %v5117_v49 = vld [vmem:[#allocation5 + $0x4] sm:$0xf]  ;;  %v3604_v51 = vor.u32 %v5153_v37, %v3601_v40 }
  0x6f   :  { %1839 = vmatpush.bf16.msra.mxu3 %v3908_v10  ;;  %v3857_v47 = vld [vmem:[#allocation5 + $0x330] sm:$0xf0]  ;;  %v3732_v52 = vor.u32 %v5185_v43, %v3729_v45  ;;  %v5149_v53 = vld [vmem:[#allocation5 + $0x104] sm:$0xf] }
  0x70   :  { %1801 = vmatpush.bf16.msra.mxu0 %v3508_v16  ;;  %v3457_v50 = vld [vmem:[#allocation5 + $0x10] sm:$0xf0]  ;;  %v5181_v55 = vld [vmem:[#allocation5 + $0x204] sm:$0xf]  ;;  %v3860_v56 = vor.u32 %v5217_v46, %v3857_v47 }
  0x71   :  { %v3585_v54 = vld [vmem:[#allocation5 + $0x110] sm:$0xf0]  ;;  %v5213_v58 = vld [vmem:[#allocation5 + $0x304] sm:$0xf]  ;;  %v3460_v63 = vor.u32 %v5117_v49, %v3457_v50 }
  0x72   :  { %1814 = vmatpush.bf16.msra.mxu1 %v3636_v17  ;;  %1827 = vmatpush.bf16.msra.mxu2 %v3764_v21  ;;  %v3713_v57 = vld [vmem:[#allocation5 + $0x210] sm:$0xf0]  ;;  %v5273_v60 = vld [vmem:[#allocation5 + $0x4e4] sm:$0xf]  ;;  %v3588_v3 = vor.u32 %v5149_v53, %v3585_v54 }
  0x73   :  { %1840 = vmatpush.bf16.msra.mxu3 %v3892_v26  ;;  %v3841_v59 = vld [vmem:[#allocation5 + $0x310] sm:$0xf0]  ;;  %v5305_v62 = vld [vmem:[#allocation5 + $0x5e4] sm:$0xf]  ;;  %v3716_v4 = vor.u32 %v5181_v55, %v3713_v57 }
  0x74   :  { %1802 = vmatpush.bf16.msra.mxu0 %v3492_v32  ;;  %v4081_v61 = vld [vmem:[#allocation5 + $0x4f0] sm:$0xf0]  ;;  %v5337_v1 = vld [vmem:[#allocation5 + $0x6e4] sm:$0xf]  ;;  %v3844_v7 = vor.u32 %v5213_v58, %v3841_v59 }
  0x75   :  { %v4209_v0 = vld [vmem:[#allocation5 + $0x5f0] sm:$0xf0]  ;;  %v5369_v5 = vld [vmem:[#allocation5 + $0x7e4] sm:$0xf]  ;;  %v4084_v8 = vor.u32 %v5273_v60, %v4081_v61 }
  0x76   :  { %1815 = vmatpush.bf16.msra.mxu1 %v3620_v33  ;;  %1828 = vmatpush.bf16.msra.mxu2 %v3748_v34  ;;  %v4337_v2 = vld [vmem:[#allocation5 + $0x6f0] sm:$0xf0]  ;;  %v4212_v9 = vor.u32 %v5305_v62, %v4209_v0  ;;  %v5269_v11 = vld [vmem:[#allocation5 + $0x4c4] sm:$0xf] }
  0x77   :  { %1841 = vmatpush.bf16.msra.mxu3 %v3876_v39  ;;  %v4465_v6 = vld [vmem:[#allocation5 + $0x7f0] sm:$0xf0]  ;;  %v4340_v10 = vor.u32 %v5337_v1, %v4337_v2  ;;  %v5301_v13 = vld [vmem:[#allocation5 + $0x5c4] sm:$0xf] }
  0x78   :  { %1803 = vmatpush.bf16.msra.mxu0 %v3476_v48  ;;  %v4065_v12 = vld [vmem:[#allocation5 + $0x4d0] sm:$0xf0]  ;;  %v4468_v14 = vor.u32 %v5369_v5, %v4465_v6  ;;  %v5333_v16 = vld [vmem:[#allocation5 + $0x6c4] sm:$0xf] }
  0x79   :  { %v4193_v15 = vld [vmem:[#allocation5 + $0x5d0] sm:$0xf0]  ;;  %v5365_v21 = vld [vmem:[#allocation5 + $0x7c4] sm:$0xf]  ;;  %v4068_v24 = vor.u32 %v5269_v11, %v4065_v12 }
  0x7a   :  { %1816 = vmatpush.bf16.msra.mxu1 %v3604_v51  ;;  %1829 = vmatpush.bf16.msra.mxu2 %v3732_v52  ;;  %v4321_v17 = vld [vmem:[#allocation5 + $0x6d0] sm:$0xf0]  ;;  %v4196_v25 = vor.u32 %v5301_v13, %v4193_v15  ;;  %v5265_v27 = vld [vmem:[#allocation5 + $0x4a4] sm:$0xf] }
  0x7b   :  { %1842 = vmatpush.bf16.msra.mxu3 %v3860_v56  ;;  %v4449_v23 = vld [vmem:[#allocation5 + $0x7d0] sm:$0xf0]  ;;  %v4324_v26 = vor.u32 %v5333_v16, %v4321_v17  ;;  %v5297_v29 = vld [vmem:[#allocation5 + $0x5a4] sm:$0xf] }
  0x7c   :  { %1804 = vmatpush.bf16.msra.mxu0 %v3460_v63  ;;  %v4049_v28 = vld [vmem:[#allocation5 + $0x4b0] sm:$0xf0]  ;;  %v4452_v30 = vor.u32 %v5365_v21, %v4449_v23  ;;  %v5329_v32 = vld [vmem:[#allocation5 + $0x6a4] sm:$0xf] }
  0x7d   :  { %v4177_v31 = vld [vmem:[#allocation5 + $0x5b0] sm:$0xf0]  ;;  %v5361_v34 = vld [vmem:[#allocation5 + $0x7a4] sm:$0xf]  ;;  %v4052_v36 = vor.u32 %v5265_v27, %v4049_v28 }
  0x7e   :  { %1817 = vmatpush.bf16.msra.mxu1 %v3588_v3  ;;  %1830 = vmatpush.bf16.msra.mxu2 %v3716_v4  ;;  %v4305_v33 = vld [vmem:[#allocation5 + $0x6b0] sm:$0xf0]  ;;  %v4180_v37 = vor.u32 %v5297_v29, %v4177_v31  ;;  %v5261_v40 = vld [vmem:[#allocation5 + $0x484] sm:$0xf] }
  0x7f   :  { %1843 = vmatpush.bf16.msra.mxu3 %v3844_v7  ;;  %v4433_v35 = vld [vmem:[#allocation5 + $0x7b0] sm:$0xf0]  ;;  %1805 = vmatmul.bf16.vlgmr.msra.gmra.mxu0 %v5799_v19  ;;  %v4308_v39 = vor.u32 %v5329_v32, %v4305_v33  ;;  %v5293_v45 = vld [vmem:[#allocation5 + $0x584] sm:$0xf] }
  0x80   :  { %1849 = vmatpush.bf16.msrb.mxu0 %v4084_v8  ;;  %v4033_v43 = vld [vmem:[#allocation5 + $0x490] sm:$0xf0]  ;;  %v4436_v46 = vor.u32 %v5361_v34, %v4433_v35  ;;  %v5325_v48 = vld [vmem:[#allocation5 + $0x684] sm:$0xf] }
  0x81   :  { %1831 = vmatmul.bf16.vlgmr.msra.gmra.mxu2 %v5797_v18  ;;  %1818 = vmatmul.bf16.vlgmr.msra.gmra.mxu1 %v5803_v22  ;;  %v4161_v47 = vld [vmem:[#allocation5 + $0x590] sm:$0xf0]  ;;  %v5357_v50 = vld [vmem:[#allocation5 + $0x784] sm:$0xf]  ;;  %v4036_v52 = vor.u32 %v5261_v40, %v4033_v43  ;;  %v3575_v43 = vld [vmem:[#allocation5 + $0xe8] sm:$0xf] }
  0x82   :  { %1862 = vmatpush.bf16.msrb.mxu1 %v4212_v9  ;;  %1875 = vmatpush.bf16.msrb.mxu2 %v4340_v10  ;;  %v4289_v49 = vld [vmem:[#allocation5 + $0x690] sm:$0xf0]  ;;  %v4164_v53 = vor.u32 %v5293_v45, %v4161_v47  ;;  %v5257_v55 = vld [vmem:[#allocation5 + $0x464] sm:$0xf]  ;;  %v5148_v45 = vld [vmem:[#allocation5 + $0xf4] sm:$0xf0] }
  0x83   :  { %1888 = vmatpush.bf16.msrb.mxu3 %v4468_v14  ;;  %v4417_v51 = vld [vmem:[#allocation5 + $0x790] sm:$0xf0]  ;;  %v4292_v54 = vor.u32 %v5325_v48, %v4289_v49  ;;  %v5289_v57 = vld [vmem:[#allocation5 + $0x564] sm:$0xf]  ;;  %v5180_v48 = vld [vmem:[#allocation5 + $0x1f4] sm:$0xf0] }
  0x84   :  { %1844 = vmatmul.bf16.vlgmr.msra.gmra.mxu3 %v5801_v20  ;;  %1850 = vmatpush.bf16.msrb.mxu0 %v4068_v24  ;;  %v4017_v56 = vld [vmem:[#allocation5 + $0x470] sm:$0xf0]  ;;  %v4420_v58 = vor.u32 %v5357_v50, %v4417_v51  ;;  %v5321_v60 = vld [vmem:[#allocation5 + $0x664] sm:$0xf]  ;;  %v3831_v49 = vld [vmem:[#allocation5 + $0x2e8] sm:$0xf] }
  0x85   :  { %v4145_v59 = vld [vmem:[#allocation5 + $0x570] sm:$0xf0]  ;;  %v5353_v62 = vld [vmem:[#allocation5 + $0x764] sm:$0xf]  ;;  %v4020_v0 = vor.u32 %v5257_v55, %v4017_v56  ;;  %v5212_v50 = vld [vmem:[#allocation5 + $0x2f4] sm:$0xf0]  ;;  %v3576_v56 = vor.u32 %v5148_v45, %v3575_v43 }
  0x86   :  { %1863 = vmatpush.bf16.msrb.mxu1 %v4196_v25  ;;  %1876 = vmatpush.bf16.msrb.mxu2 %v4324_v26  ;;  %v4273_v61 = vld [vmem:[#allocation5 + $0x670] sm:$0xf0]  ;;  %v4148_v1 = vor.u32 %v5289_v57, %v4145_v59  ;;  %v5253_v3 = vld [vmem:[#allocation5 + $0x444] sm:$0xf]  ;;  %v3559_v59 = vld [vmem:[#allocation5 + $0xc8] sm:$0xf] }
  0x87   :  { %1889 = vmatpush.bf16.msrb.mxu3 %v4452_v30  ;;  %v4401_v63 = vld [vmem:[#allocation5 + $0x770] sm:$0xf0]  ;;  %v4276_v2 = vor.u32 %v5321_v60, %v4273_v61  ;;  %v5285_v5 = vld [vmem:[#allocation5 + $0x544] sm:$0xf]  ;;  %v5144_v60 = vld [vmem:[#allocation5 + $0xd4] sm:$0xf0] }
  0x88   :  { %1851 = vmatpush.bf16.msrb.mxu0 %v4052_v36  ;;  %v4001_v4 = vld [vmem:[#allocation5 + $0x450] sm:$0xf0]  ;;  %v4404_v6 = vor.u32 %v5353_v62, %v4401_v63  ;;  %v5317_v8 = vld [vmem:[#allocation5 + $0x644] sm:$0xf]  ;;  %v3687_v61 = vld [vmem:[#allocation5 + $0x1c8] sm:$0xf] }
  0x89   :  { %v4129_v7 = vld [vmem:[#allocation5 + $0x550] sm:$0xf0]  ;;  %v5349_v10 = vld [vmem:[#allocation5 + $0x744] sm:$0xf]  ;;  %v4004_v12 = vor.u32 %v5253_v3, %v4001_v4  ;;  %v5176_v63 = vld [vmem:[#allocation5 + $0x1d4] sm:$0xf0]  ;;  %v3560_v4 = vor.u32 %v5144_v60, %v3559_v59 }
  0x8a   :  { %1864 = vmatpush.bf16.msrb.mxu1 %v4180_v37  ;;  %1877 = vmatpush.bf16.msrb.mxu2 %v4308_v39  ;;  %v4257_v9 = vld [vmem:[#allocation5 + $0x650] sm:$0xf0]  ;;  %v4132_v13 = vor.u32 %v5285_v5, %v4129_v7  ;;  %v5249_v15 = vld [vmem:[#allocation5 + $0x424] sm:$0xf]  ;;  %v5240_v3 = vld [vmem:[#allocation5 + $0x3d4] sm:$0xf0]  ;;  %v3688_v5 = vor.u32 %v5176_v63, %v3687_v61 }
  0x8b   :  { %1890 = vmatpush.bf16.msrb.mxu3 %v4436_v46  ;;  %v4385_v11 = vld [vmem:[#allocation5 + $0x750] sm:$0xf0]  ;;  %v4260_v14 = vor.u32 %v5317_v8, %v4257_v9  ;;  %v5281_v17 = vld [vmem:[#allocation5 + $0x524] sm:$0xf]  ;;  %v3703_v46 = vld [vmem:[#allocation5 + $0x1e8] sm:$0xf] }
  0x8c   :  { %1852 = vmatpush.bf16.msrb.mxu0 %v4036_v52  ;;  %v3985_v16 = vld [vmem:[#allocation5 + $0x430] sm:$0xf0]  ;;  %v4388_v21 = vor.u32 %v5349_v10, %v4385_v11  ;;  %v5313_v24 = vld [vmem:[#allocation5 + $0x624] sm:$0xf]  ;;  %v3704_v57 = vor.u32 %v5180_v48, %v3703_v46  ;;  %v3543_v7 = vld [vmem:[#allocation5 + $0xa8] sm:$0xf] }
  0x8d   :  { %v4113_v23 = vld [vmem:[#allocation5 + $0x530] sm:$0xf0]  ;;  %v5345_v26 = vld [vmem:[#allocation5 + $0x724] sm:$0xf]  ;;  %v3988_v28 = vor.u32 %v5249_v15, %v3985_v16  ;;  %v5140_v8 = vld [vmem:[#allocation5 + $0xb4] sm:$0xf0] }
  0x8e   :  { %1865 = vmatpush.bf16.msrb.mxu1 %v4164_v53  ;;  %1878 = vmatpush.bf16.msrb.mxu2 %v4292_v54  ;;  %v4241_v25 = vld [vmem:[#allocation5 + $0x630] sm:$0xf0]  ;;  %v5245_v29 = vld [vmem:[#allocation5 + $0x404] sm:$0xf]  ;;  %v4116_v31 = vor.u32 %v5281_v17, %v4113_v23  ;;  %v3959_v53 = vld [vmem:[#allocation5 + $0x3e8] sm:$0xf]  ;;  %v3544_v16 = vor.u32 %v5140_v8, %v3543_v7 }
  0x8f   :  { %1891 = vmatpush.bf16.msrb.mxu3 %v4420_v58  ;;  %v4369_v27 = vld [vmem:[#allocation5 + $0x730] sm:$0xf0]  ;;  %v4244_v32 = vor.u32 %v5313_v24, %v4241_v25  ;;  %v5277_v33 = vld [vmem:[#allocation5 + $0x504] sm:$0xf]  ;;  %v5244_v54 = vld [vmem:[#allocation5 + $0x3f4] sm:$0xf0]  ;;  %v3832_v58 = vor.u32 %v5212_v50, %v3831_v49 }
  0x90   :  { %1853 = vmatpush.bf16.msrb.mxu0 %v4020_v0  ;;  %v3969_v30 = vld [vmem:[#allocation5 + $0x410] sm:$0xf0]  ;;  %v5309_v35 = vld [vmem:[#allocation5 + $0x604] sm:$0xf]  ;;  %v4372_v36 = vor.u32 %v5345_v26, %v4369_v27  ;;  %v3960_v62 = vor.u32 %v5244_v54, %v3959_v53  ;;  %v3815_v0 = vld [vmem:[#allocation5 + $0x2c8] sm:$0xf] }
  0x91   :  { %v4097_v34 = vld [vmem:[#allocation5 + $0x510] sm:$0xf0]  ;;  %v5341_v39 = vld [vmem:[#allocation5 + $0x704] sm:$0xf]  ;;  %v3972_v47 = vor.u32 %v5245_v29, %v3969_v30  ;;  %v3671_v9 = vld [vmem:[#allocation5 + $0x1a8] sm:$0xf] }
  0x92   :  { %1866 = vmatpush.bf16.msrb.mxu1 %v4148_v1  ;;  %1879 = vmatpush.bf16.msrb.mxu2 %v4276_v2  ;;  %v4225_v37 = vld [vmem:[#allocation5 + $0x610] sm:$0xf0]  ;;  %v4100_v51 = vor.u32 %v5277_v33, %v4097_v34  ;;  %v5208_v1 = vld [vmem:[#allocation5 + $0x2d4] sm:$0xf0]  ;;  %v3943_v2 = vld [vmem:[#allocation5 + $0x3c8] sm:$0xf] }
  0x93   :  { %1892 = vmatpush.bf16.msrb.mxu3 %v4404_v6  ;;  %v4353_v40 = vld [vmem:[#allocation5 + $0x710] sm:$0xf0]  ;;  %v4228_v52 = vor.u32 %v5309_v35, %v4225_v37  ;;  %v3816_v6 = vor.u32 %v5208_v1, %v3815_v0  ;;  %v3944_v10 = vor.u32 %v5240_v3, %v3943_v2  ;;  %v5172_v11 = vld [vmem:[#allocation5 + $0x1b4] sm:$0xf0]  ;;  %v3527_v23 = vld [vmem:[#allocation5 + $0x88] sm:$0xf] }
  0x94   :  { %1854 = vmatpush.bf16.msrb.mxu0 %v4004_v12  ;;  %v4356_v55 = vor.u32 %v5341_v39, %v4353_v40  ;;  %v3799_v12 = vld [vmem:[#allocation5 + $0x2a8] sm:$0xf]  ;;  %v5236_v15 = vld [vmem:[#allocation5 + $0x3b4] sm:$0xf0]  ;;  %v3672_v17 = vor.u32 %v5172_v11, %v3671_v9 }
  0x95   :  { %v5136_v24 = vld [vmem:[#allocation5 + $0x94] sm:$0xf0]  ;;  %v3655_v25 = vld [vmem:[#allocation5 + $0x188] sm:$0xf] }
  0x96   :  { %1867 = vmatpush.bf16.msrb.mxu1 %v4132_v13  ;;  %1880 = vmatpush.bf16.msrb.mxu2 %v4260_v14  ;;  %v5204_v13 = vld [vmem:[#allocation5 + $0x2b4] sm:$0xf0]  ;;  %v3927_v14 = vld [vmem:[#allocation5 + $0x3a8] sm:$0xf] }
  0x97   :  { %1893 = vmatpush.bf16.msrb.mxu3 %v4388_v21  ;;  %v3800_v21 = vor.u32 %v5204_v13, %v3799_v12  ;;  %v3928_v26 = vor.u32 %v5236_v15, %v3927_v14  ;;  %v5168_v27 = vld [vmem:[#allocation5 + $0x194] sm:$0xf0]  ;;  %v3911_v30 = vld [vmem:[#allocation5 + $0x388] sm:$0xf] }
  0x98   :  { %1855 = vmatpush.bf16.msrb.mxu0 %v3988_v28  ;;  %v3783_v28 = vld [vmem:[#allocation5 + $0x288] sm:$0xf]  ;;  %v5200_v29 = vld [vmem:[#allocation5 + $0x294] sm:$0xf0]  ;;  %v3656_v33 = vor.u32 %v5168_v27, %v3655_v25 }
  0x99   :  { %v3784_v34 = vor.u32 %v5200_v29, %v3783_v28  ;;  %v3511_v35 = vld [vmem:[#allocation5 + $0x68] sm:$0xf]  ;;  %v5164_v40 = vld [vmem:[#allocation5 + $0x174] sm:$0xf0] }
  0x9a   :  { %1868 = vmatpush.bf16.msrb.mxu1 %v4116_v31  ;;  %1881 = vmatpush.bf16.msrb.mxu2 %v4244_v32  ;;  %v5232_v31 = vld [vmem:[#allocation5 + $0x394] sm:$0xf0]  ;;  %v3528_v32 = vor.u32 %v5136_v24, %v3527_v23  ;;  %v3639_v37 = vld [vmem:[#allocation5 + $0x168] sm:$0xf] }
  0x9b   :  { %1894 = vmatpush.bf16.msrb.mxu3 %v4372_v36  ;;  %v5132_v36 = vld [vmem:[#allocation5 + $0x74] sm:$0xf0]  ;;  %v3912_v39 = vor.u32 %v5232_v31, %v3911_v30  ;;  %v3767_v43 = vld [vmem:[#allocation5 + $0x268] sm:$0xf]  ;;  %v3640_v49 = vor.u32 %v5164_v40, %v3639_v37 }
  0x9c   :  { %1856 = vmatpush.bf16.msrb.mxu0 %v3972_v47  ;;  %v5196_v45 = vld [vmem:[#allocation5 + $0x274] sm:$0xf0]  ;;  %v3895_v46 = vld [vmem:[#allocation5 + $0x368] sm:$0xf]  ;;  %v3512_v48 = vor.u32 %v5132_v36, %v3511_v35 }
  0x9d   :  { %v5228_v47 = vld [vmem:[#allocation5 + $0x374] sm:$0xf0]  ;;  %v3768_v50 = vor.u32 %v5196_v45, %v3767_v43  ;;  %v3623_v53 = vld [vmem:[#allocation5 + $0x148] sm:$0xf] }
  0x9e   :  { %1869 = vmatpush.bf16.msrb.mxu1 %v4100_v51  ;;  %1882 = vmatpush.bf16.msrb.mxu2 %v4228_v52  ;;  %v3495_v51 = vld [vmem:[#allocation5 + $0x48] sm:$0xf]  ;;  %v5128_v52 = vld [vmem:[#allocation5 + $0x54] sm:$0xf0]  ;;  %v3896_v54 = vor.u32 %v5228_v47, %v3895_v46 }
  0x9f   :  { %1895 = vmatpush.bf16.msrb.mxu3 %v4356_v55  ;;  %1857 = vmatmul.bf16.vlgmr.msrb.gmra.mxu0 %v5811_v41  ;;  %v5160_v55 = vld [vmem:[#allocation5 + $0x154] sm:$0xf0]  ;;  %v3496_v60 = vor.u32 %v5128_v52, %v3495_v51  ;;  %v3479_v63 = vld [vmem:[#allocation5 + $0x28] sm:$0xf] }
  0xa0   :  { %1901 = vmatpush.bf16.msra.mxu0 %v3576_v56  ;;  %v3751_v56 = vld [vmem:[#allocation5 + $0x248] sm:$0xf]  ;;  %v5224_v59 = vld [vmem:[#allocation5 + $0x354] sm:$0xf0]  ;;  %v3624_v61 = vor.u32 %v5160_v55, %v3623_v53 }
  0xa1   :  { %1883 = vmatmul.bf16.vlgmr.msrb.gmra.mxu2 %v5809_v38  ;;  %1870 = vmatmul.bf16.vlgmr.msrb.gmra.mxu1 %v5815_v44  ;;  %v5124_v0 = vld [vmem:[#allocation5 + $0x34] sm:$0xf0]  ;;  %v3607_v1 = vld [vmem:[#allocation5 + $0x128] sm:$0xf] }
  0xa2   :  { %1914 = vmatpush.bf16.msra.mxu1 %v3704_v57  ;;  %1927 = vmatpush.bf16.msra.mxu2 %v3832_v58  ;;  %v5192_v57 = vld [vmem:[#allocation5 + $0x254] sm:$0xf0]  ;;  %v3879_v58 = vld [vmem:[#allocation5 + $0x348] sm:$0xf]  ;;  %v3480_v8 = vor.u32 %v5124_v0, %v3479_v63 }
  0xa3   :  { %1940 = vmatpush.bf16.msra.mxu3 %v3960_v62  ;;  %v3752_v62 = vor.u32 %v5192_v57, %v3751_v56  ;;  %v3880_v2 = vor.u32 %v5224_v59, %v3879_v58  ;;  %v5156_v3 = vld [vmem:[#allocation5 + $0x134] sm:$0xf0]  ;;  %v3463_v9 = vld [vmem:[#allocation5 + $0x8] sm:$0xf] }
  0xa4   :  { %1896 = vmatmul.bf16.vlgmr.msrb.gmra.mxu3 %v5813_v42  ;;  %1902 = vmatpush.bf16.msra.mxu0 %v3560_v4  ;;  %v3735_v4 = vld [vmem:[#allocation5 + $0x228] sm:$0xf]  ;;  %v5220_v7 = vld [vmem:[#allocation5 + $0x334] sm:$0xf0]  ;;  %v3608_v11 = vor.u32 %v5156_v3, %v3607_v1 }
  0xa5   :  { %v3591_v13 = vld [vmem:[#allocation5 + $0x108] sm:$0xf]  ;;  %v5152_v14 = vld [vmem:[#allocation5 + $0x114] sm:$0xf0] }
  0xa6   :  { %1915 = vmatpush.bf16.msra.mxu1 %v3688_v5  ;;  %1928 = vmatpush.bf16.msra.mxu2 %v3816_v6  ;;  %v5188_v5 = vld [vmem:[#allocation5 + $0x234] sm:$0xf0]  ;;  %v3863_v6 = vld [vmem:[#allocation5 + $0x328] sm:$0xf]  ;;  %v3592_v31 = vor.u32 %v5152_v14, %v3591_v13 }
  0xa7   :  { %1941 = vmatpush.bf16.msra.mxu3 %v3944_v10  ;;  %v5120_v10 = vld [vmem:[#allocation5 + $0x14] sm:$0xf0]  ;;  %v3736_v12 = vor.u32 %v5188_v5, %v3735_v4  ;;  %v3719_v15 = vld [vmem:[#allocation5 + $0x208] sm:$0xf] }
  0xa8   :  { %1903 = vmatpush.bf16.msra.mxu0 %v3544_v16  ;;  %v3864_v16 = vor.u32 %v5220_v7, %v3863_v6  ;;  %v5216_v23 = vld [vmem:[#allocation5 + $0x314] sm:$0xf0]  ;;  %v4087_v24 = vld [vmem:[#allocation5 + $0x4e8] sm:$0xf]  ;;  %v3464_v27 = vor.u32 %v5120_v10, %v3463_v9 }
  0xa9   :  { %v5276_v25 = vld [vmem:[#allocation5 + $0x4f4] sm:$0xf0]  ;;  %v4343_v29 = vld [vmem:[#allocation5 + $0x6e8] sm:$0xf] }
  0xaa   :  { %1916 = vmatpush.bf16.msra.mxu1 %v3672_v17  ;;  %1929 = vmatpush.bf16.msra.mxu2 %v3800_v21  ;;  %v5184_v17 = vld [vmem:[#allocation5 + $0x214] sm:$0xf0]  ;;  %v3847_v21 = vld [vmem:[#allocation5 + $0x308] sm:$0xf]  ;;  %v4088_v36 = vor.u32 %v5276_v25, %v4087_v24 }
  0xab   :  { %1942 = vmatpush.bf16.msra.mxu3 %v3928_v26  ;;  %v4215_v26 = vld [vmem:[#allocation5 + $0x5e8] sm:$0xf]  ;;  %v5308_v28 = vld [vmem:[#allocation5 + $0x5f4] sm:$0xf0]  ;;  %v3848_v35 = vor.u32 %v5216_v23, %v3847_v21 }
  0xac   :  { %1904 = vmatpush.bf16.msra.mxu0 %v3528_v32  ;;  %v5340_v30 = vld [vmem:[#allocation5 + $0x6f4] sm:$0xf0]  ;;  %v3720_v32 = vor.u32 %v5184_v17, %v3719_v15  ;;  %v4216_v37 = vor.u32 %v5308_v28, %v4215_v26  ;;  %v4071_v40 = vld [vmem:[#allocation5 + $0x4c8] sm:$0xf]  ;;  %v5833_v26 = vld [vmem:[#allocation7] sm:$0xf] }
  0xad   :  { %v5272_v43 = vld [vmem:[#allocation5 + $0x4d4] sm:$0xf0]  ;;  %v4199_v45 = vld [vmem:[#allocation5 + $0x5c8] sm:$0xf] }
  0xae   :  { %1917 = vmatpush.bf16.msra.mxu1 %v3656_v33  ;;  %1930 = vmatpush.bf16.msra.mxu2 %v3784_v34  ;;  %v4471_v33 = vld [vmem:[#allocation5 + $0x7e8] sm:$0xf]  ;;  %v5372_v34 = vld [vmem:[#allocation5 + $0x7f4] sm:$0xf0]  ;;  %v4072_v52 = vor.u32 %v5272_v43, %v4071_v40 }
  0xaf   :  { %1943 = vmatpush.bf16.msra.mxu3 %v3912_v39  ;;  %v4344_v39 = vor.u32 %v5340_v30, %v4343_v29  ;;  %v4472_v46 = vor.u32 %v5372_v34, %v4471_v33  ;;  %v5304_v47 = vld [vmem:[#allocation5 + $0x5d4] sm:$0xf0]  ;;  %v4055_v55 = vld [vmem:[#allocation5 + $0x4a8] sm:$0xf] }
  0xb0   :  { %1905 = vmatpush.bf16.msra.mxu0 %v3512_v48  ;;  %v4327_v48 = vld [vmem:[#allocation5 + $0x6c8] sm:$0xf]  ;;  %v5368_v51 = vld [vmem:[#allocation5 + $0x7d4] sm:$0xf0]  ;;  %v4200_v53 = vor.u32 %v5304_v47, %v4199_v45 }
  0xb1   :  { %v5268_v56 = vld [vmem:[#allocation5 + $0x4b4] sm:$0xf0]  ;;  %v4183_v57 = vld [vmem:[#allocation5 + $0x5a8] sm:$0xf] }
  0xb2   :  { %1918 = vmatpush.bf16.msra.mxu1 %v3640_v49  ;;  %1931 = vmatpush.bf16.msra.mxu2 %v3768_v50  ;;  %v5336_v49 = vld [vmem:[#allocation5 + $0x6d4] sm:$0xf0]  ;;  %v4455_v50 = vld [vmem:[#allocation5 + $0x7c8] sm:$0xf]  ;;  %v4056_v0 = vor.u32 %v5268_v56, %v4055_v55 }
  0xb3   :  { %1944 = vmatpush.bf16.msra.mxu3 %v3896_v54  ;;  %v4328_v54 = vor.u32 %v5336_v49, %v4327_v48  ;;  %v4456_v58 = vor.u32 %v5368_v51, %v4455_v50  ;;  %v5300_v59 = vld [vmem:[#allocation5 + $0x5b4] sm:$0xf0]  ;;  %v4039_v3 = vld [vmem:[#allocation5 + $0x488] sm:$0xf] }
  0xb4   :  { %1906 = vmatpush.bf16.msra.mxu0 %v3496_v60  ;;  %v4311_v60 = vld [vmem:[#allocation5 + $0x6a8] sm:$0xf]  ;;  %v5364_v63 = vld [vmem:[#allocation5 + $0x7b4] sm:$0xf0]  ;;  %v4184_v1 = vor.u32 %v5300_v59, %v4183_v57 }
  0xb5   :  { %v5264_v4 = vld [vmem:[#allocation5 + $0x494] sm:$0xf0]  ;;  %v4167_v5 = vld [vmem:[#allocation5 + $0x588] sm:$0xf] }
  0xb6   :  { %1919 = vmatpush.bf16.msra.mxu1 %v3624_v61  ;;  %1932 = vmatpush.bf16.msra.mxu2 %v3752_v62  ;;  %v5332_v61 = vld [vmem:[#allocation5 + $0x6b4] sm:$0xf0]  ;;  %v4439_v62 = vld [vmem:[#allocation5 + $0x7a8] sm:$0xf] }
  0xb7   :  { %1945 = vmatpush.bf16.msra.mxu3 %v3880_v2  ;;  %v4312_v2 = vor.u32 %v5332_v61, %v4311_v60  ;;  %v4440_v6 = vor.u32 %v5364_v63, %v4439_v62  ;;  %v5296_v7 = vld [vmem:[#allocation5 + $0x594] sm:$0xf0]  ;;  %v4423_v10 = vld [vmem:[#allocation5 + $0x788] sm:$0xf] }
  0xb8   :  { %1907 = vmatpush.bf16.msra.mxu0 %v3480_v8  ;;  %v4295_v8 = vld [vmem:[#allocation5 + $0x688] sm:$0xf]  ;;  %v5328_v9 = vld [vmem:[#allocation5 + $0x694] sm:$0xf0]  ;;  %v4168_v14 = vor.u32 %v5296_v7, %v4167_v5 }
  0xb9   :  { %v4023_v13 = vld [vmem:[#allocation5 + $0x468] sm:$0xf]  ;;  %v4296_v15 = vor.u32 %v5328_v9, %v4295_v8  ;;  %v5292_v21 = vld [vmem:[#allocation5 + $0x574] sm:$0xf0] }
  0xba   :  { %1920 = vmatpush.bf16.msra.mxu1 %v3608_v11  ;;  %1933 = vmatpush.bf16.msra.mxu2 %v3736_v12  ;;  %v5360_v11 = vld [vmem:[#allocation5 + $0x794] sm:$0xf0]  ;;  %v4040_v12 = vor.u32 %v5264_v4, %v4039_v3  ;;  %v4151_v17 = vld [vmem:[#allocation5 + $0x568] sm:$0xf] }
  0xbb   :  { %1946 = vmatpush.bf16.msra.mxu3 %v3864_v16  ;;  %v5260_v16 = vld [vmem:[#allocation5 + $0x474] sm:$0xf0]  ;;  %v4424_v23 = vor.u32 %v5360_v11, %v4423_v10  ;;  %v4279_v24 = vld [vmem:[#allocation5 + $0x668] sm:$0xf] }
  0xbc   :  { %1908 = vmatpush.bf16.msra.mxu0 %v3464_v27  ;;  %v5324_v25 = vld [vmem:[#allocation5 + $0x674] sm:$0xf0]  ;;  %v4407_v27 = vld [vmem:[#allocation5 + $0x768] sm:$0xf]  ;;  %v4024_v29 = vor.u32 %v5260_v16, %v4023_v13  ;;  %v5146_v13 = vld [vmem:[#allocation5 + $0xec] sm:$0xf] }
  0xbd   :  { %v5356_v28 = vld [vmem:[#allocation5 + $0x774] sm:$0xf0]  ;;  %v4007_v30 = vld [vmem:[#allocation5 + $0x448] sm:$0xf] }
  0xbe   :  { %1921 = vmatpush.bf16.msra.mxu1 %v3592_v31  ;;  %1934 = vmatpush.bf16.msra.mxu2 %v3720_v32  ;;  %v4152_v31 = vor.u32 %v5292_v21, %v4151_v17  ;;  %v4280_v32 = vor.u32 %v5324_v25, %v4279_v24  ;;  %v5256_v33 = vld [vmem:[#allocation5 + $0x454] sm:$0xf0]  ;;  %v4135_v34 = vld [vmem:[#allocation5 + $0x548] sm:$0xf]  ;;  %v3705_v17 = vld [vmem:[#allocation5 + $0x1f8] sm:$0xf0] }
  0xbf   :  { %1947 = vmatpush.bf16.msra.mxu3 %v3848_v35  ;;  %1909 = vmatmul.bf16.vlgmr.msra.gmra.mxu0 %v5799_v19  ;;  %v377_v35 = vperm.slane %v5833_v26, 0  ;;  %v5320_v40 = vld [vmem:[#allocation5 + $0x654] sm:$0xf0]  ;;  %v4391_v43 = vld [vmem:[#allocation5 + $0x748] sm:$0xf] }
  0xc0   :  { %1953 = vmatpush.bf16.msrb.mxu0 %v4088_v36  ;;  %v4408_v36 = vor.u32 %v5356_v28, %v4407_v27  ;;  %v5352_v45 = vld [vmem:[#allocation5 + $0x754] sm:$0xf0]  ;;  %v3991_v50 = vld [vmem:[#allocation5 + $0x428] sm:$0xf]  ;;  %v5210_v21 = vld [vmem:[#allocation5 + $0x2ec] sm:$0xf] }
  0xc1   :  { %1935 = vmatmul.bf16.vlgmr.msra.gmra.mxu2 %v5797_v18  ;;  %1922 = vmatmul.bf16.vlgmr.msra.gmra.mxu1 %v5803_v22  ;;  %v5252_v51 = vld [vmem:[#allocation5 + $0x434] sm:$0xf0]  ;;  %v4392_v55 = vor.u32 %v5352_v45, %v4391_v43  ;;  %v4247_v57 = vld [vmem:[#allocation5 + $0x628] sm:$0xf]  ;;  %v3689_v43 = vld [vmem:[#allocation5 + $0x1d8] sm:$0xf0] }
  0xc2   :  { %1966 = vmatpush.bf16.msrb.mxu1 %v4216_v37  ;;  %1979 = vmatpush.bf16.msrb.mxu2 %v4344_v39  ;;  %v5288_v37 = vld [vmem:[#allocation5 + $0x554] sm:$0xf0]  ;;  %v4263_v39 = vld [vmem:[#allocation5 + $0x648] sm:$0xf]  ;;  %v3992_v62 = vor.u32 %v5252_v51, %v3991_v50  ;;  %v5206_v45 = vld [vmem:[#allocation5 + $0x2cc] sm:$0xf] }
  0xc3   :  { %1992 = vmatpush.bf16.msrb.mxu3 %v4472_v46  ;;  %v4008_v46 = vor.u32 %v5256_v33, %v4007_v30  ;;  %v4136_v48 = vor.u32 %v5288_v37, %v4135_v34  ;;  %v4264_v49 = vor.u32 %v5320_v40, %v4263_v39  ;;  %v5284_v56 = vld [vmem:[#allocation5 + $0x534] sm:$0xf0]  ;;  %v4375_v59 = vld [vmem:[#allocation5 + $0x728] sm:$0xf]  ;;  %v3961_v30 = vld [vmem:[#allocation5 + $0x3f8] sm:$0xf0] }
  0xc4   :  { %1948 = vmatmul.bf16.vlgmr.msra.gmra.mxu3 %v5801_v20  ;;  %1954 = vmatpush.bf16.msrb.mxu0 %v4072_v52  ;;  %v4119_v52 = vld [vmem:[#allocation5 + $0x528] sm:$0xf]  ;;  %v5348_v60 = vld [vmem:[#allocation5 + $0x734] sm:$0xf0]  ;;  %v3561_v37 = vld [vmem:[#allocation5 + $0xd8] sm:$0xf0] }
  0xc5   :  { %v3975_v63 = vld [vmem:[#allocation5 + $0x408] sm:$0xf]  ;;  %v5280_v4 = vld [vmem:[#allocation5 + $0x514] sm:$0xf0]  ;;  %v4376_v7 = vor.u32 %v5348_v60, %v4375_v59  ;;  %v5174_v39 = vld [vmem:[#allocation5 + $0x1cc] sm:$0xf] }
  0xc6   :  { %1967 = vmatpush.bf16.msrb.mxu1 %v4200_v53  ;;  %1980 = vmatpush.bf16.msrb.mxu2 %v4328_v54  ;;  %v4103_v3 = vld [vmem:[#allocation5 + $0x508] sm:$0xf]  ;;  %v5312_v8 = vld [vmem:[#allocation5 + $0x614] sm:$0xf0]  ;;  %v5202_v59 = vld [vmem:[#allocation5 + $0x2ac] sm:$0xf] }
  0xc7   :  { %1993 = vmatpush.bf16.msrb.mxu3 %v4456_v58  ;;  %v5316_v58 = vld [vmem:[#allocation5 + $0x634] sm:$0xf0]  ;;  %v4231_v5 = vld [vmem:[#allocation5 + $0x608] sm:$0xf]  ;;  %v4104_v27 = vor.u32 %v5280_v4, %v4103_v3  ;;  %v3801_v60 = vld [vmem:[#allocation5 + $0x2b8] sm:$0xf0] }
  0xc8   :  { %1955 = vmatpush.bf16.msrb.mxu0 %v4056_v0  ;;  %v5248_v0 = vld [vmem:[#allocation5 + $0x414] sm:$0xf0]  ;;  %v4359_v9 = vld [vmem:[#allocation5 + $0x708] sm:$0xf]  ;;  %v4232_v28 = vor.u32 %v5312_v8, %v4231_v5  ;;  %v3529_v3 = vld [vmem:[#allocation5 + $0x98] sm:$0xf0] }
  0xc9   :  { %v5344_v10 = vld [vmem:[#allocation5 + $0x714] sm:$0xf0]  ;;  %v3976_v16 = vor.u32 %v5248_v0, %v3975_v63  ;;  %v5166_v4 = vld [vmem:[#allocation5 + $0x18c] sm:$0xf]  ;;  %v3785_v8 = vld [vmem:[#allocation5 + $0x298] sm:$0xf0] }
  0xca   :  { %1968 = vmatpush.bf16.msrb.mxu1 %v4184_v1  ;;  %1981 = vmatpush.bf16.msrb.mxu2 %v4312_v2  ;;  %v1702_v47 = vpop.f32.mrf.mxu0  ;;  %v1715_v54 = vpop.f32.mrf.mxu1  ;;  %v4120_v1 = vor.u32 %v5284_v56, %v4119_v52  ;;  %v4248_v2 = vor.u32 %v5316_v58, %v4247_v57  ;;  %v3692_v52 = vor.u32 %v5174_v39, %v3689_v43  ;;  %v5170_v56 = vld [vmem:[#allocation5 + $0x1ac] sm:$0xf]  ;;  %v3673_v58 = vld [vmem:[#allocation5 + $0x1b8] sm:$0xf0] }
  0xcb   :  { %1994 = vmatpush.bf16.msrb.mxu3 %v4440_v6  ;;  %v1703_v53 = vadd.f32 %v1702_v47, %v377_v35  ;;  %v1728_v6 = vpop.f32.mrf.mxu2  ;;  %v5238_v47 = vld [vmem:[#allocation5 + $0x3cc] sm:$0xf]  ;;  %v3676_v0 = vor.u32 %v5170_v56, %v3673_v58  ;;  %v3625_v43 = vld [vmem:[#allocation5 + $0x158] sm:$0xf0] }
  0xcc   :  { %1956 = vmatpush.bf16.msrb.mxu0 %v4040_v12  ;;  %v1741_v12 = vpop.f32.mrf.mxu3  ;;  %v5158_v39 = vld [vmem:[#allocation5 + $0x14c] sm:$0xf] }
  0xcd   :  { %v1716_v61 = vadd.f32 %v1715_v54, %v1703_v53  ;;  %v5138_v54 = vld [vmem:[#allocation5 + $0xac] sm:$0xf] }
  0xce   :  { %1969 = vmatpush.bf16.msrb.mxu1 %v4168_v14  ;;  %1982 = vmatpush.bf16.msrb.mxu2 %v4296_v15  ;;  %v3577_v14 = vld [vmem:[#allocation5 + $0xf8] sm:$0xf0]  ;;  %v5178_v15 = vld [vmem:[#allocation5 + $0x1ec] sm:$0xf] }
  0xcf   :  { %1995 = vmatpush.bf16.msrb.mxu3 %v4424_v23  ;;  %v1729_v11 = vadd.f32 %v1728_v6, %v1716_v61  ;;  %v3833_v23 = vld [vmem:[#allocation5 + $0x2f8] sm:$0xf0]  ;;  %v3580_v33 = vor.u32 %v5146_v13, %v3577_v14  ;;  %v3708_v34 = vor.u32 %v5178_v15, %v3705_v17  ;;  %v5234_v61 = vld [vmem:[#allocation5 + $0x3ac] sm:$0xf] }
  0xd0   :  { %1957 = vmatpush.bf16.msrb.mxu0 %v4024_v29  ;;  %v5242_v29 = vld [vmem:[#allocation5 + $0x3ec] sm:$0xf]  ;;  %v3836_v35 = vor.u32 %v5210_v21, %v3833_v23  ;;  %v3657_v6 = vld [vmem:[#allocation5 + $0x198] sm:$0xf0] }
  0xd1   :  { %v5836_v24 = vadd.f32 %v1741_v12, %v1729_v11  ;;  %v3964_v40 = vor.u32 %v5242_v29, %v3961_v30  ;;  %v3660_v13 = vor.u32 %v5166_v4, %v3657_v6  ;;  %v5130_v15 = vld [vmem:[#allocation5 + $0x6c] sm:$0xf]  ;;  %v3769_v29 = vld [vmem:[#allocation5 + $0x278] sm:$0xf0] }
  0xd2   :  { %1970 = vmatpush.bf16.msrb.mxu1 %v4152_v31  ;;  %1983 = vmatpush.bf16.msrb.mxu2 %v4280_v32  ;;  %v1704_v25 = vpop.f32.mrf.mxu0  ;;  %v1717_v31 = vpop.f32.mrf.mxu1  ;;  %v4360_v32 = vor.u32 %v5344_v10, %v4359_v9  ;;  %v5230_v9 = vld [vmem:[#allocation5 + $0x38c] sm:$0xf]  ;;  %v3913_v10 = vld [vmem:[#allocation5 + $0x398] sm:$0xf0] }
  0xd3   :  { %1996 = vmatpush.bf16.msrb.mxu3 %v4408_v36  ;;  %v5142_v36 = vld [vmem:[#allocation5 + $0xcc] sm:$0xf]  ;;  %v3916_v25 = vor.u32 %v5230_v9, %v3913_v10  ;;  %v3897_v31 = vld [vmem:[#allocation5 + $0x378] sm:$0xf0] }
  0xd4   :  { %1958 = vmatpush.bf16.msrb.mxu0 %v4008_v46  ;;  %v3817_v46 = vld [vmem:[#allocation5 + $0x2d8] sm:$0xf0]  ;;  %v3564_v50 = vor.u32 %v5142_v36, %v3561_v37  ;;  %v1743_v51 = vpop.f32.mrf.mxu3  ;;  %v5162_v17 = vld [vmem:[#allocation5 + $0x16c] sm:$0xf] }
  0xd5   :  { %v3820_v53 = vor.u32 %v5206_v45, %v3817_v46  ;;  %v5226_v30 = vld [vmem:[#allocation5 + $0x36c] sm:$0xf]  ;;  %v3497_v37 = vld [vmem:[#allocation5 + $0x58] sm:$0xf0] }
  0xd6   :  { %1971 = vmatpush.bf16.msrb.mxu1 %v4136_v48  ;;  %1984 = vmatpush.bf16.msrb.mxu2 %v4264_v49  ;;  %v3945_v48 = vld [vmem:[#allocation5 + $0x3d8] sm:$0xf0]  ;;  %v1730_v49 = vpop.f32.mrf.mxu2  ;;  %v5126_v36 = vld [vmem:[#allocation5 + $0x4c] sm:$0xf] }
  0xd7   :  { %1997 = vmatpush.bf16.msrb.mxu3 %v4392_v55  ;;  %v3545_v55 = vld [vmem:[#allocation5 + $0xb8] sm:$0xf0]  ;;  %v3948_v57 = vor.u32 %v5238_v47, %v3945_v48  ;;  %v5190_v45 = vld [vmem:[#allocation5 + $0x24c] sm:$0xf]  ;;  %v3500_v51 = vor.u32 %v5126_v36, %v3497_v37 }
  0xd8   :  { %1959 = vmatpush.bf16.msrb.mxu0 %v3992_v62  ;;  %v3929_v62 = vld [vmem:[#allocation5 + $0x3b8] sm:$0xf0]  ;;  %v3548_v63 = vor.u32 %v5138_v54, %v3545_v55  ;;  %v5222_v49 = vld [vmem:[#allocation5 + $0x34c] sm:$0xf]  ;;  %v3628_v54 = vor.u32 %v5158_v39, %v3625_v43 }
  0xd9   :  { %v3932_v5 = vor.u32 %v5234_v61, %v3929_v62  ;;  %v3753_v46 = vld [vmem:[#allocation5 + $0x258] sm:$0xf0]  ;;  %v5122_v56 = vld [vmem:[#allocation5 + $0x2c] sm:$0xf] }
  0xda   :  { %1972 = vmatpush.bf16.msrb.mxu1 %v4120_v1  ;;  %1985 = vmatpush.bf16.msrb.mxu2 %v4248_v2  ;;  %v3804_v1 = vor.u32 %v5202_v59, %v3801_v60  ;;  %v5134_v2 = vld [vmem:[#allocation5 + $0x8c] sm:$0xf]  ;;  %v3756_v55 = vor.u32 %v5190_v45, %v3753_v46  ;;  %v3609_v61 = vld [vmem:[#allocation5 + $0x138] sm:$0xf0] }
  0xdb   :  { %1998 = vmatpush.bf16.msrb.mxu3 %v4376_v7  ;;  %v5198_v7 = vld [vmem:[#allocation5 + $0x28c] sm:$0xf]  ;;  %v3532_v11 = vor.u32 %v5134_v2, %v3529_v3  ;;  %v3465_v4 = vld [vmem:[#allocation5 + $0x18] sm:$0xf0] }
  0xdc   :  { %1960 = vmatpush.bf16.msrb.mxu0 %v3976_v16  ;;  %v3788_v14 = vor.u32 %v5198_v7, %v3785_v8  ;;  %v3513_v16 = vld [vmem:[#allocation5 + $0x78] sm:$0xf0]  ;;  %v5154_v58 = vld [vmem:[#allocation5 + $0x12c] sm:$0xf] }
  0xdd   :  { %v5186_v62 = vld [vmem:[#allocation5 + $0x22c] sm:$0xf]  ;;  %v3593_v8 = vld [vmem:[#allocation5 + $0x118] sm:$0xf0] }
  0xde   :  { %1973 = vmatpush.bf16.msrb.mxu1 %v4104_v27  ;;  %1986 = vmatpush.bf16.msrb.mxu2 %v4232_v28  ;;  %v1754_v12 = vpop.f32.mrf.mxu0  ;;  %v3641_v27 = vld [vmem:[#allocation5 + $0x178] sm:$0xf0]  ;;  %v5194_v28 = vld [vmem:[#allocation5 + $0x26c] sm:$0xf] }
  0xdf   :  { %1999 = vmatpush.bf16.msrb.mxu3 %v4360_v32  ;;  %1961 = vmatmul.bf16.vlgmr.msrb.gmra.mxu0 %v5811_v41  ;;  %v1755_v21 = vadd.f32 %v1754_v12, %v5836_v24  ;;  %v3900_v24 = vor.u32 %v5226_v30, %v3897_v31  ;;  %v5118_v3 = vld [vmem:[#allocation5 + $0xc] sm:$0xf]  ;;  %v3721_v12 = vld [vmem:[#allocation5 + $0x218] sm:$0xf0] }
  0xe0   :  { %2005 = vmatpush.bf16.msra.mxu0 %v3580_v33  ;;  %v1767_v23 = vpop.f32.mrf.mxu1  ;;  %v3516_v33 = vor.u32 %v5130_v15, %v3513_v16  ;;  %v5150_v7 = vld [vmem:[#allocation5 + $0x10c] sm:$0xf]  ;;  %v4073_v39 = vld [vmem:[#allocation5 + $0x4d8] sm:$0xf0] }
  0xe1   :  { %1987 = vmatmul.bf16.vlgmr.msrb.gmra.mxu2 %v5809_v38  ;;  %1974 = vmatmul.bf16.vlgmr.msrb.gmra.mxu1 %v5815_v44  ;;  %v1768_v32 = vadd.f32 %v1767_v23, %v1755_v21  ;;  %v5182_v9 = vld [vmem:[#allocation5 + $0x20c] sm:$0xf]  ;;  %v3468_v23 = vor.u32 %v5118_v3, %v3465_v4  ;;  %v4201_v43 = vld [vmem:[#allocation5 + $0x5d8] sm:$0xf0] }
  0xe2   :  { %2018 = vmatpush.bf16.msra.mxu1 %v3708_v34  ;;  %2031 = vmatpush.bf16.msra.mxu2 %v3836_v35  ;;  %v3644_v34 = vor.u32 %v5162_v17, %v3641_v27  ;;  %v3772_v35 = vor.u32 %v5194_v28, %v3769_v29  ;;  %v5274_v16 = vld [vmem:[#allocation5 + $0x4ec] sm:$0xf]  ;;  %v4089_v17 = vld [vmem:[#allocation5 + $0x4f8] sm:$0xf0]  ;;  %v3596_v29 = vor.u32 %v5150_v7, %v3593_v8 }
  0xe3   :  { %2044 = vmatpush.bf16.msra.mxu3 %v3964_v40  ;;  %v5306_v21 = vld [vmem:[#allocation5 + $0x5ec] sm:$0xf]  ;;  %v4345_v28 = vld [vmem:[#allocation5 + $0x6f8] sm:$0xf0]  ;;  %v3724_v30 = vor.u32 %v5182_v9, %v3721_v12 }
  0xe4   :  { %2000 = vmatmul.bf16.vlgmr.msrb.gmra.mxu3 %v5813_v42  ;;  %2006 = vmatpush.bf16.msra.mxu0 %v3564_v50  ;;  %v1780_v40 = vpop.f32.mrf.mxu2  ;;  %v3881_v50 = vld [vmem:[#allocation5 + $0x358] sm:$0xf0]  ;;  %v5338_v27 = vld [vmem:[#allocation5 + $0x6ec] sm:$0xf] }
  0xe5   :  { %v1781_v47 = vadd.f32 %v1780_v40, %v1768_v32  ;;  %v3884_v60 = vor.u32 %v5222_v49, %v3881_v50  ;;  %v5370_v31 = vld [vmem:[#allocation5 + $0x7ec] sm:$0xf]  ;;  %v4473_v32 = vld [vmem:[#allocation5 + $0x7f8] sm:$0xf0]  ;;  %v4348_v36 = vor.u32 %v5338_v27, %v4345_v28 }
  0xe6   :  { %2019 = vmatpush.bf16.msra.mxu1 %v3692_v52  ;;  %2032 = vmatpush.bf16.msra.mxu2 %v3820_v53  ;;  %v1756_v53 = vpop.f32.mrf.mxu0  ;;  %v5270_v37 = vld [vmem:[#allocation5 + $0x4cc] sm:$0xf]  ;;  %v4329_v46 = vld [vmem:[#allocation5 + $0x6d8] sm:$0xf0] }
  0xe7   :  { %2045 = vmatpush.bf16.msra.mxu3 %v3948_v57  ;;  %v1793_v48 = vpop.f32.mrf.mxu3  ;;  %v3481_v57 = vld [vmem:[#allocation5 + $0x38] sm:$0xf0]  ;;  %v5302_v40 = vld [vmem:[#allocation5 + $0x5cc] sm:$0xf]  ;;  %v4076_v49 = vor.u32 %v5270_v37, %v4073_v39 }
  0xe8   :  { %2007 = vmatpush.bf16.msra.mxu0 %v3548_v63  ;;  %v5843_v52 = vadd.f32 %v1793_v48, %v1781_v47  ;;  %v1769_v59 = vpop.f32.mrf.mxu1  ;;  %v3737_v63 = vld [vmem:[#allocation5 + $0x238] sm:$0xf0]  ;;  %v3484_v2 = vor.u32 %v5122_v56, %v3481_v57  ;;  %v5334_v45 = vld [vmem:[#allocation5 + $0x6cc] sm:$0xf]  ;;  %v4204_v50 = vor.u32 %v5302_v40, %v4201_v43 }
  0xe9   :  { %v3740_v6 = vor.u32 %v5186_v62, %v3737_v63  ;;  %v5366_v47 = vld [vmem:[#allocation5 + $0x7cc] sm:$0xf]  ;;  %v4457_v48 = vld [vmem:[#allocation5 + $0x7d8] sm:$0xf0] }
  0xea   :  { %2020 = vmatpush.bf16.msra.mxu1 %v3676_v0  ;;  %2033 = vmatpush.bf16.msra.mxu2 %v3804_v1  ;;  %v5218_v0 = vld [vmem:[#allocation5 + $0x32c] sm:$0xf]  ;;  %v3865_v1 = vld [vmem:[#allocation5 + $0x338] sm:$0xf0]  ;;  %v4460_v56 = vor.u32 %v5366_v47, %v4457_v48 }
  0xeb   :  { %2046 = vmatpush.bf16.msra.mxu3 %v3932_v5  ;;  %v3612_v5 = vor.u32 %v5154_v58, %v3609_v61  ;;  %v5266_v53 = vld [vmem:[#allocation5 + $0x4ac] sm:$0xf]  ;;  %v4185_v57 = vld [vmem:[#allocation5 + $0x5b8] sm:$0xf0] }
  0xec   :  { %2008 = vmatpush.bf16.msra.mxu0 %v3532_v11  ;;  %v1782_v10 = vpop.f32.mrf.mxu2  ;;  %v3868_v11 = vor.u32 %v5218_v0, %v3865_v1  ;;  %v5330_v58 = vld [vmem:[#allocation5 + $0x6ac] sm:$0xf]  ;;  %v4313_v59 = vld [vmem:[#allocation5 + $0x6b8] sm:$0xf0] }
  0xed   :  { %v4441_v61 = vld [vmem:[#allocation5 + $0x7b8] sm:$0xf0]  ;;  %v4316_v0 = vor.u32 %v5330_v58, %v4313_v59  ;;  %v5262_v1 = vld [vmem:[#allocation5 + $0x48c] sm:$0xf]  ;;  %v378_v58 = vperm.slane %v5833_v26, 1 }
  0xee   :  { %2021 = vmatpush.bf16.msra.mxu1 %v3660_v13  ;;  %2034 = vmatpush.bf16.msra.mxu2 %v3788_v14  ;;  %v5214_v13 = vld [vmem:[#allocation5 + $0x30c] sm:$0xf]  ;;  %v3849_v14 = vld [vmem:[#allocation5 + $0x318] sm:$0xf0]  ;;  %v5403_v26 = vld [vmem:[#allocation8 + $0xec] sm:$0xf0] }
  0xef   :  { %2047 = vmatpush.bf16.msra.mxu3 %v3916_v25  ;;  %v1795_v15 = vpop.f32.mrf.mxu3  ;;  %v4217_v25 = vld [vmem:[#allocation5 + $0x5f8] sm:$0xf0]  ;;  %v5358_v7 = vld [vmem:[#allocation5 + $0x78c] sm:$0xf] }
  0xf0   :  { %2009 = vmatpush.bf16.msra.mxu0 %v3516_v33  ;;  %v3852_v33 = vor.u32 %v5214_v13, %v3849_v14  ;;  %v4169_v4 = vld [vmem:[#allocation5 + $0x598] sm:$0xf0]  ;;  %v5258_v10 = vld [vmem:[#allocation5 + $0x46c] sm:$0xf] }
  0xf1   :  { %v5290_v12 = vld [vmem:[#allocation5 + $0x56c] sm:$0xf]  ;;  %v4153_v15 = vld [vmem:[#allocation5 + $0x578] sm:$0xf0] }
  0xf2   :  { %2022 = vmatpush.bf16.msra.mxu1 %v3644_v34  ;;  %2035 = vmatpush.bf16.msra.mxu2 %v3772_v35  ;;  %v4092_v34 = vor.u32 %v5274_v16, %v4089_v17  ;;  %v4220_v35 = vor.u32 %v5306_v21, %v4217_v25  ;;  %v5322_v16 = vld [vmem:[#allocation5 + $0x66c] sm:$0xf]  ;;  %v4281_v17 = vld [vmem:[#allocation5 + $0x678] sm:$0xf0]  ;;  %v4156_v27 = vor.u32 %v5290_v12, %v4153_v15 }
  0xf3   :  { %2048 = vmatpush.bf16.msra.mxu3 %v3900_v24  ;;  %v4476_v24 = vor.u32 %v5370_v31, %v4473_v32  ;;  %v5354_v21 = vld [vmem:[#allocation5 + $0x76c] sm:$0xf]  ;;  %v4284_v28 = vor.u32 %v5322_v16, %v4281_v17  ;;  %v4393_v40 = vld [vmem:[#allocation5 + $0x758] sm:$0xf0]  ;;  %v4847_v16 = vld [vmem:[#allocation8 + $0x2e0] sm:$0xf] }
  0xf4   :  { %2010 = vmatpush.bf16.msra.mxu0 %v3500_v51  ;;  %v4332_v51 = vor.u32 %v5334_v45, %v4329_v46  ;;  %v5286_v31 = vld [vmem:[#allocation5 + $0x54c] sm:$0xf]  ;;  %v3993_v48 = vld [vmem:[#allocation5 + $0x438] sm:$0xf0]  ;;  %v5467_v17 = vld [vmem:[#allocation8 + $0x2ec] sm:$0xf0] }
  0xf5   :  { %v5350_v39 = vld [vmem:[#allocation5 + $0x74c] sm:$0xf] }
  0xf6   :  { %2023 = vmatpush.bf16.msra.mxu1 %v3628_v54  ;;  %2036 = vmatpush.bf16.msra.mxu2 %v3756_v55  ;;  %v4057_v54 = vld [vmem:[#allocation5 + $0x4b8] sm:$0xf0]  ;;  %v5298_v55 = vld [vmem:[#allocation5 + $0x5ac] sm:$0xf] }
  0xf7   :  { %2049 = vmatpush.bf16.msra.mxu3 %v3884_v60  ;;  %v5362_v60 = vld [vmem:[#allocation5 + $0x7ac] sm:$0xf]  ;;  %v4060_v62 = vor.u32 %v5266_v53, %v4057_v54  ;;  %v4188_v63 = vor.u32 %v5298_v55, %v4185_v57  ;;  %v4121_v53 = vld [vmem:[#allocation5 + $0x538] sm:$0xf0] }
  0xf8   :  { %2011 = vmatpush.bf16.msra.mxu0 %v3484_v2  ;;  %v4041_v2 = vld [vmem:[#allocation5 + $0x498] sm:$0xf0]  ;;  %v4444_v3 = vor.u32 %v5362_v60, %v4441_v61  ;;  %v5250_v47 = vld [vmem:[#allocation5 + $0x42c] sm:$0xf] }
  0xf9   :  { %v5314_v54 = vld [vmem:[#allocation5 + $0x62c] sm:$0xf]  ;;  %v4249_v55 = vld [vmem:[#allocation5 + $0x638] sm:$0xf0]  ;;  %v3996_v59 = vor.u32 %v5250_v47, %v3993_v48  ;;  %v4543_v47 = vld [vmem:[#allocation8 + $0x80] sm:$0xf] }
  0xfa   :  { %2024 = vmatpush.bf16.msra.mxu1 %v3612_v5  ;;  %2037 = vmatpush.bf16.msra.mxu2 %v3740_v6  ;;  %v5326_v5 = vld [vmem:[#allocation5 + $0x68c] sm:$0xf]  ;;  %v4297_v6 = vld [vmem:[#allocation5 + $0x698] sm:$0xf0]  ;;  %v5391_v48 = vld [vmem:[#allocation8 + $0x8c] sm:$0xf0] }
  0xfb   :  { %2050 = vmatpush.bf16.msra.mxu3 %v3868_v11  ;;  %v4300_v9 = vor.u32 %v5326_v5, %v4297_v6  ;;  %v4025_v11 = vld [vmem:[#allocation5 + $0x478] sm:$0xf0]  ;;  %v5246_v60 = vld [vmem:[#allocation5 + $0x40c] sm:$0xf] }
  0xfc   :  { %2012 = vmatpush.bf16.msra.mxu0 %v3468_v23  ;;  %v5849_v8 = vpop.f32.mrf.mxu0  ;;  %v4409_v23 = vld [vmem:[#allocation5 + $0x778] sm:$0xf0]  ;;  %v4028_v25 = vor.u32 %v5258_v10, %v4025_v11  ;;  %v5342_v5 = vld [vmem:[#allocation5 + $0x70c] sm:$0xf]  ;;  %v5435_v10 = vld [vmem:[#allocation8 + $0x1ec] sm:$0xf0] }
  0xfd   :  { %v4377_v57 = vld [vmem:[#allocation5 + $0x738] sm:$0xf0] }
  0xfe   :  { %2025 = vmatpush.bf16.msra.mxu1 %v3596_v29  ;;  %2038 = vmatpush.bf16.msra.mxu2 %v3724_v30  ;;  %v5851_v13 = vpop.f32.mrf.mxu1  ;;  %v5254_v29 = vld [vmem:[#allocation5 + $0x44c] sm:$0xf]  ;;  %v4009_v30 = vld [vmem:[#allocation5 + $0x458] sm:$0xf0] }
  0xff   :  { %2051 = vmatpush.bf16.msra.mxu3 %v3852_v33  ;;  %2013 = vmatmul.bf16.vlgmr.msra.gmra.mxu0 %v5799_v19  ;;  %v4425_v19 = vld [vmem:[#allocation5 + $0x798] sm:$0xf0]  ;;  %v4412_v33 = vor.u32 %v5354_v21, %v4409_v23 }
 0x100   :  { %2057 = vmatpush.bf16.msrb.mxu0 %v4092_v34  ;;  %v4428_v14 = vor.u32 %v5358_v7, %v4425_v19  ;;  %v4137_v34 = vld [vmem:[#allocation5 + $0x558] sm:$0xf0]  ;;  %v4591_v19 = vld [vmem:[#allocation8 + $0xe0] sm:$0xf] }
 0x101   :  { %2039 = vmatmul.bf16.vlgmr.msra.gmra.mxu2 %v5797_v18  ;;  %2026 = vmatmul.bf16.vlgmr.msra.gmra.mxu1 %v5803_v22  ;;  %v5294_v18 = vld [vmem:[#allocation5 + $0x58c] sm:$0xf]  ;;  %v4140_v45 = vor.u32 %v5286_v31, %v4137_v34  ;;  %v4361_v7 = vld [vmem:[#allocation5 + $0x718] sm:$0xf0]  ;;  %v4592_v15 = vor.u32 %v5403_v26, %v4591_v19  ;;  %v4831_v31 = vld [vmem:[#allocation8 + $0x2c0] sm:$0xf] }
 0x102   :  { %2070 = vmatpush.bf16.msrb.mxu1 %v4220_v35  ;;  %2083 = vmatpush.bf16.msrb.mxu2 %v4348_v36  ;;  %v4172_v22 = vor.u32 %v5294_v18, %v4169_v4  ;;  %v5318_v35 = vld [vmem:[#allocation5 + $0x64c] sm:$0xf]  ;;  %v4265_v36 = vld [vmem:[#allocation5 + $0x658] sm:$0xf0] }
 0x103   :  { %2096 = vmatpush.bf16.msrb.mxu3 %v4476_v24  ;;  %v4012_v24 = vor.u32 %v5254_v29, %v4009_v30  ;;  %v4268_v46 = vor.u32 %v5318_v35, %v4265_v36  ;;  %v4233_v4 = vld [vmem:[#allocation5 + $0x618] sm:$0xf0]  ;;  %v4848_v29 = vor.u32 %v5467_v17, %v4847_v16  ;;  %v5395_v36 = vld [vmem:[#allocation8 + $0xac] sm:$0xf0] }
 0x104   :  { %2052 = vmatmul.bf16.vlgmr.msra.gmra.mxu3 %v5801_v20  ;;  %2058 = vmatpush.bf16.msrb.mxu0 %v4076_v49  ;;  %v4044_v20 = vor.u32 %v5262_v1, %v4041_v2  ;;  %v5853_v32 = vpop.f32.mrf.mxu2  ;;  %v1808_v43 = vpop.f32.mrf.mxu0  ;;  %v5282_v49 = vld [vmem:[#allocation5 + $0x52c] sm:$0xf]  ;;  %v4105_v1 = vld [vmem:[#allocation5 + $0x518] sm:$0xf0]  ;;  %v5411_v16 = vld [vmem:[#allocation8 + $0x12c] sm:$0xf0] }
 0x105   :  { %v4124_v61 = vor.u32 %v5282_v49, %v4121_v53  ;;  %v4671_v49 = vld [vmem:[#allocation8 + $0x180] sm:$0xf]  ;;  %v5455_v53 = vld [vmem:[#allocation8 + $0x28c] sm:$0xf0] }
 0x106   :  { %2071 = vmatpush.bf16.msrb.mxu1 %v4204_v50  ;;  %2084 = vmatpush.bf16.msrb.mxu2 %v4332_v51  ;;  %v1821_v50 = vpop.f32.mrf.mxu1  ;;  %v4396_v51 = vor.u32 %v5350_v39, %v4393_v40  ;;  %v4687_v39 = vld [vmem:[#allocation8 + $0x1a0] sm:$0xf]  ;;  %v5427_v40 = vld [vmem:[#allocation8 + $0x1ac] sm:$0xf0] }
 0x107   :  { %2097 = vmatpush.bf16.msrb.mxu3 %v4460_v56  ;;  %v5855_v37 = vpop.f32.mrf.mxu3  ;;  %v5346_v56 = vld [vmem:[#allocation5 + $0x72c] sm:$0xf]  ;;  %v4544_v50 = vor.u32 %v5391_v48, %v4543_v47  ;;  %v5465_v48 = vld [vmem:[#allocation8 + $0x2e4] sm:$0xf] }
 0x108   :  { %2059 = vmatpush.bf16.msrb.mxu0 %v4060_v62  ;;  %v4252_v62 = vor.u32 %v5314_v54, %v4249_v55  ;;  %v4380_v18 = vor.u32 %v5346_v56, %v4377_v57  ;;  %v4527_v55 = vld [vmem:[#allocation8 + $0x60] sm:$0xf]  ;;  %v5387_v56 = vld [vmem:[#allocation8 + $0x6c] sm:$0xf0] }
 0x10a   :  { %2072 = vmatpush.bf16.msrb.mxu1 %v4188_v63  ;;  %2085 = vmatpush.bf16.msrb.mxu2 %v4316_v0  ;;  %v3977_v63 = vld [vmem:[#allocation5 + $0x418] sm:$0xf0]  ;;  %v5278_v0 = vld [vmem:[#allocation5 + $0x50c] sm:$0xf] }
 0x10b   :  { %2098 = vmatpush.bf16.msrb.mxu3 %v4444_v3  ;;  %v5310_v3 = vld [vmem:[#allocation5 + $0x60c] sm:$0xf]  ;;  %v4108_v11 = vor.u32 %v5278_v0, %v4105_v1  ;;  %v5451_v0 = vld [vmem:[#allocation8 + $0x26c] sm:$0xf0] }
 0x10c   :  { %2060 = vmatpush.bf16.msrb.mxu0 %v4044_v20  ;;  %v1834_v2 = vpop.f32.mrf.mxu2  ;;  %v1807_v20 = vadd.f32 %v5849_v8, %v378_v58  ;;  %v4236_v12 = vor.u32 %v5310_v3, %v4233_v4  ;;  %v4703_v8 = vld [vmem:[#allocation8 + $0x1c0] sm:$0xf] }
 0x10d   :  { %v4511_v2 = vld [vmem:[#allocation8 + $0x40] sm:$0xf] }
 0x10e   :  { %2073 = vmatpush.bf16.msrb.mxu1 %v4172_v22  ;;  %2086 = vmatpush.bf16.msrb.mxu2 %v4300_v9  ;;  %v3980_v22 = vor.u32 %v5246_v60, %v3977_v63  ;;  %v4719_v9 = vld [vmem:[#allocation8 + $0x1e0] sm:$0xf]  ;;  %v1820_v23 = vadd.f32 %v5851_v13, %v1807_v20 }
 0x10f   :  { %2099 = vmatpush.bf16.msrb.mxu3 %v4428_v14  ;;  %v1847_v6 = vpop.f32.mrf.mxu3  ;;  %v4364_v14 = vor.u32 %v5342_v5, %v4361_v7  ;;  %v4720_v21 = vor.u32 %v5435_v10, %v4719_v9  ;;  %v4559_v13 = vld [vmem:[#allocation8 + $0xa0] sm:$0xf]  ;;  %v5415_v5 = vld [vmem:[#allocation8 + $0x14c] sm:$0xf0] }
 0x110   :  { %2061 = vmatpush.bf16.msrb.mxu0 %v4028_v25  ;;  %v4575_v25 = vld [vmem:[#allocation8 + $0xc0] sm:$0xf]  ;;  %v1833_v35 = vadd.f32 %v5853_v32, %v1820_v23  ;;  %v4560_v43 = vor.u32 %v5395_v36, %v4559_v13  ;;  %v4688_v32 = vor.u32 %v5427_v40, %v4687_v39  ;;  %v5447_v9 = vld [vmem:[#allocation8 + $0x24c] sm:$0xf0]  ;;  %v5433_v36 = vld [vmem:[#allocation8 + $0x1e4] sm:$0xf] }
 0x111   :  { %v4783_v63 = vld [vmem:[#allocation8 + $0x260] sm:$0xf]  ;;  %v4721_v39 = vld [vmem:[#allocation8 + $0x1f0] sm:$0xf0] }
 0x112   :  { %2074 = vmatpush.bf16.msrb.mxu1 %v4156_v27  ;;  %2087 = vmatpush.bf16.msrb.mxu2 %v4284_v28  ;;  %v5399_v27 = vld [vmem:[#allocation8 + $0xcc] sm:$0xf0]  ;;  %v4639_v4 = vld [vmem:[#allocation8 + $0x140] sm:$0xf]  ;;  %v4784_v7 = vor.u32 %v5451_v0, %v4783_v63 }
 0x113   :  { %2100 = vmatpush.bf16.msrb.mxu3 %v4412_v33  ;;  %v5431_v28 = vld [vmem:[#allocation8 + $0x1cc] sm:$0xf0]  ;;  %v4576_v30 = vor.u32 %v5399_v27, %v4575_v25  ;;  %v4640_v10 = vor.u32 %v5415_v5, %v4639_v4  ;;  %v4751_v25 = vld [vmem:[#allocation8 + $0x220] sm:$0xf]  ;;  %v4545_v4 = vld [vmem:[#allocation8 + $0x90] sm:$0xf0] }
 0x114   :  { %2062 = vmatpush.bf16.msrb.mxu0 %v4012_v24  ;;  %v5463_v33 = vld [vmem:[#allocation8 + $0x2cc] sm:$0xf0]  ;;  %v4704_v34 = vor.u32 %v5431_v28, %v4703_v8  ;;  %v4479_v28 = vld [vmem:[#allocation8] sm:$0xf]  ;;  %v5421_v5 = vld [vmem:[#allocation8 + $0x184] sm:$0xf] }
 0x115   :  { %v4832_v24 = vor.u32 %v5463_v33, %v4831_v31  ;;  %v5443_v27 = vld [vmem:[#allocation8 + $0x22c] sm:$0xf0] }
 0x116   :  { %2075 = vmatpush.bf16.msrb.mxu1 %v4140_v45  ;;  %2088 = vmatpush.bf16.msrb.mxu2 %v4268_v46  ;;  %v4815_v45 = vld [vmem:[#allocation8 + $0x2a0] sm:$0xf]  ;;  %v5459_v46 = vld [vmem:[#allocation8 + $0x2ac] sm:$0xf0]  ;;  %v4752_v40 = vor.u32 %v5443_v27, %v4751_v25  ;;  %v5381_v27 = vld [vmem:[#allocation8 + $0x44] sm:$0xf] }
 0x117   :  { %2101 = vmatpush.bf16.msrb.mxu3 %v4396_v51  ;;  %v5407_v33 = vld [vmem:[#allocation8 + $0x10c] sm:$0xf0] }
 0x118   :  { %2063 = vmatpush.bf16.msrb.mxu0 %v3996_v59  ;;  %v4655_v59 = vld [vmem:[#allocation8 + $0x160] sm:$0xf] }
 0x11a   :  { %2076 = vmatpush.bf16.msrb.mxu1 %v4124_v61  ;;  %2089 = vmatpush.bf16.msrb.mxu2 %v4252_v62  ;;  %v4528_v61 = vor.u32 %v5387_v56, %v4527_v55 }
 0x11b   :  { %2102 = vmatpush.bf16.msrb.mxu3 %v4380_v18  ;;  %v5383_v18 = vld [vmem:[#allocation8 + $0x4c] sm:$0xf0] }
 0x11c   :  { %2064 = vmatpush.bf16.msrb.mxu0 %v3980_v22  ;;  %v1858_v51 = vpop.f32.mrf.mxu0  ;;  %v4512_v19 = vor.u32 %v5383_v18, %v4511_v2  ;;  %v4767_v22 = vld [vmem:[#allocation8 + $0x240] sm:$0xf]  ;;  %v4817_v2 = vld [vmem:[#allocation8 + $0x2b0] sm:$0xf0] }
 0x11d   :  { %v4768_v17 = vor.u32 %v5447_v9, %v4767_v22  ;;  %v5385_v9 = vld [vmem:[#allocation8 + $0x64] sm:$0xf] }
 0x11e   :  { %2077 = vmatpush.bf16.msrb.mxu1 %v4108_v11  ;;  %2090 = vmatpush.bf16.msrb.mxu2 %v4236_v12  ;;  %v1871_v58 = vpop.f32.mrf.mxu1  ;;  %v4495_v11 = vld [vmem:[#allocation8 + $0x20] sm:$0xf]  ;;  %v5379_v12 = vld [vmem:[#allocation8 + $0x2c] sm:$0xf0] }
 0x11f   :  { %2103 = vmatpush.bf16.msrb.mxu3 %v4364_v14  ;;  %2065 = vmatmul.bf16.vlgmr.msrb.gmra.mxu0 %v5811_v41  ;;  %v1846_v41 = vadd.f32 %v5855_v37, %v1833_v35  ;;  %v5419_v37 = vld [vmem:[#allocation8 + $0x16c] sm:$0xf0]  ;;  %v4496_v23 = vor.u32 %v5379_v12, %v4495_v11  ;;  %v4593_v35 = vld [vmem:[#allocation8 + $0xf0] sm:$0xf0]  ;;  %v5417_v12 = vld [vmem:[#allocation8 + $0x164] sm:$0xf] }
 0x120   :  { %2895 = vmatpush.bf16.msra.mxu0 %v4592_v15  ;;  %v4656_v1 = vor.u32 %v5419_v37, %v4655_v59  ;;  %v4623_v15 = vld [vmem:[#allocation8 + $0x120] sm:$0xf]  ;;  %v5393_v37 = vld [vmem:[#allocation8 + $0xa4] sm:$0xf] }
 0x121   :  { %2078 = vmatmul.bf16.vlgmr.msrb.gmra.mxu1 %v5815_v44  ;;  %2091 = vmatmul.bf16.vlgmr.msrb.gmra.mxu2 %v5809_v38  ;;  %v5423_v44 = vld [vmem:[#allocation8 + $0x18c] sm:$0xf0]  ;;  %v4816_v38 = vor.u32 %v5459_v46, %v4815_v45  ;;  %v1859_v57 = vadd.f32 %v1858_v51, %v1846_v41  ;;  %v4624_v8 = vor.u32 %v5411_v16, %v4623_v15  ;;  %v4735_v45 = vld [vmem:[#allocation8 + $0x200] sm:$0xf]  ;;  %v2109_v41 = vmax.f32 %v5843_v52, 0.0 }
 0x122   :  { %2908 = vmatpush.bf16.msra.mxu1 %v4720_v21  ;;  %2104 = vmatmul.bf16.vlgmr.msrb.gmra.mxu3 %v5813_v42  ;;  %v4799_v42 = vld [vmem:[#allocation8 + $0x280] sm:$0xf]  ;;  %v4672_v54 = vor.u32 %v5423_v44, %v4671_v49  ;;  %v5439_v46 = vld [vmem:[#allocation8 + $0x20c] sm:$0xf0]  ;;  %v4849_v49 = vld [vmem:[#allocation8 + $0x2f0] sm:$0xf0]  ;;  %v4724_v44 = vor.u32 %v5433_v36, %v4721_v39 }
 0x123   :  { %2921 = vmatpush.bf16.msra.mxu2 %v4848_v29  ;;  %v4800_v60 = vor.u32 %v5455_v53, %v4799_v42  ;;  %v1872_v62 = vadd.f32 %v1871_v58, %v1859_v57  ;;  %v5375_v29 = vld [vmem:[#allocation8 + $0xc] sm:$0xf0]  ;;  %v5429_v51 = vld [vmem:[#allocation8 + $0x1c4] sm:$0xf]  ;;  %v4705_v42 = vld [vmem:[#allocation8 + $0x1d0] sm:$0xf0]  ;;  %v4736_v53 = vor.u32 %v5439_v46, %v4735_v45  ;;  %v4852_v55 = vor.u32 %v5465_v48, %v4849_v49 }
 0x124   :  { %2896 = vmatpush.bf16.msra.mxu0 %v4576_v30  ;;  %v1884_v3 = vpop.f32.mrf.mxu2  ;;  %v1860_v20 = vpop.f32.mrf.mxu0  ;;  %v4607_v30 = vld [vmem:[#allocation8 + $0x100] sm:$0xf]  ;;  %v5869_v56 = vpack.c.bf16 %v2109_v41, %v2109_v41  ;;  %v5461_v57 = vld [vmem:[#allocation8 + $0x2c4] sm:$0xf]  ;;  %v4833_v58 = vld [vmem:[#allocation8 + $0x2d0] sm:$0xf0]  ;;  %v4708_v59 = vor.u32 %v5429_v51, %v4705_v42 }
 0x125   :  { %v1885_v26 = vadd.f32 %v1884_v3, %v1872_v62  ;;  %v4689_v62 = vld [vmem:[#allocation8 + $0x1b0] sm:$0xf0]  ;;  %v4836_v63 = vor.u32 %v5461_v57, %v4833_v58  ;;  %v5389_v3 = vld [vmem:[#allocation8 + $0x84] sm:$0xf]  ;;  %v5879_v41 = vld [vmem:[#allocation7] sm:$0xf] }
 0x126   :  { %2909 = vmatpush.bf16.msra.mxu1 %v4704_v34  ;;  %v1873_v14 = vpop.f32.mrf.mxu1  ;;  %v5401_v34 = vld [vmem:[#allocation8 + $0xe4] sm:$0xf]  ;;  %v4801_v20 = vld [vmem:[#allocation8 + $0x290] sm:$0xf0]  ;;  %v4599_v57 = vld [vmem:[#allocation8 + $0xe8] sm:$0xf] }
 0x127   :  { %2922 = vmatpush.bf16.msra.mxu2 %v4832_v24  ;;  %v1897_v6 = vpop.f32.mrf.mxu3  ;;  %v4596_v47 = vor.u32 %v5401_v34, %v4593_v35  ;;  %v4657_v14 = vld [vmem:[#allocation8 + $0x170] sm:$0xf0]  ;;  %v5445_v35 = vld [vmem:[#allocation8 + $0x244] sm:$0xf]  ;;  %v5404_v58 = vld [vmem:[#allocation8 + $0xf4] sm:$0xf0] }
 0x128   :  { %2897 = vmatpush.bf16.msra.mxu0 %v4560_v43  ;;  %v1898_v21 = vadd.f32 %v1897_v6, %v1885_v26  ;;  %v4480_v43 = vor.u32 %v5375_v29, %v4479_v28  ;;  %v4673_v6 = vld [vmem:[#allocation8 + $0x190] sm:$0xf0]  ;;  %v5453_v26 = vld [vmem:[#allocation8 + $0x284] sm:$0xf]  ;;  %v4660_v25 = vor.u32 %v5417_v12, %v4657_v14  ;;  %v4943_v14 = vld [vmem:[#allocation8 + $0x3a0] sm:$0xf] }
 0x129   :  { %v4676_v22 = vor.u32 %v5421_v5, %v4673_v6  ;;  %v4804_v16 = vor.u32 %v5453_v26, %v4801_v20  ;;  %v5413_v28 = vld [vmem:[#allocation8 + $0x144] sm:$0xf]  ;;  %v4641_v29 = vld [vmem:[#allocation8 + $0x150] sm:$0xf0]  ;;  %v4959_v5 = vld [vmem:[#allocation8 + $0x3c0] sm:$0xf] }
 0x12a   :  { %2910 = vmatpush.bf16.msra.mxu1 %v4688_v32  ;;  %v2110_v24 = vmax.f32 %v1898_v21, 0.0  ;;  %v4608_v32 = vor.u32 %v5407_v33, %v4607_v30  ;;  %v5449_v21 = vld [vmem:[#allocation8 + $0x264] sm:$0xf]  ;;  %v4644_v36 = vor.u32 %v5413_v28, %v4641_v29  ;;  %v4625_v45 = vld [vmem:[#allocation8 + $0x130] sm:$0xf0] }
 0x12b   :  { %2923 = vmatpush.bf16.msra.mxu2 %v4816_v38  ;;  %v5397_v38 = vld [vmem:[#allocation8 + $0xc4] sm:$0xf]  ;;  %v5495_v6 = vld [vmem:[#allocation8 + $0x3cc] sm:$0xf0]  ;;  %v5400_v26 = vld [vmem:[#allocation8 + $0xd4] sm:$0xf0] }
 0x12c   :  { %2898 = vmatpush.bf16.msra.mxu0 %v4544_v50  ;;  %v1886_v31 = vpop.f32.mrf.mxu2  ;;  %v4577_v50 = vld [vmem:[#allocation8 + $0xd0] sm:$0xf0]  ;;  %v5377_v39 = vld [vmem:[#allocation8 + $0x24] sm:$0xf]  ;;  %v4960_v20 = vor.u32 %v5495_v6, %v4959_v5  ;;  %v4927_v29 = vld [vmem:[#allocation8 + $0x380] sm:$0xf] }
 0x12d   :  { %v4580_v52 = vor.u32 %v5397_v38, %v4577_v50  ;;  %v5441_v38 = vld [vmem:[#allocation8 + $0x224] sm:$0xf]  ;;  %v4753_v50 = vld [vmem:[#allocation8 + $0x230] sm:$0xf0]  ;;  %v4631_v5 = vld [vmem:[#allocation8 + $0x128] sm:$0xf] }
 0x12e   :  { %2911 = vmatpush.bf16.msra.mxu1 %v4672_v54  ;;  %v5867_v54 = vpack.c.bf16 %v2110_v24, %v2110_v24  ;;  %v5405_v42 = vld [vmem:[#allocation8 + $0x104] sm:$0xf] }
 0x12f   :  { %2924 = vmatpush.bf16.msra.mxu2 %v4800_v60  ;;  %v1899_v13 = vpop.f32.mrf.mxu3  ;;  %v4561_v60 = vld [vmem:[#allocation8 + $0xb0] sm:$0xf0] }
 0x130   :  { %2899 = vmatpush.bf16.msra.mxu0 %v4528_v61  ;;  %v5425_v61 = vld [vmem:[#allocation8 + $0x1a4] sm:$0xf]  ;;  %v4564_v0 = vor.u32 %v5393_v37, %v4561_v60  ;;  %v4769_v13 = vld [vmem:[#allocation8 + $0x250] sm:$0xf0]  ;;  %v4727_v60 = vld [vmem:[#allocation8 + $0x1e8] sm:$0xf] }
 0x131   :  { %v4692_v18 = vor.u32 %v5425_v61, %v4689_v62  ;;  %v4772_v48 = vor.u32 %v5445_v35, %v4769_v13  ;;  %v5436_v61 = vld [vmem:[#allocation8 + $0x1f4] sm:$0xf0]  ;;  %v4551_v35 = vld [vmem:[#allocation8 + $0x88] sm:$0xf] }
 0x132   :  { %2912 = vmatpush.bf16.msra.mxu1 %v4656_v1  ;;  %v5457_v1 = vld [vmem:[#allocation8 + $0x2a4] sm:$0xf]  ;;  %v5392_v13 = vld [vmem:[#allocation8 + $0x94] sm:$0xf0] }
 0x133   :  { %2925 = vmatpush.bf16.msra.mxu2 %v4784_v7  ;;  %v4820_v7 = vor.u32 %v5457_v1, %v4817_v2  ;;  %v5437_v2 = vld [vmem:[#allocation8 + $0x204] sm:$0xf] }
 0x134   :  { %2900 = vmatpush.bf16.msra.mxu0 %v4512_v19  ;;  %v4548_v19 = vor.u32 %v5389_v3, %v4545_v4  ;;  %v4600_v4 = vor.u32 %v5404_v58, %v4599_v57  ;;  %v4519_v57 = vld [vmem:[#allocation8 + $0x48] sm:$0xf]  ;;  %v5384_v58 = vld [vmem:[#allocation8 + $0x54] sm:$0xf0] }
 0x136   :  { %2913 = vmatpush.bf16.msra.mxu1 %v4640_v10  ;;  %v4529_v10 = vld [vmem:[#allocation8 + $0x70] sm:$0xf0] }
 0x137   :  { %2926 = vmatpush.bf16.msra.mxu2 %v4768_v17  ;;  %v4532_v17 = vor.u32 %v5385_v9, %v4529_v10  ;;  %v5432_v9 = vld [vmem:[#allocation8 + $0x1d4] sm:$0xf0] }
 0x138   :  { %2901 = vmatpush.bf16.msra.mxu0 %v4496_v23  ;;  %v4785_v23 = vld [vmem:[#allocation8 + $0x270] sm:$0xf0] }
 0x139   :  { %v4788_v33 = vor.u32 %v5449_v21, %v4785_v23  ;;  %v4567_v21 = vld [vmem:[#allocation8 + $0xa8] sm:$0xf]  ;;  %v5396_v23 = vld [vmem:[#allocation8 + $0xb4] sm:$0xf0] }
 0x13a   :  { %2914 = vmatpush.bf16.msra.mxu1 %v4624_v8  ;;  %v4513_v8 = vld [vmem:[#allocation8 + $0x50] sm:$0xf0] }
 0x13b   :  { %2927 = vmatpush.bf16.msra.mxu2 %v4752_v40  ;;  %v4516_v34 = vor.u32 %v5381_v27, %v4513_v8  ;;  %v4497_v40 = vld [vmem:[#allocation8 + $0x30] sm:$0xf0]  ;;  %v4695_v27 = vld [vmem:[#allocation8 + $0x1a8] sm:$0xf]  ;;  %v5428_v8 = vld [vmem:[#allocation8 + $0x1b4] sm:$0xf0] }
 0x13c   :  { %2902 = vmatpush.bf16.msra.mxu0 %v4480_v43  ;;  %v1910_v11 = vpop.f32.mrf.mxu0  ;;  %v5409_v43 = vld [vmem:[#allocation8 + $0x124] sm:$0xf]  ;;  %v4500_v49 = vor.u32 %v5377_v39, %v4497_v40  ;;  %v4679_v39 = vld [vmem:[#allocation8 + $0x188] sm:$0xf]  ;;  %v5424_v40 = vld [vmem:[#allocation8 + $0x194] sm:$0xf0] }
 0x13d   :  { %v4628_v51 = vor.u32 %v5409_v43, %v4625_v45  ;;  %v4552_v43 = vor.u32 %v5392_v13, %v4551_v35  ;;  %v5483_v45 = vld [vmem:[#allocation8 + $0x36c] sm:$0xf0]  ;;  %v4977_v35 = vld [vmem:[#allocation8 + $0x3f0] sm:$0xf0]  ;;  %v4729_v13 = vld [vmem:[#allocation8 + $0x1f8] sm:$0xf0] }
 0x13e   :  { %2915 = vmatpush.bf16.msra.mxu1 %v4608_v32  ;;  %v5873_v15 = vpop.f32.mrf.mxu1  ;;  %v379_v32 = vperm.slane %v5879_v41, 2 }
 0x13f   :  { %2903 = vmatmul.bf16.vlgmr.msra.gmra.mxu0 %v5869_v56  ;;  %2928 = vmatpush.bf16.msra.mxu2 %v4736_v53  ;;  %v4975_v53 = vld [vmem:[#allocation8 + $0x3e0] sm:$0xf] }
 0x140   :  { %2947 = vmatpush.bf16.msrb.mxu0 %v4596_v47  ;;  %v5373_v47 = vld [vmem:[#allocation8 + $0x4] sm:$0xf] }
 0x141   :  { %2916 = vmatmul.bf16.vlgmr.msra.gmra.mxu1 %v5867_v54 }
 0x142   :  { %2960 = vmatpush.bf16.msrb.mxu1 %v4724_v44  ;;  %v4481_v44 = vld [vmem:[#allocation8 + $0x10] sm:$0xf0] }
 0x143   :  { %2973 = vmatpush.bf16.msrb.mxu2 %v4852_v55  ;;  %v5499_v55 = vld [vmem:[#allocation8 + $0x3ec] sm:$0xf0]  ;;  %v4484_v1 = vor.u32 %v5373_v47, %v4481_v44  ;;  %v5388_v47 = vld [vmem:[#allocation8 + $0x74] sm:$0xf0]  ;;  %v4663_v44 = vld [vmem:[#allocation8 + $0x168] sm:$0xf] }
 0x144   :  { %2948 = vmatpush.bf16.msrb.mxu0 %v4580_v52  ;;  %v5875_v30 = vpop.f32.mrf.mxu2  ;;  %v1912_v24 = vpop.f32.mrf.mxu0  ;;  %v4609_v52 = vld [vmem:[#allocation8 + $0x110] sm:$0xf0]  ;;  %v4976_v37 = vor.u32 %v5499_v55, %v4975_v53  ;;  %v4895_v53 = vld [vmem:[#allocation8 + $0x340] sm:$0xf] }
 0x145   :  { %v4612_v3 = vor.u32 %v5405_v42, %v4609_v52 }
 0x146   :  { %2961 = vmatpush.bf16.msrb.mxu1 %v4708_v59  ;;  %v1925_v46 = vpop.f32.mrf.mxu1  ;;  %2934 = vmatpush.bf16.msra.mxu3 %v4976_v37  ;;  %v4647_v37 = vld [vmem:[#allocation8 + $0x148] sm:$0xf] }
 0x147   :  { %2974 = vmatpush.bf16.msrb.mxu2 %v4836_v63  ;;  %v5877_v31 = vpop.f32.mrf.mxu3  ;;  %v4756_v63 = vor.u32 %v5441_v38, %v4753_v50  ;;  %v4680_v46 = vor.u32 %v5424_v40, %v4679_v39  ;;  %v5420_v38 = vld [vmem:[#allocation8 + $0x174] sm:$0xf0] }
 0x148   :  { %2949 = vmatpush.bf16.msrb.mxu0 %v4564_v0  ;;  %v1911_v0 = vadd.f32 %v1910_v11, %v379_v32  ;;  %v4535_v32 = vld [vmem:[#allocation8 + $0x68] sm:$0xf]  ;;  %v4664_v52 = vor.u32 %v5420_v38, %v4663_v44  ;;  %v5464_v39 = vld [vmem:[#allocation8 + $0x2d4] sm:$0xf0]  ;;  %v5398_v44 = vld [vmem:[#allocation8 + $0xcc] sm:$0xf] }
 0x149   :  { %v4536_v42 = vor.u32 %v5388_v47, %v4535_v32  ;;  %v5493_v32 = vld [vmem:[#allocation8 + $0x3c4] sm:$0xf]  ;;  %v4961_v47 = vld [vmem:[#allocation8 + $0x3d0] sm:$0xf0]  ;;  %v4585_v38 = vld [vmem:[#allocation8 + $0xd8] sm:$0xf0] }
 0x14a   :  { %2962 = vmatpush.bf16.msrb.mxu1 %v4692_v18  ;;  %v4737_v18 = vld [vmem:[#allocation8 + $0x210] sm:$0xf0]  ;;  %v1924_v12 = vadd.f32 %v5873_v15, %v1911_v0  ;;  %2935 = vmatpush.bf16.msra.mxu3 %v4960_v20  ;;  %v4568_v15 = vor.u32 %v5396_v23, %v4567_v21  ;;  %v4520_v0 = vor.u32 %v5384_v58, %v4519_v57  ;;  %v5468_v20 = vld [vmem:[#allocation8 + $0x2f4] sm:$0xf0]  ;;  %v5471_v21 = vld [vmem:[#allocation8 + $0x30c] sm:$0xf0] }
 0x14b   :  { %2975 = vmatpush.bf16.msrb.mxu2 %v4820_v7  ;;  %v4728_v7 = vor.u32 %v5436_v61, %v4727_v60  ;;  %v4740_v10 = vor.u32 %v5437_v2, %v4737_v18  ;;  %v5416_v60 = vld [vmem:[#allocation8 + $0x154] sm:$0xf0]  ;;  %v5475_v2 = vld [vmem:[#allocation8 + $0x32c] sm:$0xf0]  ;;  %v4945_v57 = vld [vmem:[#allocation8 + $0x3b0] sm:$0xf0] }
 0x14c   :  { %2950 = vmatpush.bf16.msrb.mxu0 %v4548_v19  ;;  %v1938_v59 = vpop.f32.mrf.mxu2  ;;  %v4583_v19 = vld [vmem:[#allocation8 + $0xc8] sm:$0xf]  ;;  %v1937_v28 = vadd.f32 %v5875_v30, %v1924_v12  ;;  %v4911_v30 = vld [vmem:[#allocation8 + $0x360] sm:$0xf]  ;;  %v4648_v18 = vor.u32 %v5416_v60, %v4647_v37  ;;  %v5394_v37 = vld [vmem:[#allocation8 + $0xac] sm:$0xf] }
 0x14d   :  { %v4584_v11 = vor.u32 %v5400_v26, %v4583_v19  ;;  %v5412_v19 = vld [vmem:[#allocation8 + $0x134] sm:$0xf0]  ;;  %v4855_v26 = vld [vmem:[#allocation8 + $0x2e8] sm:$0xf]  ;;  %v4569_v60 = vld [vmem:[#allocation8 + $0xb8] sm:$0xf0] }
 0x14e   :  { %2963 = vmatpush.bf16.msrb.mxu1 %v4676_v22  ;;  %v4711_v22 = vld [vmem:[#allocation8 + $0x1c8] sm:$0xf]  ;;  %v1950_v24 = vadd.f32 %v5877_v31, %v1937_v28  ;;  %v5479_v31 = vld [vmem:[#allocation8 + $0x34c] sm:$0xf0]  ;;  %v4632_v23 = vor.u32 %v5412_v19, %v4631_v5  ;;  %v5422_v19 = vld [vmem:[#allocation8 + $0x18c] sm:$0xf] }
 0x14f   :  { %2976 = vmatpush.bf16.msrb.mxu2 %v4804_v16  ;;  %v1951_v62 = vpop.f32.mrf.mxu3  ;;  %v5491_v16 = vld [vmem:[#allocation8 + $0x3ac] sm:$0xf0]  ;;  %v4896_v59 = vor.u32 %v5479_v31, %v4895_v53  ;;  %v5460_v53 = vld [vmem:[#allocation8 + $0x2b4] sm:$0xf0]  ;;  %v4964_v31 = vor.u32 %v5493_v32, %v4961_v47 }
 0x150   :  { %2951 = vmatpush.bf16.msrb.mxu0 %v4532_v17  ;;  %v4712_v17 = vor.u32 %v5432_v9, %v4711_v22  ;;  %v4487_v9 = vld [vmem:[#allocation8 + $0x8] sm:$0xf] }
 0x152   :  { %2964 = vmatpush.bf16.msrb.mxu1 %v4660_v25  ;;  %v4944_v25 = vor.u32 %v5491_v16, %v4943_v14  ;;  %v4615_v16 = vld [vmem:[#allocation8 + $0x108] sm:$0xf] }
 0x153   :  { %2977 = vmatpush.bf16.msrb.mxu2 %v4788_v33  ;;  %v5487_v33 = vld [vmem:[#allocation8 + $0x38c] sm:$0xf0] }
 0x154   :  { %2952 = vmatpush.bf16.msrb.mxu0 %v4516_v34  ;;  %2936 = vmatpush.bf16.msra.mxu3 %v4944_v25  ;;  %v4696_v34 = vor.u32 %v5428_v8, %v4695_v27  ;;  %v4856_v25 = vor.u32 %v5468_v20, %v4855_v26  ;;  %v5408_v27 = vld [vmem:[#allocation8 + $0x114] sm:$0xf0]  ;;  %v5402_v8 = vld [vmem:[#allocation8 + $0xec] sm:$0xf]  ;;  %v4681_v26 = vld [vmem:[#allocation8 + $0x198] sm:$0xf0] }
 0x155   :  { %v4791_v20 = vld [vmem:[#allocation8 + $0x268] sm:$0xf] }
 0x156   :  { %2965 = vmatpush.bf16.msrb.mxu1 %v4644_v36  ;;  %v4928_v36 = vor.u32 %v5487_v33, %v4927_v29  ;;  %v4601_v33 = vld [vmem:[#allocation8 + $0xf8] sm:$0xf0] }
 0x157   :  { %2978 = vmatpush.bf16.msrb.mxu2 %v4772_v48  ;;  %v4912_v48 = vor.u32 %v5483_v45, %v4911_v30  ;;  %v4616_v45 = vor.u32 %v5408_v27, %v4615_v16  ;;  %v4775_v27 = vld [vmem:[#allocation8 + $0x248] sm:$0xf] }
 0x158   :  { %2953 = vmatpush.bf16.msrb.mxu0 %v4500_v49  ;;  %2937 = vmatpush.bf16.msra.mxu3 %v4928_v36  ;;  %v4839_v36 = vld [vmem:[#allocation8 + $0x2c8] sm:$0xf] }
 0x15a   :  { %2966 = vmatpush.bf16.msrb.mxu1 %v4628_v51 }
 0x15b   :  { %2979 = vmatpush.bf16.msrb.mxu2 %v4756_v63 }
 0x15c   :  { %2954 = vmatpush.bf16.msrb.mxu0 %v4484_v1  ;;  %v1962_v49 = vpop.f32.mrf.mxu0  ;;  %2938 = vmatpush.bf16.msra.mxu3 %v4912_v48  ;;  %v4879_v1 = vld [vmem:[#allocation8 + $0x320] sm:$0xf] }
 0x15d   :  { %v1963_v50 = vadd.f32 %v1962_v49, %v1950_v24  ;;  %v4880_v6 = vor.u32 %v5475_v2, %v4879_v1  ;;  %v4840_v49 = vor.u32 %v5464_v39, %v4839_v36  ;;  %v5485_v2 = vld [vmem:[#allocation8 + $0x384] sm:$0xf] }
 0x15e   :  { %2967 = vmatpush.bf16.msrb.mxu1 %v4612_v3  ;;  %v1975_v51 = vpop.f32.mrf.mxu1  ;;  %v4503_v3 = vld [vmem:[#allocation8 + $0x28] sm:$0xf] }
 0x15f   :  { %2955 = vmatmul.bf16.vlgmr.msrb.gmra.mxu0 %v5869_v56  ;;  %2980 = vmatpush.bf16.msrb.mxu2 %v4740_v10  ;;  %v1976_v55 = vadd.f32 %v1975_v51, %v1963_v50  ;;  %v5376_v10 = vld [vmem:[#allocation8 + $0x14] sm:$0xf0]  ;;  %v5430_v50 = vld [vmem:[#allocation8 + $0x1cc] sm:$0xf]  ;;  %v4713_v51 = vld [vmem:[#allocation8 + $0x1d8] sm:$0xf0] }
 0x160   :  { %2999 = vmatpush.bf16.msra.mxu0 %v4600_v4  ;;  %2939 = vmatpush.bf16.msra.mxu3 %v4896_v59  ;;  %v5380_v4 = vld [vmem:[#allocation8 + $0x34] sm:$0xf0]  ;;  %v4716_v58 = vor.u32 %v5430_v50, %v4713_v51 }
 0x161   :  { %2968 = vmatmul.bf16.vlgmr.msrb.gmra.mxu1 %v5867_v54  ;;  %v4504_v14 = vor.u32 %v5380_v4, %v4503_v3  ;;  %v4572_v3 = vor.u32 %v5394_v37, %v4569_v60  ;;  %v5466_v37 = vld [vmem:[#allocation8 + $0x2ec] sm:$0xf]  ;;  %v4857_v60 = vld [vmem:[#allocation8 + $0x2f8] sm:$0xf0] }
 0x162   :  { %3012 = vmatpush.bf16.msra.mxu1 %v4728_v7 }
 0x164   :  { %3000 = vmatpush.bf16.msra.mxu0 %v4584_v11  ;;  %v1988_v61 = vpop.f32.mrf.mxu2  ;;  %v1964_v22 = vpop.f32.mrf.mxu0  ;;  %2940 = vmatpush.bf16.msra.mxu3 %v4880_v6  ;;  %v5390_v6 = vld [vmem:[#allocation8 + $0x8c] sm:$0xf] }
 0x165   :  { %v1989_v62 = vadd.f32 %v1988_v61, %v1976_v55  ;;  %v4588_v55 = vor.u32 %v5398_v44, %v4585_v38  ;;  %v5426_v61 = vld [vmem:[#allocation8 + $0x1ac] sm:$0xf]  ;;  %v5452_v22 = vld [vmem:[#allocation8 + $0x274] sm:$0xf0]  ;;  %v4881_v44 = vld [vmem:[#allocation8 + $0x330] sm:$0xf0] }
 0x166   :  { %3013 = vmatpush.bf16.msra.mxu1 %v4712_v17  ;;  %v1977_v12 = vpop.f32.mrf.mxu1  ;;  %v4863_v17 = vld [vmem:[#allocation8 + $0x300] sm:$0xf]  ;;  %v4792_v16 = vor.u32 %v5452_v22, %v4791_v20  ;;  %v4841_v20 = vld [vmem:[#allocation8 + $0x2d8] sm:$0xf0] }
 0x167   :  { %v2001_v63 = vpop.f32.mrf.mxu3  ;;  %v4864_v28 = vor.u32 %v5471_v21, %v4863_v17  ;;  %v5481_v12 = vld [vmem:[#allocation8 + $0x364] sm:$0xf]  ;;  %v5386_v17 = vld [vmem:[#allocation8 + $0x6c] sm:$0xf]  ;;  %v4537_v21 = vld [vmem:[#allocation8 + $0x78] sm:$0xf0] }
 0x168   :  { %3001 = vmatpush.bf16.msra.mxu0 %v4568_v15  ;;  %v2002_v7 = vadd.f32 %v2001_v63, %v1989_v62  ;;  %v5497_v15 = vld [vmem:[#allocation8 + $0x3e4] sm:$0xf]  ;;  %v4697_v62 = vld [vmem:[#allocation8 + $0x1b8] sm:$0xf0]  ;;  %v4807_v63 = vld [vmem:[#allocation8 + $0x288] sm:$0xf] }
 0x169   :  { %2941 = vmatpush.bf16.msra.mxu3 %v4864_v28  ;;  %v4980_v24 = vor.u32 %v5497_v15, %v4977_v35  ;;  %v4700_v4 = vor.u32 %v5426_v61, %v4697_v62  ;;  %v5477_v35 = vld [vmem:[#allocation8 + $0x344] sm:$0xf] }
 0x16a   :  { %3014 = vmatpush.bf16.msra.mxu1 %v4696_v34  ;;  %v2111_v11 = vmax.f32 %v2002_v7, 0.0  ;;  %v5434_v34 = vld [vmem:[#allocation8 + $0x1ec] sm:$0xf]  ;;  %v4553_v7 = vld [vmem:[#allocation8 + $0x98] sm:$0xf0] }
 0x16b   :  { %v4732_v48 = vor.u32 %v5434_v34, %v4729_v13  ;;  %v4897_v13 = vld [vmem:[#allocation8 + $0x350] sm:$0xf0] }
 0x16c   :  { %3002 = vmatpush.bf16.msra.mxu0 %v4552_v43  ;;  %v5887_v29 = vpack.c.bf16 %v2111_v11, %v2111_v11  ;;  %v1990_v40 = vpop.f32.mrf.mxu2  ;;  %v4488_v43 = vor.u32 %v5376_v10, %v4487_v9  ;;  %v4556_v10 = vor.u32 %v5390_v6, %v4553_v7  ;;  %v4913_v11 = vld [vmem:[#allocation8 + $0x370] sm:$0xf0]  ;;  %v4900_v32 = vor.u32 %v5477_v35, %v4897_v13  ;;  %v4617_v6 = vld [vmem:[#allocation8 + $0x118] sm:$0xf0] }
 0x16d   :  { %2986 = vmatpush.bf16.msrb.mxu3 %v4980_v24  ;;  %v4916_v28 = vor.u32 %v5481_v12, %v4913_v11  ;;  %v5382_v40 = vld [vmem:[#allocation8 + $0x4c] sm:$0xf]  ;;  %v4521_v24 = vld [vmem:[#allocation8 + $0x58] sm:$0xf0] }
 0x16e   :  { %3015 = vmatpush.bf16.msra.mxu1 %v4680_v46  ;;  %2929 = vmatmul.bf16.vlgmr.msra.gmra.mxu2 %v5887_v29  ;;  %v4604_v46 = vor.u32 %v5402_v8, %v4601_v33  ;;  %v5448_v8 = vld [vmem:[#allocation8 + $0x254] sm:$0xf0]  ;;  %v4540_v33 = vor.u32 %v5386_v17, %v4537_v21  ;;  %v4524_v47 = vor.u32 %v5382_v40, %v4521_v24  ;;  %v4825_v17 = vld [vmem:[#allocation8 + $0x2b8] sm:$0xf0]  ;;  %v5442_v24 = vld [vmem:[#allocation8 + $0x22c] sm:$0xf] }
 0x16f   :  { %v2003_v30 = vpop.f32.mrf.mxu3  ;;  %3025 = vmatpush.bf16.msra.mxu2 %v4856_v25  ;;  %v4665_v25 = vld [vmem:[#allocation8 + $0x178] sm:$0xf0]  ;;  %v4776_v39 = vor.u32 %v5448_v8, %v4775_v27 }
 0x170   :  { %3003 = vmatpush.bf16.msra.mxu0 %v4536_v42  ;;  %v4823_v42 = vld [vmem:[#allocation8 + $0x2a8] sm:$0xf]  ;;  %v4649_v30 = vld [vmem:[#allocation8 + $0x158] sm:$0xf0] }
 0x171   :  { %v4824_v59 = vor.u32 %v5460_v53, %v4823_v42  ;;  %2987 = vmatpush.bf16.msrb.mxu3 %v4964_v31  ;;  %v5378_v42 = vld [vmem:[#allocation8 + $0x2c] sm:$0xf]  ;;  %v4505_v53 = vld [vmem:[#allocation8 + $0x38] sm:$0xf0] }
 0x172   :  { %3016 = vmatpush.bf16.msra.mxu1 %v4664_v52  ;;  %v5489_v52 = vld [vmem:[#allocation8 + $0x3a4] sm:$0xf]  ;;  %v5410_v31 = vld [vmem:[#allocation8 + $0x12c] sm:$0xf]  ;;  %v4508_v61 = vor.u32 %v5378_v42, %v4505_v53 }
 0x173   :  { %3026 = vmatpush.bf16.msra.mxu2 %v4840_v49  ;;  %v4948_v1 = vor.u32 %v5489_v52, %v4945_v57  ;;  %v5473_v49 = vld [vmem:[#allocation8 + $0x324] sm:$0xf]  ;;  %v4743_v52 = vld [vmem:[#allocation8 + $0x208] sm:$0xf]  ;;  %v5440_v57 = vld [vmem:[#allocation8 + $0x214] sm:$0xf0] }
 0x174   :  { %3004 = vmatpush.bf16.msra.mxu0 %v4520_v0  ;;  %v5456_v0 = vld [vmem:[#allocation8 + $0x294] sm:$0xf0] }
 0x175   :  { %v4808_v5 = vor.u32 %v5456_v0, %v4807_v63  ;;  %2988 = vmatpush.bf16.msrb.mxu3 %v4948_v1  ;;  %v5469_v63 = vld [vmem:[#allocation8 + $0x304] sm:$0xf]  ;;  %v4865_v0 = vld [vmem:[#allocation8 + $0x310] sm:$0xf0] }
 0x176   :  { %3017 = vmatpush.bf16.msra.mxu1 %v4648_v18  ;;  %v4929_v18 = vld [vmem:[#allocation8 + $0x390] sm:$0xf0]  ;;  %v4868_v7 = vor.u32 %v5469_v63, %v4865_v0  ;;  %v4935_v63 = vld [vmem:[#allocation8 + $0x388] sm:$0xf]  ;;  %v5488_v0 = vld [vmem:[#allocation8 + $0x394] sm:$0xf0] }
 0x177   :  { %3027 = vmatpush.bf16.msra.mxu2 %v4824_v59  ;;  %v4932_v9 = vor.u32 %v5485_v2, %v4929_v18  ;;  %v4744_v2 = vor.u32 %v5440_v57, %v4743_v52  ;;  %v5374_v18 = vld [vmem:[#allocation8 + $0xc] sm:$0xf]  ;;  %v4967_v52 = vld [vmem:[#allocation8 + $0x3c8] sm:$0xf]  ;;  %v5496_v57 = vld [vmem:[#allocation8 + $0x3d4] sm:$0xf0] }
 0x178   :  { %3005 = vmatpush.bf16.msra.mxu0 %v4504_v14  ;;  %v4684_v14 = vor.u32 %v5422_v19, %v4681_v26  ;;  %v380_v19 = vperm.slane %v5879_v41, 3  ;;  %v5462_v26 = vld [vmem:[#allocation8 + $0x2cc] sm:$0xf] }
 0x179   :  { %2989 = vmatpush.bf16.msrb.mxu3 %v4932_v9  ;;  %v4844_v11 = vor.u32 %v5462_v26, %v4841_v20 }
 0x17a   :  { %3018 = vmatpush.bf16.msra.mxu1 %v4632_v23  ;;  %v5418_v23 = vld [vmem:[#allocation8 + $0x16c] sm:$0xf] }
 0x17b   :  { %3028 = vmatpush.bf16.msra.mxu2 %v4808_v5  ;;  %v4668_v36 = vor.u32 %v5418_v23, %v4665_v25  ;;  %v5406_v5 = vld [vmem:[#allocation8 + $0x10c] sm:$0xf]  ;;  %v4809_v25 = vld [vmem:[#allocation8 + $0x298] sm:$0xf0] }
 0x17c   :  { %3006 = vmatpush.bf16.msra.mxu0 %v4488_v43  ;;  %v5893_v15 = vpop.f32.mrf.mxu0  ;;  %v5414_v43 = vld [vmem:[#allocation8 + $0x14c] sm:$0xf] }
 0x17d   :  { %2990 = vmatpush.bf16.msrb.mxu3 %v4916_v28  ;;  %v4652_v38 = vor.u32 %v5414_v43, %v4649_v30  ;;  %v5454_v23 = vld [vmem:[#allocation8 + $0x28c] sm:$0xf]  ;;  %v4761_v43 = vld [vmem:[#allocation8 + $0x238] sm:$0xf0] }
 0x17e   :  { %3019 = vmatpush.bf16.msra.mxu1 %v4616_v45  ;;  %2981 = vmatmul.bf16.vlgmr.msrb.gmra.mxu2 %v5887_v29  ;;  %v5895_v34 = vpop.f32.mrf.mxu1  ;;  %v4759_v45 = vld [vmem:[#allocation8 + $0x228] sm:$0xf]  ;;  %v4812_v27 = vor.u32 %v5454_v23, %v4809_v25  ;;  %v5450_v28 = vld [vmem:[#allocation8 + $0x26c] sm:$0xf] }
 0x17f   :  { %3007 = vmatmul.bf16.vlgmr.msra.gmra.mxu0 %v5869_v56  ;;  %3029 = vmatpush.bf16.msra.mxu2 %v4792_v16  ;;  %v5458_v16 = vld [vmem:[#allocation8 + $0x2ac] sm:$0xf] }
 0x180   :  { %3051 = vmatpush.bf16.msrb.mxu0 %v4604_v46  ;;  %v5444_v46 = vld [vmem:[#allocation8 + $0x234] sm:$0xf0]  ;;  %v4828_v41 = vor.u32 %v5458_v16, %v4825_v17 }
 0x181   :  { %3020 = vmatmul.bf16.vlgmr.msra.gmra.mxu1 %v5867_v54  ;;  %v4760_v50 = vor.u32 %v5444_v46, %v4759_v45  ;;  %2991 = vmatpush.bf16.msrb.mxu3 %v4900_v32  ;;  %v4764_v45 = vor.u32 %v5442_v24, %v4761_v43  ;;  %v5472_v16 = vld [vmem:[#allocation8 + $0x314] sm:$0xf0] }
 0x182   :  { %3064 = vmatpush.bf16.msrb.mxu1 %v4732_v48 }
 0x183   :  { %3030 = vmatpush.bf16.msra.mxu2 %v4776_v39  ;;  %v4777_v39 = vld [vmem:[#allocation8 + $0x258] sm:$0xf0] }
 0x184   :  { %3052 = vmatpush.bf16.msrb.mxu0 %v4588_v55  ;;  %v5897_v48 = vpop.f32.mrf.mxu2  ;;  %v4633_v55 = vld [vmem:[#allocation8 + $0x138] sm:$0xf0]  ;;  %v2016_v59 = vpop.f32.mrf.mxu0 }
 0x185   :  { %v4636_v1 = vor.u32 %v5410_v31, %v4633_v55 }
 0x186   :  { %3065 = vmatpush.bf16.msrb.mxu1 %v4716_v58  ;;  %v4884_v58 = vor.u32 %v5473_v49, %v4881_v44  ;;  %v2029_v62 = vpop.f32.mrf.mxu1  ;;  %v4745_v49 = vld [vmem:[#allocation8 + $0x218] sm:$0xf0] }
 0x187   :  { %v2053_v51 = vpop.f32.mrf.mxu3  ;;  %3031 = vmatpush.bf16.msra.mxu2 %v4760_v50  ;;  %v4983_v50 = vld [vmem:[#allocation8 + $0x3e8] sm:$0xf] }
 0x188   :  { %3053 = vmatpush.bf16.msrb.mxu0 %v4572_v3  ;;  %v4489_v3 = vld [vmem:[#allocation8 + $0x18] sm:$0xf0]  ;;  %2992 = vmatpush.bf16.msrb.mxu3 %v4884_v58 }
 0x189   :  { %v4492_v22 = vor.u32 %v5374_v18, %v4489_v3  ;;  %v4919_v18 = vld [vmem:[#allocation8 + $0x368] sm:$0xf]  ;;  %v5484_v3 = vld [vmem:[#allocation8 + $0x374] sm:$0xf0] }
 0x18a   :  { %3066 = vmatpush.bf16.msrb.mxu1 %v4700_v4  ;;  %v4860_v4 = vor.u32 %v5466_v37, %v4857_v60  ;;  %v4968_v37 = vor.u32 %v5496_v57, %v4967_v52  ;;  %v4951_v60 = vld [vmem:[#allocation8 + $0x3a8] sm:$0xf] }
 0x18b   :  { %3032 = vmatpush.bf16.msra.mxu2 %v4744_v2  ;;  %v4936_v2 = vor.u32 %v5488_v0, %v4935_v63  ;;  %v5506_v0 = vld [vmem:[#allocation11 + $0x28] sm:$0xff] }
 0x18c   :  { %3054 = vmatpush.bf16.msrb.mxu0 %v4556_v10  ;;  %v2042_v9 = vpop.f32.mrf.mxu2  ;;  %v4620_v10 = vor.u32 %v5406_v5, %v4617_v6  ;;  %2993 = vmatpush.bf16.msrb.mxu3 %v4868_v7  ;;  %v4920_v5 = vor.u32 %v5484_v3, %v4919_v18  ;;  %v4903_v7 = vld [vmem:[#allocation8 + $0x348] sm:$0xf]  ;;  %v5516_v18 = vld [vmem:[#allocation11 + $0x78] sm:$0xff] }
 0x18d   :  { %v4887_v9 = vld [vmem:[#allocation8 + $0x328] sm:$0xf] }
 0x18e   :  { %3067 = vmatpush.bf16.msrb.mxu1 %v4684_v14  ;;  %v2015_v14 = vadd.f32 %v5893_v15, %v380_v19  ;;  %3033 = vmatmul.bf16.vlgmr.msra.gmra.mxu2 %v5887_v29  ;;  %v4793_v15 = vld [vmem:[#allocation8 + $0x278] sm:$0xf0]  ;;  %v5480_v19 = vld [vmem:[#allocation8 + $0x354] sm:$0xf0]  ;;  %v5505_v3 = vld [vmem:[#allocation11 + $0x20] sm:$0xff] }
 0x18f   :  { %v2055_v12 = vpop.f32.mrf.mxu3  ;;  %3077 = vmatpush.bf16.msrb.mxu2 %v4860_v4 }
 0x190   :  { %3055 = vmatpush.bf16.msrb.mxu0 %v4540_v33  ;;  %v2028_v21 = vadd.f32 %v5895_v34, %v2015_v14  ;;  %v4796_v33 = vor.u32 %v5450_v28, %v4793_v15  ;;  %v4871_v14 = vld [vmem:[#allocation8 + $0x308] sm:$0xf]  ;;  %v5490_v15 = vld [vmem:[#allocation8 + $0x3ac] sm:$0xf] }
 0x191   :  { %v4872_v23 = vor.u32 %v5472_v16, %v4871_v14 }
 0x192   :  { %3068 = vmatpush.bf16.msrb.mxu1 %v4668_v36  ;;  %v2041_v8 = vadd.f32 %v5897_v48, %v2028_v21  ;;  %v5446_v36 = vld [vmem:[#allocation8 + $0x24c] sm:$0xf]  ;;  %v4985_v21 = vld [vmem:[#allocation8 + $0x3f8] sm:$0xf0] }
 0x193   :  { %3078 = vmatpush.bf16.msrb.mxu2 %v4844_v11  ;;  %v5438_v48 = vld [vmem:[#allocation8 + $0x20c] sm:$0xf] }
 0x194   :  { %3056 = vmatpush.bf16.msrb.mxu0 %v4524_v47  ;;  %v2054_v35 = vadd.f32 %v2053_v51, %v2041_v8  ;;  %v5500_v51 = vld [vmem:[#allocation8 + $0x3f4] sm:$0xf0]  ;;  %v4748_v42 = vor.u32 %v5438_v48, %v4745_v49  ;;  %v4969_v8 = vld [vmem:[#allocation8 + $0x3d8] sm:$0xf0]  ;;  %v5474_v48 = vld [vmem:[#allocation8 + $0x32c] sm:$0xf] }
 0x195   :  { %v4984_v31 = vor.u32 %v5500_v51, %v4983_v50  ;;  %v4889_v49 = vld [vmem:[#allocation8 + $0x338] sm:$0xf0]  ;;  %v5470_v50 = vld [vmem:[#allocation8 + $0x30c] sm:$0xf] }
 0x196   :  { %3069 = vmatpush.bf16.msrb.mxu1 %v4652_v38  ;;  %v4873_v51 = vld [vmem:[#allocation8 + $0x318] sm:$0xf0] }
 0x197   :  { %3079 = vmatpush.bf16.msrb.mxu2 %v4828_v41  ;;  %v5498_v41 = vld [vmem:[#allocation8 + $0x3ec] sm:$0xf] }
 0x198   :  { %3057 = vmatpush.bf16.msrb.mxu0 %v4508_v61  ;;  %v5492_v61 = vld [vmem:[#allocation8 + $0x3b4] sm:$0xf0]  ;;  %v4988_v25 = vor.u32 %v5498_v41, %v4985_v21  ;;  %v5524_v41 = vld [vmem:[#allocation11 + $0xb8] sm:$0xff] }
 0x199   :  { %v4952_v62 = vor.u32 %v5492_v61, %v4951_v60  ;;  %v5507_v61 = vld [vmem:[#allocation11 + $0x30] sm:$0xff] }
 0x19a   :  { %3070 = vmatpush.bf16.msrb.mxu1 %v4636_v1  ;;  %v5910_v1 = vld [vmem:[#allocation10] sm:$0xf] }
 0x19b   :  { %3080 = vmatpush.bf16.msrb.mxu2 %v4812_v27  ;;  %v2247_v4 = vperm.slane %v5910_v1, 0  ;;  %v5494_v27 = vld [vmem:[#allocation8 + $0x3cc] sm:$0xf] }
 0x19c   :  { %3058 = vmatpush.bf16.msrb.mxu0 %v4492_v22  ;;  %v2066_v13 = vpop.f32.mrf.mxu0  ;;  %v4904_v22 = vor.u32 %v5480_v19, %v4903_v7  ;;  %v4972_v28 = vor.u32 %v5494_v27, %v4969_v8  ;;  %v2250_v19 = vperm.slane %v5910_v1, 3  ;;  %v5510_v8 = vld [vmem:[#allocation11 + $0x48] sm:$0xff] }
 0x19d   :  { %v2067_v34 = vadd.f32 %v2066_v13, %v2054_v35  ;;  %v5486_v13 = vld [vmem:[#allocation8 + $0x38c] sm:$0xf] }
 0x19e   :  { %3071 = vmatpush.bf16.msrb.mxu1 %v4620_v10  ;;  %v2079_v40 = vpop.f32.mrf.mxu1  ;;  %v5476_v10 = vld [vmem:[#allocation8 + $0x334] sm:$0xf0] }
 0x19f   :  { %3059 = vmatmul.bf16.vlgmr.msrb.gmra.mxu0 %v5869_v56  ;;  %3081 = vmatpush.bf16.msrb.mxu2 %v4796_v33  ;;  %v4780_v56 = vor.u32 %v5446_v36, %v4777_v39  ;;  %v2080_v30 = vadd.f32 %v2079_v40, %v2067_v34  ;;  %v4888_v12 = vor.u32 %v5476_v10, %v4887_v9  ;;  %v4953_v33 = vld [vmem:[#allocation8 + $0x3b8] sm:$0xf0]  ;;  %v5482_v40 = vld [vmem:[#allocation8 + $0x36c] sm:$0xf] }
 0x1a0   :  { %v4956_v35 = vor.u32 %v5490_v15, %v4953_v33  ;;  %v4937_v36 = vld [vmem:[#allocation8 + $0x398] sm:$0xf0]  ;;  %v5509_v15 = vld [vmem:[#allocation11 + $0x40] sm:$0xff] }
 0x1a1   :  { %3072 = vmatmul.bf16.vlgmr.msrb.gmra.mxu1 %v5867_v54  ;;  %v4940_v39 = vor.u32 %v5486_v13, %v4937_v36  ;;  %v4921_v34 = vld [vmem:[#allocation8 + $0x378] sm:$0xf0]  ;;  %v5521_v33 = vld [vmem:[#allocation11 + $0xa0] sm:$0xff]  ;;  %v5519_v13 = vld [vmem:[#allocation11 + $0x90] sm:$0xff] }
 0x1a2   :  { %v4924_v24 = vor.u32 %v5482_v40, %v4921_v34  ;;  %3384 = vmatpush.bf16.msra.mxu1 %v5516_v18 }
 0x1a3   :  { %3082 = vmatpush.bf16.msrb.mxu2 %v4780_v56  ;;  %v2248_v56 = vperm.slane %v5910_v1, 1 }
 0x1a4   :  { %v2092_v54 = vpop.f32.mrf.mxu2  ;;  %v2068_v47 = vpop.f32.mrf.mxu0 }
 0x1a5   :  { %v2093_v46 = vadd.f32 %v2092_v54, %v2080_v30  ;;  %v2105_v32 = vpop.f32.mrf.mxu3  ;;  %v5478_v30 = vld [vmem:[#allocation8 + $0x34c] sm:$0xf]  ;;  %v4905_v54 = vld [vmem:[#allocation8 + $0x358] sm:$0xf0] }
 0x1a6   :  { %v2081_v44 = vpop.f32.mrf.mxu1  ;;  %v4908_v47 = vor.u32 %v5478_v30, %v4905_v54  ;;  %v5532_v30 = vld [vmem:[#allocation11 + $0xf8] sm:$0xff] }
 0x1a7   :  { %v2106_v38 = vadd.f32 %v2105_v32, %v2093_v46  ;;  %3083 = vmatpush.bf16.msrb.mxu2 %v4764_v45  ;;  %v4892_v44 = vor.u32 %v5474_v48, %v4889_v49  ;;  %v5529_v49 = vld [vmem:[#allocation11 + $0xe0] sm:$0xff] }
 0x1a9   :  { %v2112_v53 = vmax.f32 %v2106_v38, 0.0 }
 0x1ab   :  { %v5906_v55 = vpack.c.bf16 %v2112_v53, %v2112_v53  ;;  %3084 = vmatpush.bf16.msrb.mxu2 %v4748_v42  ;;  %v4876_v53 = vor.u32 %v5470_v50, %v4873_v51  ;;  %v5528_v50 = vld [vmem:[#allocation11 + $0xd8] sm:$0xff] }
 0x1ac   :  { %v2094_v58 = vpop.f32.mrf.mxu2 }
 0x1ad   :  { %v2107_v59 = vpop.f32.mrf.mxu3  ;;  %2942 = vmatmul.bf16.vlgmr.msra.gmra.mxu3 %v5906_v55 }
 0x1ae   :  { %3038 = vmatpush.bf16.msra.mxu3 %v4984_v31  ;;  %3085 = vmatmul.bf16.vlgmr.msrb.gmra.mxu2 %v5887_v29  ;;  %v2249_v31 = vperm.slane %v5910_v1, 2  ;;  %v5511_v1 = vld [vmem:[#allocation11 + $0x50] sm:$0xff] }
 0x1af   :  { %3397 = vmatpush.bf16.msra.mxu2 %v5524_v41 }
 0x1b2   :  { %3039 = vmatpush.bf16.msra.mxu3 %v4968_v37  ;;  %v5508_v37 = vld [vmem:[#allocation11 + $0x38] sm:$0xff] }
 0x1b3   :  { %3371 = vmatpush.bf16.msra.mxu0 %v5508_v37 }
 0x1b6   :  { %3040 = vmatpush.bf16.msra.mxu3 %v4952_v62 }
 0x1b7   :  { %3372 = vmatpush.bf16.msra.mxu0 %v5507_v61 }
 0x1ba   :  { %3041 = vmatpush.bf16.msra.mxu3 %v4936_v2 }
 0x1bb   :  { %3373 = vmatpush.bf16.msra.mxu0 %v5506_v0 }
 0x1bc   :  { %v2904_v6 = vpop.f32.mrf.mxu0 }
 0x1bd   :  { %v2905_v29 = vadd.f32 %v2904_v6, %v2247_v4  ;;  %2994 = vmatmul.bf16.vlgmr.msrb.gmra.mxu3 %v5906_v55  ;;  %v5503_v6 = vld [vmem:[#allocation11 + $0x10] sm:$0xff] }
 0x1be   :  { %v2917_v26 = vpop.f32.mrf.mxu1  ;;  %3042 = vmatpush.bf16.msra.mxu3 %v4920_v5  ;;  %v5504_v5 = vld [vmem:[#allocation11 + $0x18] sm:$0xff] }
 0x1bf   :  { %v5914_v20 = vadd.f32 %v2917_v26, %v2905_v29  ;;  %3374 = vmatpush.bf16.msra.mxu0 %v5505_v3  ;;  %v5502_v29 = vld [vmem:[#allocation11 + $0x8] sm:$0xff] }
 0x1c0   :  { %v5514_v26 = vld [vmem:[#allocation11 + $0x68] sm:$0xff] }
 0x1c2   :  { %3043 = vmatpush.bf16.msra.mxu3 %v4904_v22 }
 0x1c3   :  { %3375 = vmatpush.bf16.msra.mxu0 %v5504_v5 }
 0x1c4   :  { %v2906_v11 = vpop.f32.mrf.mxu0 }
 0x1c5   :  { %v5513_v11 = vld [vmem:[#allocation11 + $0x60] sm:$0xff] }
 0x1c6   :  { %v2919_v17 = vpop.f32.mrf.mxu1  ;;  %3044 = vmatpush.bf16.msra.mxu3 %v4888_v12  ;;  %v5501_v12 = vld [vmem:[#allocation11] sm:$0xff] }
 0x1c7   :  { %3376 = vmatpush.bf16.msra.mxu0 %v5503_v6  ;;  %v5512_v17 = vld [vmem:[#allocation11 + $0x58] sm:$0xff] }
 0x1ca   :  { %3045 = vmatpush.bf16.msra.mxu3 %v4872_v23  ;;  %v5523_v23 = vld [vmem:[#allocation11 + $0xb0] sm:$0xff] }
 0x1cb   :  { %3377 = vmatpush.bf16.msra.mxu0 %v5502_v29  ;;  %3398 = vmatpush.bf16.msra.mxu2 %v5523_v23  ;;  %v5544_v29 = vld [vmem:[%s5949_s6] ss:$0 sm:$0xff]  ;;  %s3440_s6 = sshll.u32 %s5950_s7, 4  ;;  %s3441_s6 = int_to_ptr.hbm [resolvable:$true] %s3440_s6 }
 0x1cd   :  { %3046 = vmatmul.bf16.vlgmr.msra.gmra.mxu3 %v5906_v55 }
 0x1ce   :  { %3090 = vmatpush.bf16.msrb.mxu3 %v4988_v25 }
 0x1cf   :  { %3378 = vmatpush.bf16.msra.mxu0 %v5501_v12 }
 0x1d2   :  { %3091 = vmatpush.bf16.msrb.mxu3 %v4972_v28  ;;  %v5522_v28 = vld [vmem:[#allocation11 + $0xa8] sm:$0xff] }
 0x1d3   :  { %3399 = vmatpush.bf16.msra.mxu2 %v5522_v28 }
 0x1d6   :  { %3092 = vmatpush.bf16.msrb.mxu3 %v4956_v35  ;;  %v5520_v35 = vld [vmem:[#allocation11 + $0x98] sm:$0xff] }
 0x1d7   :  { %3400 = vmatpush.bf16.msra.mxu2 %v5521_v33 }
 0x1da   :  { %3093 = vmatpush.bf16.msrb.mxu3 %v4940_v39  ;;  %v5518_v39 = vld [vmem:[#allocation11 + $0x88] sm:$0xff] }
 0x1db   :  { %3401 = vmatpush.bf16.msra.mxu2 %v5520_v35 }
 0x1dc   :  { %v2956_v43 = vpop.f32.mrf.mxu0 }
 0x1dd   :  { %v2957_v45 = vadd.f32 %v2956_v43, %v2248_v56  ;;  %v5517_v43 = vld [vmem:[#allocation11 + $0x80] sm:$0xff] }
 0x1de   :  { %v2969_v46 = vpop.f32.mrf.mxu1  ;;  %3094 = vmatpush.bf16.msrb.mxu3 %v4924_v24 }
 0x1df   :  { %v5918_v32 = vadd.f32 %v2969_v46, %v2957_v45  ;;  %3402 = vmatpush.bf16.msra.mxu2 %v5519_v13  ;;  %v5531_v45 = vld [vmem:[#allocation11 + $0xf0] sm:$0xff] }
 0x1e2   :  { %3095 = vmatpush.bf16.msrb.mxu3 %v4908_v47  ;;  %v5530_v47 = vld [vmem:[#allocation11 + $0xe8] sm:$0xff] }
 0x1e3   :  { %3403 = vmatpush.bf16.msra.mxu2 %v5518_v39 }
 0x1e4   :  { %v2958_v38 = vpop.f32.mrf.mxu0 }
 0x1e6   :  { %v2971_v42 = vpop.f32.mrf.mxu1  ;;  %3096 = vmatpush.bf16.msrb.mxu3 %v4892_v44 }
 0x1e7   :  { %3404 = vmatpush.bf16.msra.mxu2 %v5517_v43 }
 0x1ea   :  { %3097 = vmatpush.bf16.msrb.mxu3 %v4876_v53  ;;  %v5527_v53 = vld [vmem:[#allocation11 + $0xd0] sm:$0xff] }
 0x1ed   :  { %3098 = vmatmul.bf16.vlgmr.msrb.gmra.mxu3 %v5906_v55  ;;  %v5515_v55 = vld [vmem:[#allocation11 + $0x70] sm:$0xff] }
 0x1ee   :  { %3385 = vmatpush.bf16.msra.mxu1 %v5515_v55  ;;  %3410 = vmatpush.bf16.msra.mxu3 %v5532_v30 }
 0x1f1   :  { %v5922_v52 = vpop.f32.mrf.mxu2 }
 0x1f2   :  { %3386 = vmatpush.bf16.msra.mxu1 %v5514_v26  ;;  %v2931_v36 = vadd.f32 %v5922_v52, %v5914_v20  ;;  %3411 = vmatpush.bf16.msra.mxu3 %v5531_v45  ;;  %v5526_v52 = vld [vmem:[#allocation11 + $0xc8] sm:$0xff] }
 0x1f6   :  { %3387 = vmatpush.bf16.msra.mxu1 %v5513_v11  ;;  %3412 = vmatpush.bf16.msra.mxu3 %v5530_v47 }
 0x1f9   :  { %v2932_v62 = vpop.f32.mrf.mxu2 }
 0x1fa   :  { %3388 = vmatpush.bf16.msra.mxu1 %v5512_v17  ;;  %3413 = vmatpush.bf16.msra.mxu3 %v5529_v49 }
 0x1fc   :  { %v3008_v57 = vpop.f32.mrf.mxu0 }
 0x1fd   :  { %v3009_v58 = vadd.f32 %v3008_v57, %v2249_v31 }
 0x1fe   :  { %v3021_v59 = vpop.f32.mrf.mxu1  ;;  %3389 = vmatpush.bf16.msra.mxu1 %v5511_v1  ;;  %3414 = vmatpush.bf16.msra.mxu3 %v5528_v50 }
 0x1ff   :  { %v5924_v60 = vadd.f32 %v3021_v59, %v3009_v58  ;;  %v5525_v58 = vld [vmem:[#allocation11 + $0xc0] sm:$0xff] }
 0x201   :  { %v5926_v4 = vpop.f32.mrf.mxu2 }
 0x202   :  { %3390 = vmatpush.bf16.msra.mxu1 %v5510_v8  ;;  %v2983_v20 = vadd.f32 %v5926_v4, %v5918_v32  ;;  %3415 = vmatpush.bf16.msra.mxu3 %v5527_v53 }
 0x204   :  { %v3010_v63 = vpop.f32.mrf.mxu0 }
 0x206   :  { %v3023_v2 = vpop.f32.mrf.mxu1  ;;  %3391 = vmatpush.bf16.msra.mxu1 %v5509_v15  ;;  %3416 = vmatpush.bf16.msra.mxu3 %v5526_v52 }
 0x209   :  { %v2984_v7 = vpop.f32.mrf.mxu2 }
 0x20a   :  { %3417 = vmatpush.bf16.msra.mxu3 %v5525_v58 }
 0x211   :  { %v3034_v16 = vpop.f32.mrf.mxu2 }
 0x212   :  { %v3035_v57 = vadd.f32 %v3034_v16, %v5924_v60 }
 0x219   :  { %v3036_v27 = vpop.f32.mrf.mxu2 }
 0x21c   :  { %v3060_v22 = vpop.f32.mrf.mxu0 }
 0x21d   :  { %v3061_v9 = vadd.f32 %v3060_v22, %v2250_v19 }
 0x21e   :  { %v3073_v10 = vpop.f32.mrf.mxu1 }
 0x21f   :  { %v5929_v14 = vadd.f32 %v3073_v10, %v3061_v9 }
 0x224   :  { %v3062_v21 = vpop.f32.mrf.mxu0 }
 0x226   :  { %v3075_v25 = vpop.f32.mrf.mxu1 }
 0x230   :  { %v2943_v40 = vpop.f32.mrf.mxu3 }
 0x231   :  { %v2944_v34 = vadd.f32 %v2943_v40, %v2931_v36  ;;  %v3086_v56 = vpop.f32.mrf.mxu2 }
 0x232   :  { %v3087_v63 = vadd.f32 %v3086_v56, %v5929_v14 }
 0x233   :  { %v3103_v24 = vmax.f32 %v2944_v34, 0.0 }
 0x235   :  { %v3107_v54 = vpack.c.bf16 %v3103_v24, %v3103_v24 }
 0x237   :  { %3379 = vmatmul.bf16.vlgmr.msra.gmra.mxu0 %v3107_v54 }
 0x238   :  { %v2945_v46 = vpop.f32.mrf.mxu3 }
 0x239   :  { %v3088_v48 = vpop.f32.mrf.mxu2 }
 0x240   :  { %v2995_v44 = vpop.f32.mrf.mxu3 }
 0x241   :  { %v2996_v38 = vadd.f32 %v2995_v44, %v2983_v20 }
 0x243   :  { %v3104_v51 = vmax.f32 %v2996_v38, 0.0 }
 0x245   :  { %v3108_v42 = vpack.c.bf16 %v3104_v51, %v3104_v51 }
 0x247   :  { %3392 = vmatmul.bf16.vlgmr.msra.gmra.mxu1 %v3108_v42 }
 0x248   :  { %v2997_v31 = vpop.f32.mrf.mxu3 }
 0x250   :  { %v3047_v59 = vpop.f32.mrf.mxu3 }
 0x251   :  { %v3048_v37 = vadd.f32 %v3047_v59, %v3035_v57 }
 0x253   :  { %v3105_v32 = vmax.f32 %v3048_v37, 0.0 }
 0x255   :  { %v3109_v61 = vpack.c.bf16 %v3105_v32, %v3105_v32 }
 0x257   :  { %3405 = vmatmul.bf16.vlgmr.msra.gmra.mxu2 %v3109_v61 }
 0x258   :  { %v3049_v62 = vpop.f32.mrf.mxu3 }
 0x270   :  { %v3099_v0 = vpop.f32.mrf.mxu3 }
 0x271   :  { %v3100_v2 = vadd.f32 %v3099_v0, %v3087_v63 }
 0x273   :  { %v3106_v18 = vmax.f32 %v3100_v2, 0.0 }
 0x275   :  { %v3110_v55 = vpack.c.bf16 %v3106_v18, %v3106_v18 }
 0x277   :  { %3418 = vmatmul.bf16.vlgmr.msra.gmra.mxu3 %v3110_v55 }
 0x278   :  { %v3101_v3 = vpop.f32.mrf.mxu3 }
 0x2b4   :  { %v3380_v4 = vpop.f32.mrf.mxu0 }
 0x2b5   :  { %v3381_v26 = vadd.f32 %v5544_v29, %v3380_v4 }
 0x2bc   :  { %v3382_v5 = vpop.f32.mrf.mxu0 }
 0x2c4   :  { %v3393_v6 = vpop.f32.mrf.mxu1 }
 0x2c5   :  { %v3394_v22 = vadd.f32 %v3393_v6, %v3381_v26 }
 0x2cc   :  { %v3395_v60 = vpop.f32.mrf.mxu1 }
 0x2da   :  { %v3406_v7 = vpop.f32.mrf.mxu2 }
 0x2db   :  { %v3407_v9 = vadd.f32 %v3406_v7, %v3394_v22 }
 0x2e2   :  { %v3408_v19 = vpop.f32.mrf.mxu2 }
 0x2fa   :  { %v3419_v10 = vpop.f32.mrf.mxu3 }
 0x2fb   :  { %v3420_v12 = vadd.f32 %v3419_v10, %v3407_v9 }
 0x2fd   :  { %3423 = vmax.xlane.f32.xlu0 %v3420_v12 }
 0x302   :  { %v3421_v11 = vpop.f32.mrf.mxu3 }
 0x370   :  { %v3424_v14 = vpop.xlane.xlu0 %3423 }
 0x371   :  { %v3425_v16 = vsub.f32 %v3420_v12, %v3424_v14 }
 0x373   :  { %v3426_v17 = vmul.f32 1.442695, %v3425_v16 }
 0x375   :  { %5545 = vpow2.f32 %v3426_v17 }
 0x37b   :  { %v5546_v41 = vpop.eup %5545 }
 0x37c   :  { %3428 = vadd.xlane.f32.xlu0 %v5546_v41 }
 0x3ef   :  { %v3429_v21 = vpop.xlane.xlu0 %3428 }
 0x3f0   :  { %5547 = vrcp.f32 %v3429_v21 }
 0x3f6   :  { %v5548_v1 = vpop.eup %5547 }
 0x3f7   :  { %v3431_v23 = vmul.f32 %v5548_v1, %v5546_v41 }
 0x3f9   :  { %3432 = vst [vmem:[#allocation13] sm:$0xff] %v3431_v23 }
 0x3fa   :  { %3443 = dma.vmem_to_hbm [thread:$0]  %s3439_s9, 128, %s3441_s6, [#allocation4]  }
 0x3fb   :  { %5726 = dma.done.wait [#allocation4], 128  }
 0x3fc   :  { %5727 = vsyncadd [#allocation4], 4294967168 }
 0x3fd   :  { %3448 = vsyncpa [#allocation3], 1 }
 0x3fe   :  { %3449 = vsyncpa [#allocation6], 1 }
 0x3ff   :  { %3450 = vsyncpa [#allocation9], 1 }
 0x400   :  { %3451 = vsyncpa [#allocation12], 1 }
 0x401   :  { %3452 = vsyncpa [#allocation4], 1 }

</bundles_post_ra>
